<compile_context>
chip_gen: v6e
topology: v6e:2x2x1
jax: 0.10.0
libtpu: 0.0.40
codegen_flags: <defaults>
</compile_context>

<pallas_src>
import functools

import jax
import jax.numpy as jnp
import numpy as np
from jax.experimental import pallas as pl
from jax.experimental.pallas import tpu as pltpu

LEAKY_ALPHA = 0.01
BN_EPS = 1e-5


def _leaky(x):
    return jnp.where(x >= 0, x, LEAKY_ALPHA * x)


def _conv_h3(t, w_ref, bias, h):
    """(3,1) 'same' conv along H on a w-major (G*h, D) slab (G groups of h rows).

    Neighbours along H are +/-1 rows.  pltpu.roll builds the shifted operands on
    the (otherwise idle) XLU; an iota mask supplies the zero padding at the
    h == 0 / h == h-1 group boundaries.
    """
    rows, d = t.shape
    hh = jax.lax.broadcasted_iota(jnp.int32, (rows, d), 0) % h
    acc = jnp.dot(t, w_ref[1], preferred_element_type=jnp.float32) + bias
    up = jnp.where(hh == 0, 0.0, pltpu.roll(t, shift=1, axis=0))            # row h-1
    acc = acc + jnp.dot(up, w_ref[0], preferred_element_type=jnp.float32)
    dn = jnp.where(hh == h - 1, 0.0, pltpu.roll(t, shift=rows - 1, axis=0))  # row h+1
    acc = acc + jnp.dot(dn, w_ref[2], preferred_element_type=jnp.float32)
    return acc


def _stem_kernel(xp_ref, c1_ref, cb1_ref, c2_ref, cb2_ref, c3_ref, cb3_ref,
                 c4_ref, cb4_ref, c5_ref, cb5_ref, c6_ref, cb6_ref,
                 bns_ref, bnb_ref, out_ref, *, h, w1, w2):
    # ---- conv1.0: Conv2d(1, D, (1,2), stride (1,2)) as one K=2 MXU matmul ----
    # xp rows are (w1, h) w-major; last dim holds the two width taps.
    t = (jnp.dot(xp_ref[0], c1_ref[...], preferred_element_type=jnp.float32)
         + cb1_ref[...])
    t = _leaky(t) * bns_ref[0:1, :] + bnb_ref[0:1, :]          # LeakyReLU + folded BN

    # ---- conv1.3: Conv2d(D, D, (3,1), 'same'): h-shift is +/-1 row ----
    t = _conv_h3(t, c2_ref, cb2_ref[...], h)
    t = _leaky(t) * bns_ref[1:2, :] + bnb_ref[1:2, :]

    # ---- conv1.6: Conv2d(D, D, (1,10), stride (1,10)) ----
    # In w-major order the rows feeding output width g from tap k are the
    # contiguous, 8-aligned slab t[(g*10+k)*h : (g*10+k+1)*h]; accumulate 10
    # (w2*h, D) x (D, D) matmuls (no big reshape, no HBM round trip).
    kw = w1 // w2
    taps = []
    for k in range(kw):
        slabs = [t[(g * kw + k) * h:(g * kw + k + 1) * h] for g in range(w2)]
        lhs = slabs[0] if w2 == 1 else jnp.concatenate(slabs, axis=0)
        taps.append(jnp.dot(lhs, c3_ref[k], preferred_element_type=jnp.float32))
    u = sum(taps) + cb3_ref[...]
    u = _leaky(u) * bns_ref[2:3, :] + bnb_ref[2:3, :]

    # ---- conv1.9: Conv2d(D, D, (3,1), 'same') ----
    u = _conv_h3(u, c4_ref, cb4_ref[...], h)
    u = _leaky(u) * bns_ref[3:4, :] + bnb_ref[3:4, :]

    # ---- conv2.0: Conv2d(D, D, (1,2)), valid: width 2 -> 1 ----
    # Only the surviving w == 0 column is computed (no discarded odd-row work).
    v = (jnp.dot(u[0:h], c5_ref[0], preferred_element_type=jnp.float32)
         + jnp.dot(u[h:2 * h], c5_ref[1], preferred_element_type=jnp.float32)
         + cb5_ref[...])
    v = _leaky(v) * bns_ref[4:5, :] + bnb_ref[4:5, :]

    # ---- conv2.3: Conv2d(D, D, (3,1), 'same') on the final (H, D) tile ----
    v = _conv_h3(v, c6_ref, cb6_ref[...], h)
    v = _leaky(v) * bns_ref[5:6, :] + bnb_ref[5:6, :]

    out_ref[0] = v                                              # (H, D), lane-dense


def make_params(key, channels=1, embedding_dim=128):
    d = embedding_dim
    keys = jax.random.split(key, 12)

    def conv_init(k, out_c, in_c, kh, kw):
        k1, k2 = jax.random.split(k)
        bound = 1.0 / np.sqrt(in_c * kh * kw)
        w = jax.random.uniform(k1, (out_c, in_c, kh, kw), jnp.float32, -bound, bound)
        b = jax.random.uniform(k2, (out_c,), jnp.float32, -bound, bound)
        return w, b

    def bn_init(k, c):
        k1, k2, k3, k4 = jax.random.split(k, 4)
        gamma = 1.0 + 0.1 * jax.random.normal(k1, (c,), jnp.float32)
        beta = 0.1 * jax.random.normal(k2, (c,), jnp.float32)
        mean = 0.1 * jax.random.normal(k3, (c,), jnp.float32)
        var = 1.0 + 0.5 * jax.random.uniform(k4, (c,), jnp.float32)
        return gamma, beta, mean, var

    raw = {}
    raw['w1'], raw['b1'] = conv_init(keys[0], d, 1, 1, 2)    # Conv2d(1, D, (1,2), stride (1,2))
    raw['bn1'] = bn_init(keys[1], d)
    raw['w2'], raw['b2'] = conv_init(keys[2], d, d, 3, 1)    # Conv2d(D, D, (3,1), 'same')
    raw['bn2'] = bn_init(keys[3], d)
    raw['w3'], raw['b3'] = conv_init(keys[4], d, d, 1, 10)   # Conv2d(D, D, (1,10), stride (1,10))
    raw['bn3'] = bn_init(keys[5], d)
    raw['w4'], raw['b4'] = conv_init(keys[6], d, d, 3, 1)    # Conv2d(D, D, (3,1), 'same')
    raw['bn4'] = bn_init(keys[7], d)
    raw['w5'], raw['b5'] = conv_init(keys[8], d, d, 1, 2)    # Conv2d(D, D, (1,2))
    raw['bn5'] = bn_init(keys[9], d)
    raw['w6'], raw['b6'] = conv_init(keys[10], d, d, 3, 1)   # Conv2d(D, D, (3,1), 'same')
    raw['bn6'] = bn_init(keys[11], d)
    return raw


def _fold_bn(bn):
    gamma, beta, mean, var = bn
    s = gamma / jnp.sqrt(var + BN_EPS)
    return s, beta - mean * s


def pack_kernel_params(raw):
    d = raw['w1'].shape[0]
    p = {}
    p['c1'] = jnp.transpose(raw['w1'][:, 0, 0, :], (1, 0))            # (2, D)
    p['c2'] = jnp.transpose(raw['w2'][:, :, :, 0], (2, 1, 0))         # (3, Din, Dout)
    p['c3'] = jnp.transpose(raw['w3'][:, :, 0, :], (2, 1, 0))         # (10, Din, Dout)
    p['c4'] = jnp.transpose(raw['w4'][:, :, :, 0], (2, 1, 0))         # (3, Din, Dout)
    p['c5'] = jnp.transpose(raw['w5'][:, :, 0, :], (2, 1, 0))         # (2, Din, Dout)
    p['c6'] = jnp.transpose(raw['w6'][:, :, :, 0], (2, 1, 0))         # (3, Din, Dout)
    for i in range(1, 7):
        p[f'cb{i}'] = raw[f'b{i}'].reshape(1, d)
    scales, shifts = [], []
    for i in range(1, 7):
        s, t = _fold_bn(raw[f'bn{i}'])
        scales.append(s)
        shifts.append(t)
    p['bns'] = jnp.stack(scales)                                      # (6, D)
    p['bnb'] = jnp.stack(shifts)                                      # (6, D)
    return p


def embedding_stem_forward(x, kp):
    b, c, h, w = x.shape
    assert c == 1
    d = kp['c1'].shape[1]
    w1 = w // 2
    assert w == 2 * w1 and w1 % 10 == 0
    w2 = w1 // 10
    assert w2 == 2, "module's forward implies W == 40 so the final width collapses to 1"

    # glue: (1,2)-stride patch pairs, rows ordered w-major (row = w1*H + h) so
    # every in-kernel slice is 8-row aligned.  Tiny (B*H*W floats) XLA op.
    xp = x.reshape(b, h, w1, 2).transpose(0, 2, 1, 3).reshape(b, w1 * h, 2)

    wspec2 = lambda i: (0, 0)
    wspec3 = lambda i: (0, 0, 0)
    fused = pl.pallas_call(
        functools.partial(_stem_kernel, h=h, w1=w1, w2=w2),
        out_shape=jax.ShapeDtypeStruct((b, h, d), jnp.float32),
        grid=(b,),
        in_specs=[
            pl.BlockSpec((1, w1 * h, 2), lambda i: (i, 0, 0)),   # xp
            pl.BlockSpec((2, d), wspec2),                        # c1
            pl.BlockSpec((1, d), wspec2),                        # cb1
            pl.BlockSpec((3, d, d), wspec3),                     # c2
            pl.BlockSpec((1, d), wspec2),                        # cb2
            pl.BlockSpec((10, d, d), wspec3),                    # c3
            pl.BlockSpec((1, d), wspec2),                        # cb3
            pl.BlockSpec((3, d, d), wspec3),                     # c4
            pl.BlockSpec((1, d), wspec2),                        # cb4
            pl.BlockSpec((2, d, d), wspec3),                     # c5
            pl.BlockSpec((1, d), wspec2),                        # cb5
            pl.BlockSpec((3, d, d), wspec3),                     # c6
            pl.BlockSpec((1, d), wspec2),                        # cb6
            pl.BlockSpec((6, d), wspec2),                        # folded BN scales
            pl.BlockSpec((6, d), wspec2),                        # folded BN shifts
        ],
        out_specs=pl.BlockSpec((1, h, d), lambda i: (i, 0, 0)),
        compiler_params=pltpu.CompilerParams(dimension_semantics=("parallel",)),
    )
    out = fused(xp, kp['c1'], kp['cb1'], kp['c2'], kp['cb2'], kp['c3'], kp['cb3'],
                kp['c4'], kp['cb4'], kp['c5'], kp['cb5'], kp['c6'], kp['cb6'],
                kp['bns'], kp['bnb'])

    # torch.squeeze of the NCHW result (B, D, H, 1) -> (B, D, H) (assumes B>1, H>1).
    # The kernel output stays lane-dense (last dim = D = 128, unmasked stores);
    # this final tiny transpose is one XLA op on ~B*H*D floats.
    return jnp.transpose(out, (0, 2, 1))


def reference_forward(x, raw):
    def conv(t, w, bias, stride=(1, 1), padding=((0, 0), (0, 0))):
        y = jax.lax.conv_general_dilated(
            t, w, window_strides=stride, padding=padding,
            dimension_numbers=('NCHW', 'OIHW', 'NCHW'))
        return y + bias[None, :, None, None]

    def bn(t, p):
        gamma, beta, mean, var = p
        return (gamma[None, :, None, None] * (t - mean[None, :, None, None])
                / jnp.sqrt(var[None, :, None, None] + BN_EPS)
                + beta[None, :, None, None])

    def lk(t):
        return jnp.where(t >= 0, t, LEAKY_ALPHA * t)

    same_h = ((1, 1), (0, 0))
    t = x
    t = bn(lk(conv(t, raw['w1'], raw['b1'], (1, 2))), raw['bn1'])
    t = bn(lk(conv(t, raw['w2'], raw['b2'], (1, 1), same_h)), raw['bn2'])
    t = bn(lk(conv(t, raw['w3'], raw['b3'], (1, 10))), raw['bn3'])
    t = bn(lk(conv(t, raw['w4'], raw['b4'], (1, 1), same_h)), raw['bn4'])
    t = bn(lk(conv(t, raw['w5'], raw['b5'], (1, 1))), raw['bn5'])
    t = bn(lk(conv(t, raw['w6'], raw['b6'], (1, 1), same_h)), raw['bn6'])
    return jnp.squeeze(t)


if __name__ == "__main__":
    key = jax.random.PRNGKey(0)
    k_x, k_p = jax.random.split(key)
    B, C, H, W = 2, 1, 8, 40      # widths: 40 -> 20 -> 2 -> 1 (squeeze collapses W)
    D = 128                        # embedding_dim default of the module
    x = jax.random.normal(k_x, (B, C, H, W), jnp.float32)

    raw = make_params(k_p, channels=C, embedding_dim=D)
    kp = pack_kernel_params(raw)

    out = jax.block_until_ready(jax.jit(embedding_stem_forward)(x, kp))
    ref = jax.block_until_ready(reference_forward(x, raw))

    assert out.shape == ref.shape == (B, D, H), (out.shape, ref.shape)
    np.testing.assert_allclose(np.asarray(out), np.asarray(ref), rtol=1e-2, atol=1e-2)
    print("KERNEL_OK")
</pallas_src>

<mosaic_0001>
module attributes {stable_mosaic.version = 11 : i64} {
  func.func @_stem_kernel(%arg0: i32, %arg1: memref<1x160x2xf32, #tpu.memory_space<vmem>>, %arg2: memref<2x128xf32, #tpu.memory_space<vmem>>, %arg3: memref<1x128xf32, #tpu.memory_space<vmem>>, %arg4: memref<3x128x128xf32, #tpu.memory_space<vmem>>, %arg5: memref<1x128xf32, #tpu.memory_space<vmem>>, %arg6: memref<10x128x128xf32, #tpu.memory_space<vmem>>, %arg7: memref<1x128xf32, #tpu.memory_space<vmem>>, %arg8: memref<3x128x128xf32, #tpu.memory_space<vmem>>, %arg9: memref<1x128xf32, #tpu.memory_space<vmem>>, %arg10: memref<2x128x128xf32, #tpu.memory_space<vmem>>, %arg11: memref<1x128xf32, #tpu.memory_space<vmem>>, %arg12: memref<3x128x128xf32, #tpu.memory_space<vmem>>, %arg13: memref<1x128xf32, #tpu.memory_space<vmem>>, %arg14: memref<6x128xf32, #tpu.memory_space<vmem>>, %arg15: memref<6x128xf32, #tpu.memory_space<vmem>>, %arg16: memref<1x8x128xf32, #tpu.memory_space<vmem>>) attributes {dimension_semantics = [#tpu.dimension_semantics<parallel>], iteration_bounds = array<i64: 2>, scalar_prefetch = 0 : i64, scratch_operands = 0 : i64, tpu.core_type = #tpu.core_type<tc>, window_params = [{transform_indices = @transform_0, window_bounds = array<i64: 1, 160, 2>}, {pipeline_mode = #tpu.pipeline_mode<synchronous>, transform_indices = @transform_1, window_bounds = array<i64: 2, 128>}, {pipeline_mode = #tpu.pipeline_mode<synchronous>, transform_indices = @transform_2, window_bounds = array<i64: 1, 128>}, {pipeline_mode = #tpu.pipeline_mode<synchronous>, transform_indices = @transform_3, window_bounds = array<i64: 3, 128, 128>}, {pipeline_mode = #tpu.pipeline_mode<synchronous>, transform_indices = @transform_4, window_bounds = array<i64: 1, 128>}, {pipeline_mode = #tpu.pipeline_mode<synchronous>, transform_indices = @transform_5, window_bounds = array<i64: 10, 128, 128>}, {pipeline_mode = #tpu.pipeline_mode<synchronous>, transform_indices = @transform_6, window_bounds = array<i64: 1, 128>}, {pipeline_mode = #tpu.pipeline_mode<synchronous>, transform_indices = @transform_7, window_bounds = array<i64: 3, 128, 128>}, {pipeline_mode = #tpu.pipeline_mode<synchronous>, transform_indices = @transform_8, window_bounds = array<i64: 1, 128>}, {pipeline_mode = #tpu.pipeline_mode<synchronous>, transform_indices = @transform_9, window_bounds = array<i64: 2, 128, 128>}, {pipeline_mode = #tpu.pipeline_mode<synchronous>, transform_indices = @transform_10, window_bounds = array<i64: 1, 128>}, {pipeline_mode = #tpu.pipeline_mode<synchronous>, transform_indices = @transform_11, window_bounds = array<i64: 3, 128, 128>}, {pipeline_mode = #tpu.pipeline_mode<synchronous>, transform_indices = @transform_12, window_bounds = array<i64: 1, 128>}, {pipeline_mode = #tpu.pipeline_mode<synchronous>, transform_indices = @transform_13, window_bounds = array<i64: 6, 128>}, {pipeline_mode = #tpu.pipeline_mode<synchronous>, transform_indices = @transform_14, window_bounds = array<i64: 6, 128>}, {transform_indices = @transform_15, window_bounds = array<i64: 1, 8, 128>}]} {
    %c0 = arith.constant 0 : index
    %c0_0 = arith.constant 0 : index
    %c0_1 = arith.constant 0 : index
    %0 = vector.load %arg1[%c0, %c0_0, %c0_1] : memref<1x160x2xf32, #tpu.memory_space<vmem>>, vector<1x160x2xf32>
    %1 = vector.shape_cast %0 : vector<1x160x2xf32> to vector<160x2xf32>
    %c0_2 = arith.constant 0 : index
    %c0_3 = arith.constant 0 : index
    %2 = vector.load %arg2[%c0_2, %c0_3] : memref<2x128xf32, #tpu.memory_space<vmem>>, vector<2x128xf32>
    %cst = arith.constant dense<0.000000e+00> : vector<160x128xf32>
    %3 = tpu.matmul %1, %2, %cst {dimension_numbers = #tpu.dot_dimension_numbers<[1], [0], [0], [1], [0, 0, 1, 1], [], []>} : vector<160x2xf32>, vector<2x128xf32>, vector<160x128xf32> -> vector<160x128xf32>
    %c0_4 = arith.constant 0 : index
    %c0_5 = arith.constant 0 : index
    %4 = vector.load %arg3[%c0_4, %c0_5] : memref<1x128xf32, #tpu.memory_space<vmem>>, vector<1x128xf32>
    %5 = vector.broadcast %4 : vector<1x128xf32> to vector<160x128xf32>
    %6 = arith.addf %3, %5 : vector<160x128xf32>
    %cst_6 = arith.constant 0.000000e+00 : f32
    %7 = vector.broadcast %cst_6 : f32 to vector<160x128xf32>
    %8 = arith.cmpf oge, %6, %7 : vector<160x128xf32>
    %cst_7 = arith.constant 0.00999999977 : f32
    %9 = vector.broadcast %cst_7 : f32 to vector<160x128xf32>
    %10 = arith.mulf %9, %6 : vector<160x128xf32>
    %11 = arith.select %8, %6, %10 : vector<160x128xi1>, vector<160x128xf32>
    %c0_8 = arith.constant 0 : index
    %c0_9 = arith.constant 0 : index
    %12 = vector.load %arg14[%c0_8, %c0_9] : memref<6x128xf32, #tpu.memory_space<vmem>>, vector<1x128xf32>
    %13 = vector.broadcast %12 : vector<1x128xf32> to vector<160x128xf32>
    %14 = arith.mulf %11, %13 : vector<160x128xf32>
    %c0_10 = arith.constant 0 : index
    %c0_11 = arith.constant 0 : index
    %15 = vector.load %arg15[%c0_10, %c0_11] : memref<6x128xf32, #tpu.memory_space<vmem>>, vector<1x128xf32>
    %16 = vector.broadcast %15 : vector<1x128xf32> to vector<160x128xf32>
    %17 = arith.addf %14, %16 : vector<160x128xf32>
    %c0_12 = arith.constant 0 : index
    %c0_13 = arith.constant 0 : index
    %18 = vector.load %arg5[%c0_12, %c0_13] : memref<1x128xf32, #tpu.memory_space<vmem>>, vector<1x128xf32>
    %19 = tpu.iota {dimensions = array<i32: 0>} : vector<160x128xi32>
    %c8_i32 = arith.constant 8 : i32
    %c0_i32 = arith.constant 0 : i32
    %20 = arith.cmpi eq, %c8_i32, %c0_i32 : i32
    %c1_i32 = arith.constant 1 : i32
    %21 = arith.select %20, %c1_i32, %c8_i32 : i32
    %22 = vector.broadcast %21 : i32 to vector<160x128xi32>
    %23 = arith.remsi %19, %22 : vector<160x128xi32>
    %c0_i32_14 = arith.constant 0 : i32
    %24 = vector.broadcast %c0_i32_14 : i32 to vector<160x128xi32>
    %25 = arith.cmpi ne, %23, %24 : vector<160x128xi32>
    %c0_i32_15 = arith.constant 0 : i32
    %26 = vector.broadcast %c0_i32_15 : i32 to vector<160x128xi32>
    %27 = arith.cmpi slt, %23, %26 : vector<160x128xi32>
    %c0_i32_16 = arith.constant 0 : i32
    %28 = arith.cmpi slt, %21, %c0_i32_16 : i32
    %29 = vector.broadcast %28 : i1 to vector<160x128xi1>
    %30 = vector.broadcast %29 : vector<160x128xi1> to vector<160x128xi1>
    %31 = arith.xori %27, %30 : vector<160x128xi1>
    %32 = arith.andi %31, %25 : vector<160x128xi1>
    %33 = vector.broadcast %21 : i32 to vector<160x128xi32>
    %34 = arith.addi %23, %33 : vector<160x128xi32>
    %35 = arith.select %32, %34, %23 : vector<160x128xi1>, vector<160x128xi32>
    %c1 = arith.constant 1 : index
    %c0_17 = arith.constant 0 : index
    %c0_18 = arith.constant 0 : index
    %36 = vector.load %arg4[%c1, %c0_17, %c0_18] : memref<3x128x128xf32, #tpu.memory_space<vmem>>, vector<1x128x128xf32>
    %37 = vector.shape_cast %36 : vector<1x128x128xf32> to vector<128x128xf32>
    %cst_19 = arith.constant dense<0.000000e+00> : vector<160x128xf32>
    %38 = tpu.matmul %17, %37, %cst_19 {dimension_numbers = #tpu.dot_dimension_numbers<[1], [0], [0], [1], [0, 0, 1, 1], [], []>} : vector<160x128xf32>, vector<128x128xf32>, vector<160x128xf32> -> vector<160x128xf32>
    %39 = vector.broadcast %18 : vector<1x128xf32> to vector<160x128xf32>
    %40 = arith.addf %38, %39 : vector<160x128xf32>
    %c0_i32_20 = arith.constant 0 : i32
    %41 = vector.broadcast %c0_i32_20 : i32 to vector<160x128xi32>
    %42 = arith.cmpi eq, %35, %41 : vector<160x128xi32>
    %c1_i32_21 = arith.constant 1 : i32
    %43 = tpu.dynamic_rotate %17 by %c1_i32_21 dim 0 : vector<160x128xf32>, i32 -> vector<160x128xf32>
    %cst_22 = arith.constant 0.000000e+00 : f32
    %44 = vector.broadcast %cst_22 : f32 to vector<160x128xf32>
    %45 = arith.select %42, %44, %43 : vector<160x128xi1>, vector<160x128xf32>
    %c0_23 = arith.constant 0 : index
    %c0_24 = arith.constant 0 : index
    %c0_25 = arith.constant 0 : index
    %46 = vector.load %arg4[%c0_23, %c0_24, %c0_25] : memref<3x128x128xf32, #tpu.memory_space<vmem>>, vector<1x128x128xf32>
    %47 = vector.shape_cast %46 : vector<1x128x128xf32> to vector<128x128xf32>
    %cst_26 = arith.constant dense<0.000000e+00> : vector<160x128xf32>
    %48 = tpu.matmul %45, %47, %cst_26 {dimension_numbers = #tpu.dot_dimension_numbers<[1], [0], [0], [1], [0, 0, 1, 1], [], []>} : vector<160x128xf32>, vector<128x128xf32>, vector<160x128xf32> -> vector<160x128xf32>
    %49 = arith.addf %40, %48 : vector<160x128xf32>
    %c7_i32 = arith.constant 7 : i32
    %50 = vector.broadcast %c7_i32 : i32 to vector<160x128xi32>
    %51 = arith.cmpi eq, %35, %50 : vector<160x128xi32>
    %c159_i32 = arith.constant 159 : i32
    %52 = tpu.dynamic_rotate %17 by %c159_i32 dim 0 : vector<160x128xf32>, i32 -> vector<160x128xf32>
    %cst_27 = arith.constant 0.000000e+00 : f32
    %53 = vector.broadcast %cst_27 : f32 to vector<160x128xf32>
    %54 = arith.select %51, %53, %52 : vector<160x128xi1>, vector<160x128xf32>
    %c2 = arith.constant 2 : index
    %c0_28 = arith.constant 0 : index
    %c0_29 = arith.constant 0 : index
    %55 = vector.load %arg4[%c2, %c0_28, %c0_29] : memref<3x128x128xf32, #tpu.memory_space<vmem>>, vector<1x128x128xf32>
    %56 = vector.shape_cast %55 : vector<1x128x128xf32> to vector<128x128xf32>
    %cst_30 = arith.constant dense<0.000000e+00> : vector<160x128xf32>
    %57 = tpu.matmul %54, %56, %cst_30 {dimension_numbers = #tpu.dot_dimension_numbers<[1], [0], [0], [1], [0, 0, 1, 1], [], []>} : vector<160x128xf32>, vector<128x128xf32>, vector<160x128xf32> -> vector<160x128xf32>
    %58 = arith.addf %49, %57 : vector<160x128xf32>
    %cst_31 = arith.constant 0.000000e+00 : f32
    %59 = vector.broadcast %cst_31 : f32 to vector<160x128xf32>
    %60 = arith.cmpf oge, %58, %59 : vector<160x128xf32>
    %cst_32 = arith.constant 0.00999999977 : f32
    %61 = vector.broadcast %cst_32 : f32 to vector<160x128xf32>
    %62 = arith.mulf %61, %58 : vector<160x128xf32>
    %63 = arith.select %60, %58, %62 : vector<160x128xi1>, vector<160x128xf32>
    %c1_33 = arith.constant 1 : index
    %c0_34 = arith.constant 0 : index
    %64 = vector.load %arg14[%c1_33, %c0_34] : memref<6x128xf32, #tpu.memory_space<vmem>>, vector<1x128xf32>
    %65 = vector.broadcast %64 : vector<1x128xf32> to vector<160x128xf32>
    %66 = arith.mulf %63, %65 : vector<160x128xf32>
    %c1_35 = arith.constant 1 : index
    %c0_36 = arith.constant 0 : index
    %67 = vector.load %arg15[%c1_35, %c0_36] : memref<6x128xf32, #tpu.memory_space<vmem>>, vector<1x128xf32>
    %68 = vector.broadcast %67 : vector<1x128xf32> to vector<160x128xf32>
    %69 = arith.addf %66, %68 : vector<160x128xf32>
    %70 = vector.extract_strided_slice %69 {offsets = [0, 0], sizes = [8, 128], strides = [1, 1]} : vector<160x128xf32> to vector<8x128xf32>
    %71 = vector.extract_strided_slice %69 {offsets = [80, 0], sizes = [8, 128], strides = [1, 1]} : vector<160x128xf32> to vector<8x128xf32>
    %72 = tpu.concatenate %70, %71 in 0 : vector<8x128xf32>, vector<8x128xf32> -> vector<16x128xf32>
    %c0_37 = arith.constant 0 : index
    %c0_38 = arith.constant 0 : index
    %c0_39 = arith.constant 0 : index
    %73 = vector.load %arg6[%c0_37, %c0_38, %c0_39] : memref<10x128x128xf32, #tpu.memory_space<vmem>>, vector<1x128x128xf32>
    %74 = vector.shape_cast %73 : vector<1x128x128xf32> to vector<128x128xf32>
    %cst_40 = arith.constant dense<0.000000e+00> : vector<16x128xf32>
    %75 = tpu.matmul %72, %74, %cst_40 {dimension_numbers = #tpu.dot_dimension_numbers<[1], [0], [0], [1], [0, 0, 1, 1], [], []>} : vector<16x128xf32>, vector<128x128xf32>, vector<16x128xf32> -> vector<16x128xf32>
    %76 = vector.extract_strided_slice %69 {offsets = [8, 0], sizes = [8, 128], strides = [1, 1]} : vector<160x128xf32> to vector<8x128xf32>
    %77 = vector.extract_strided_slice %69 {offsets = [88, 0], sizes = [8, 128], strides = [1, 1]} : vector<160x128xf32> to vector<8x128xf32>
    %78 = tpu.concatenate %76, %77 in 0 : vector<8x128xf32>, vector<8x128xf32> -> vector<16x128xf32>
    %c1_41 = arith.constant 1 : index
    %c0_42 = arith.constant 0 : index
    %c0_43 = arith.constant 0 : index
    %79 = vector.load %arg6[%c1_41, %c0_42, %c0_43] : memref<10x128x128xf32, #tpu.memory_space<vmem>>, vector<1x128x128xf32>
    %80 = vector.shape_cast %79 : vector<1x128x128xf32> to vector<128x128xf32>
    %cst_44 = arith.constant dense<0.000000e+00> : vector<16x128xf32>
    %81 = tpu.matmul %78, %80, %cst_44 {dimension_numbers = #tpu.dot_dimension_numbers<[1], [0], [0], [1], [0, 0, 1, 1], [], []>} : vector<16x128xf32>, vector<128x128xf32>, vector<16x128xf32> -> vector<16x128xf32>
    %82 = vector.extract_strided_slice %69 {offsets = [16, 0], sizes = [8, 128], strides = [1, 1]} : vector<160x128xf32> to vector<8x128xf32>
    %83 = vector.extract_strided_slice %69 {offsets = [96, 0], sizes = [8, 128], strides = [1, 1]} : vector<160x128xf32> to vector<8x128xf32>
    %84 = tpu.concatenate %82, %83 in 0 : vector<8x128xf32>, vector<8x128xf32> -> vector<16x128xf32>
    %c2_45 = arith.constant 2 : index
    %c0_46 = arith.constant 0 : index
    %c0_47 = arith.constant 0 : index
    %85 = vector.load %arg6[%c2_45, %c0_46, %c0_47] : memref<10x128x128xf32, #tpu.memory_space<vmem>>, vector<1x128x128xf32>
    %86 = vector.shape_cast %85 : vector<1x128x128xf32> to vector<128x128xf32>
    %cst_48 = arith.constant dense<0.000000e+00> : vector<16x128xf32>
    %87 = tpu.matmul %84, %86, %cst_48 {dimension_numbers = #tpu.dot_dimension_numbers<[1], [0], [0], [1], [0, 0, 1, 1], [], []>} : vector<16x128xf32>, vector<128x128xf32>, vector<16x128xf32> -> vector<16x128xf32>
    %88 = vector.extract_strided_slice %69 {offsets = [24, 0], sizes = [8, 128], strides = [1, 1]} : vector<160x128xf32> to vector<8x128xf32>
    %89 = vector.extract_strided_slice %69 {offsets = [104, 0], sizes = [8, 128], strides = [1, 1]} : vector<160x128xf32> to vector<8x128xf32>
    %90 = tpu.concatenate %88, %89 in 0 : vector<8x128xf32>, vector<8x128xf32> -> vector<16x128xf32>
    %c3 = arith.constant 3 : index
    %c0_49 = arith.constant 0 : index
    %c0_50 = arith.constant 0 : index
    %91 = vector.load %arg6[%c3, %c0_49, %c0_50] : memref<10x128x128xf32, #tpu.memory_space<vmem>>, vector<1x128x128xf32>
    %92 = vector.shape_cast %91 : vector<1x128x128xf32> to vector<128x128xf32>
    %cst_51 = arith.constant dense<0.000000e+00> : vector<16x128xf32>
    %93 = tpu.matmul %90, %92, %cst_51 {dimension_numbers = #tpu.dot_dimension_numbers<[1], [0], [0], [1], [0, 0, 1, 1], [], []>} : vector<16x128xf32>, vector<128x128xf32>, vector<16x128xf32> -> vector<16x128xf32>
    %94 = vector.extract_strided_slice %69 {offsets = [32, 0], sizes = [8, 128], strides = [1, 1]} : vector<160x128xf32> to vector<8x128xf32>
    %95 = vector.extract_strided_slice %69 {offsets = [112, 0], sizes = [8, 128], strides = [1, 1]} : vector<160x128xf32> to vector<8x128xf32>
    %96 = tpu.concatenate %94, %95 in 0 : vector<8x128xf32>, vector<8x128xf32> -> vector<16x128xf32>
    %c4 = arith.constant 4 : index
    %c0_52 = arith.constant 0 : index
    %c0_53 = arith.constant 0 : index
    %97 = vector.load %arg6[%c4, %c0_52, %c0_53] : memref<10x128x128xf32, #tpu.memory_space<vmem>>, vector<1x128x128xf32>
    %98 = vector.shape_cast %97 : vector<1x128x128xf32> to vector<128x128xf32>
    %cst_54 = arith.constant dense<0.000000e+00> : vector<16x128xf32>
    %99 = tpu.matmul %96, %98, %cst_54 {dimension_numbers = #tpu.dot_dimension_numbers<[1], [0], [0], [1], [0, 0, 1, 1], [], []>} : vector<16x128xf32>, vector<128x128xf32>, vector<16x128xf32> -> vector<16x128xf32>
    %100 = vector.extract_strided_slice %69 {offsets = [40, 0], sizes = [8, 128], strides = [1, 1]} : vector<160x128xf32> to vector<8x128xf32>
    %101 = vector.extract_strided_slice %69 {offsets = [120, 0], sizes = [8, 128], strides = [1, 1]} : vector<160x128xf32> to vector<8x128xf32>
    %102 = tpu.concatenate %100, %101 in 0 : vector<8x128xf32>, vector<8x128xf32> -> vector<16x128xf32>
    %c5 = arith.constant 5 : index
    %c0_55 = arith.constant 0 : index
    %c0_56 = arith.constant 0 : index
    %103 = vector.load %arg6[%c5, %c0_55, %c0_56] : memref<10x128x128xf32, #tpu.memory_space<vmem>>, vector<1x128x128xf32>
    %104 = vector.shape_cast %103 : vector<1x128x128xf32> to vector<128x128xf32>
    %cst_57 = arith.constant dense<0.000000e+00> : vector<16x128xf32>
    %105 = tpu.matmul %102, %104, %cst_57 {dimension_numbers = #tpu.dot_dimension_numbers<[1], [0], [0], [1], [0, 0, 1, 1], [], []>} : vector<16x128xf32>, vector<128x128xf32>, vector<16x128xf32> -> vector<16x128xf32>
    %106 = vector.extract_strided_slice %69 {offsets = [48, 0], sizes = [8, 128], strides = [1, 1]} : vector<160x128xf32> to vector<8x128xf32>
    %107 = vector.extract_strided_slice %69 {offsets = [128, 0], sizes = [8, 128], strides = [1, 1]} : vector<160x128xf32> to vector<8x128xf32>
    %108 = tpu.concatenate %106, %107 in 0 : vector<8x128xf32>, vector<8x128xf32> -> vector<16x128xf32>
    %c6 = arith.constant 6 : index
    %c0_58 = arith.constant 0 : index
    %c0_59 = arith.constant 0 : index
    %109 = vector.load %arg6[%c6, %c0_58, %c0_59] : memref<10x128x128xf32, #tpu.memory_space<vmem>>, vector<1x128x128xf32>
    %110 = vector.shape_cast %109 : vector<1x128x128xf32> to vector<128x128xf32>
    %cst_60 = arith.constant dense<0.000000e+00> : vector<16x128xf32>
    %111 = tpu.matmul %108, %110, %cst_60 {dimension_numbers = #tpu.dot_dimension_numbers<[1], [0], [0], [1], [0, 0, 1, 1], [], []>} : vector<16x128xf32>, vector<128x128xf32>, vector<16x128xf32> -> vector<16x128xf32>
    %112 = vector.extract_strided_slice %69 {offsets = [56, 0], sizes = [8, 128], strides = [1, 1]} : vector<160x128xf32> to vector<8x128xf32>
    %113 = vector.extract_strided_slice %69 {offsets = [136, 0], sizes = [8, 128], strides = [1, 1]} : vector<160x128xf32> to vector<8x128xf32>
    %114 = tpu.concatenate %112, %113 in 0 : vector<8x128xf32>, vector<8x128xf32> -> vector<16x128xf32>
    %c7 = arith.constant 7 : index
    %c0_61 = arith.constant 0 : index
    %c0_62 = arith.constant 0 : index
    %115 = vector.load %arg6[%c7, %c0_61, %c0_62] : memref<10x128x128xf32, #tpu.memory_space<vmem>>, vector<1x128x128xf32>
    %116 = vector.shape_cast %115 : vector<1x128x128xf32> to vector<128x128xf32>
    %cst_63 = arith.constant dense<0.000000e+00> : vector<16x128xf32>
    %117 = tpu.matmul %114, %116, %cst_63 {dimension_numbers = #tpu.dot_dimension_numbers<[1], [0], [0], [1], [0, 0, 1, 1], [], []>} : vector<16x128xf32>, vector<128x128xf32>, vector<16x128xf32> -> vector<16x128xf32>
    %118 = vector.extract_strided_slice %69 {offsets = [64, 0], sizes = [8, 128], strides = [1, 1]} : vector<160x128xf32> to vector<8x128xf32>
    %119 = vector.extract_strided_slice %69 {offsets = [144, 0], sizes = [8, 128], strides = [1, 1]} : vector<160x128xf32> to vector<8x128xf32>
    %120 = tpu.concatenate %118, %119 in 0 : vector<8x128xf32>, vector<8x128xf32> -> vector<16x128xf32>
    %c8 = arith.constant 8 : index
    %c0_64 = arith.constant 0 : index
    %c0_65 = arith.constant 0 : index
    %121 = vector.load %arg6[%c8, %c0_64, %c0_65] : memref<10x128x128xf32, #tpu.memory_space<vmem>>, vector<1x128x128xf32>
    %122 = vector.shape_cast %121 : vector<1x128x128xf32> to vector<128x128xf32>
    %cst_66 = arith.constant dense<0.000000e+00> : vector<16x128xf32>
    %123 = tpu.matmul %120, %122, %cst_66 {dimension_numbers = #tpu.dot_dimension_numbers<[1], [0], [0], [1], [0, 0, 1, 1], [], []>} : vector<16x128xf32>, vector<128x128xf32>, vector<16x128xf32> -> vector<16x128xf32>
    %124 = vector.extract_strided_slice %69 {offsets = [72, 0], sizes = [8, 128], strides = [1, 1]} : vector<160x128xf32> to vector<8x128xf32>
    %125 = vector.extract_strided_slice %69 {offsets = [152, 0], sizes = [8, 128], strides = [1, 1]} : vector<160x128xf32> to vector<8x128xf32>
    %126 = tpu.concatenate %124, %125 in 0 : vector<8x128xf32>, vector<8x128xf32> -> vector<16x128xf32>
    %c9 = arith.constant 9 : index
    %c0_67 = arith.constant 0 : index
    %c0_68 = arith.constant 0 : index
    %127 = vector.load %arg6[%c9, %c0_67, %c0_68] : memref<10x128x128xf32, #tpu.memory_space<vmem>>, vector<1x128x128xf32>
    %128 = vector.shape_cast %127 : vector<1x128x128xf32> to vector<128x128xf32>
    %cst_69 = arith.constant dense<0.000000e+00> : vector<16x128xf32>
    %129 = tpu.matmul %126, %128, %cst_69 {dimension_numbers = #tpu.dot_dimension_numbers<[1], [0], [0], [1], [0, 0, 1, 1], [], []>} : vector<16x128xf32>, vector<128x128xf32>, vector<16x128xf32> -> vector<16x128xf32>
    %cst_70 = arith.constant 0.000000e+00 : f32
    %130 = vector.broadcast %cst_70 : f32 to vector<16x128xf32>
    %131 = arith.addf %130, %75 : vector<16x128xf32>
    %132 = arith.addf %131, %81 : vector<16x128xf32>
    %133 = arith.addf %132, %87 : vector<16x128xf32>
    %134 = arith.addf %133, %93 : vector<16x128xf32>
    %135 = arith.addf %134, %99 : vector<16x128xf32>
    %136 = arith.addf %135, %105 : vector<16x128xf32>
    %137 = arith.addf %136, %111 : vector<16x128xf32>
    %138 = arith.addf %137, %117 : vector<16x128xf32>
    %139 = arith.addf %138, %123 : vector<16x128xf32>
    %140 = arith.addf %139, %129 : vector<16x128xf32>
    %c0_71 = arith.constant 0 : index
    %c0_72 = arith.constant 0 : index
    %141 = vector.load %arg7[%c0_71, %c0_72] : memref<1x128xf32, #tpu.memory_space<vmem>>, vector<1x128xf32>
    %142 = vector.broadcast %141 : vector<1x128xf32> to vector<16x128xf32>
    %143 = arith.addf %140, %142 : vector<16x128xf32>
    %cst_73 = arith.constant 0.000000e+00 : f32
    %144 = vector.broadcast %cst_73 : f32 to vector<16x128xf32>
    %145 = arith.cmpf oge, %143, %144 : vector<16x128xf32>
    %cst_74 = arith.constant 0.00999999977 : f32
    %146 = vector.broadcast %cst_74 : f32 to vector<16x128xf32>
    %147 = arith.mulf %146, %143 : vector<16x128xf32>
    %148 = arith.select %145, %143, %147 : vector<16x128xi1>, vector<16x128xf32>
    %c2_75 = arith.constant 2 : index
    %c0_76 = arith.constant 0 : index
    %149 = vector.load %arg14[%c2_75, %c0_76] : memref<6x128xf32, #tpu.memory_space<vmem>>, vector<1x128xf32>
    %150 = vector.broadcast %149 : vector<1x128xf32> to vector<16x128xf32>
    %151 = arith.mulf %148, %150 : vector<16x128xf32>
    %c2_77 = arith.constant 2 : index
    %c0_78 = arith.constant 0 : index
    %152 = vector.load %arg15[%c2_77, %c0_78] : memref<6x128xf32, #tpu.memory_space<vmem>>, vector<1x128xf32>
    %153 = vector.broadcast %152 : vector<1x128xf32> to vector<16x128xf32>
    %154 = arith.addf %151, %153 : vector<16x128xf32>
    %c0_79 = arith.constant 0 : index
    %c0_80 = arith.constant 0 : index
    %155 = vector.load %arg9[%c0_79, %c0_80] : memref<1x128xf32, #tpu.memory_space<vmem>>, vector<1x128xf32>
    %156 = tpu.iota {dimensions = array<i32: 0>} : vector<16x128xi32>
    %c8_i32_81 = arith.constant 8 : i32
    %c0_i32_82 = arith.constant 0 : i32
    %157 = arith.cmpi eq, %c8_i32_81, %c0_i32_82 : i32
    %c1_i32_83 = arith.constant 1 : i32
    %158 = arith.select %157, %c1_i32_83, %c8_i32_81 : i32
    %159 = vector.broadcast %158 : i32 to vector<16x128xi32>
    %160 = arith.remsi %156, %159 : vector<16x128xi32>
    %c0_i32_84 = arith.constant 0 : i32
    %161 = vector.broadcast %c0_i32_84 : i32 to vector<16x128xi32>
    %162 = arith.cmpi ne, %160, %161 : vector<16x128xi32>
    %c0_i32_85 = arith.constant 0 : i32
    %163 = vector.broadcast %c0_i32_85 : i32 to vector<16x128xi32>
    %164 = arith.cmpi slt, %160, %163 : vector<16x128xi32>
    %c0_i32_86 = arith.constant 0 : i32
    %165 = arith.cmpi slt, %158, %c0_i32_86 : i32
    %166 = vector.broadcast %165 : i1 to vector<16x128xi1>
    %167 = vector.broadcast %166 : vector<16x128xi1> to vector<16x128xi1>
    %168 = arith.xori %164, %167 : vector<16x128xi1>
    %169 = arith.andi %168, %162 : vector<16x128xi1>
    %170 = vector.broadcast %158 : i32 to vector<16x128xi32>
    %171 = arith.addi %160, %170 : vector<16x128xi32>
    %172 = arith.select %169, %171, %160 : vector<16x128xi1>, vector<16x128xi32>
    %c1_87 = arith.constant 1 : index
    %c0_88 = arith.constant 0 : index
    %c0_89 = arith.constant 0 : index
    %173 = vector.load %arg8[%c1_87, %c0_88, %c0_89] : memref<3x128x128xf32, #tpu.memory_space<vmem>>, vector<1x128x128xf32>
    %174 = vector.shape_cast %173 : vector<1x128x128xf32> to vector<128x128xf32>
    %cst_90 = arith.constant dense<0.000000e+00> : vector<16x128xf32>
    %175 = tpu.matmul %154, %174, %cst_90 {dimension_numbers = #tpu.dot_dimension_numbers<[1], [0], [0], [1], [0, 0, 1, 1], [], []>} : vector<16x128xf32>, vector<128x128xf32>, vector<16x128xf32> -> vector<16x128xf32>
    %176 = vector.broadcast %155 : vector<1x128xf32> to vector<16x128xf32>
    %177 = arith.addf %175, %176 : vector<16x128xf32>
    %c0_i32_91 = arith.constant 0 : i32
    %178 = vector.broadcast %c0_i32_91 : i32 to vector<16x128xi32>
    %179 = arith.cmpi eq, %172, %178 : vector<16x128xi32>
    %c1_i32_92 = arith.constant 1 : i32
    %180 = tpu.dynamic_rotate %154 by %c1_i32_92 dim 0 : vector<16x128xf32>, i32 -> vector<16x128xf32>
    %cst_93 = arith.constant 0.000000e+00 : f32
    %181 = vector.broadcast %cst_93 : f32 to vector<16x128xf32>
    %182 = arith.select %179, %181, %180 : vector<16x128xi1>, vector<16x128xf32>
    %c0_94 = arith.constant 0 : index
    %c0_95 = arith.constant 0 : index
    %c0_96 = arith.constant 0 : index
    %183 = vector.load %arg8[%c0_94, %c0_95, %c0_96] : memref<3x128x128xf32, #tpu.memory_space<vmem>>, vector<1x128x128xf32>
    %184 = vector.shape_cast %183 : vector<1x128x128xf32> to vector<128x128xf32>
    %cst_97 = arith.constant dense<0.000000e+00> : vector<16x128xf32>
    %185 = tpu.matmul %182, %184, %cst_97 {dimension_numbers = #tpu.dot_dimension_numbers<[1], [0], [0], [1], [0, 0, 1, 1], [], []>} : vector<16x128xf32>, vector<128x128xf32>, vector<16x128xf32> -> vector<16x128xf32>
    %186 = arith.addf %177, %185 : vector<16x128xf32>
    %c7_i32_98 = arith.constant 7 : i32
    %187 = vector.broadcast %c7_i32_98 : i32 to vector<16x128xi32>
    %188 = arith.cmpi eq, %172, %187 : vector<16x128xi32>
    %c15_i32 = arith.constant 15 : i32
    %189 = tpu.dynamic_rotate %154 by %c15_i32 dim 0 : vector<16x128xf32>, i32 -> vector<16x128xf32>
    %cst_99 = arith.constant 0.000000e+00 : f32
    %190 = vector.broadcast %cst_99 : f32 to vector<16x128xf32>
    %191 = arith.select %188, %190, %189 : vector<16x128xi1>, vector<16x128xf32>
    %c2_100 = arith.constant 2 : index
    %c0_101 = arith.constant 0 : index
    %c0_102 = arith.constant 0 : index
    %192 = vector.load %arg8[%c2_100, %c0_101, %c0_102] : memref<3x128x128xf32, #tpu.memory_space<vmem>>, vector<1x128x128xf32>
    %193 = vector.shape_cast %192 : vector<1x128x128xf32> to vector<128x128xf32>
    %cst_103 = arith.constant dense<0.000000e+00> : vector<16x128xf32>
    %194 = tpu.matmul %191, %193, %cst_103 {dimension_numbers = #tpu.dot_dimension_numbers<[1], [0], [0], [1], [0, 0, 1, 1], [], []>} : vector<16x128xf32>, vector<128x128xf32>, vector<16x128xf32> -> vector<16x128xf32>
    %195 = arith.addf %186, %194 : vector<16x128xf32>
    %cst_104 = arith.constant 0.000000e+00 : f32
    %196 = vector.broadcast %cst_104 : f32 to vector<16x128xf32>
    %197 = arith.cmpf oge, %195, %196 : vector<16x128xf32>
    %cst_105 = arith.constant 0.00999999977 : f32
    %198 = vector.broadcast %cst_105 : f32 to vector<16x128xf32>
    %199 = arith.mulf %198, %195 : vector<16x128xf32>
    %200 = arith.select %197, %195, %199 : vector<16x128xi1>, vector<16x128xf32>
    %c3_106 = arith.constant 3 : index
    %c0_107 = arith.constant 0 : index
    %201 = vector.load %arg14[%c3_106, %c0_107] : memref<6x128xf32, #tpu.memory_space<vmem>>, vector<1x128xf32>
    %202 = vector.broadcast %201 : vector<1x128xf32> to vector<16x128xf32>
    %203 = arith.mulf %200, %202 : vector<16x128xf32>
    %c3_108 = arith.constant 3 : index
    %c0_109 = arith.constant 0 : index
    %204 = vector.load %arg15[%c3_108, %c0_109] : memref<6x128xf32, #tpu.memory_space<vmem>>, vector<1x128xf32>
    %205 = vector.broadcast %204 : vector<1x128xf32> to vector<16x128xf32>
    %206 = arith.addf %203, %205 : vector<16x128xf32>
    %207 = vector.extract_strided_slice %206 {offsets = [0, 0], sizes = [8, 128], strides = [1, 1]} : vector<16x128xf32> to vector<8x128xf32>
    %c0_110 = arith.constant 0 : index
    %c0_111 = arith.constant 0 : index
    %c0_112 = arith.constant 0 : index
    %208 = vector.load %arg10[%c0_110, %c0_111, %c0_112] : memref<2x128x128xf32, #tpu.memory_space<vmem>>, vector<1x128x128xf32>
    %209 = vector.shape_cast %208 : vector<1x128x128xf32> to vector<128x128xf32>
    %cst_113 = arith.constant dense<0.000000e+00> : vector<8x128xf32>
    %210 = tpu.matmul %207, %209, %cst_113 {dimension_numbers = #tpu.dot_dimension_numbers<[1], [0], [0], [1], [0, 0, 1, 1], [], []>} : vector<8x128xf32>, vector<128x128xf32>, vector<8x128xf32> -> vector<8x128xf32>
    %211 = vector.extract_strided_slice %206 {offsets = [8, 0], sizes = [8, 128], strides = [1, 1]} : vector<16x128xf32> to vector<8x128xf32>
    %c1_114 = arith.constant 1 : index
    %c0_115 = arith.constant 0 : index
    %c0_116 = arith.constant 0 : index
    %212 = vector.load %arg10[%c1_114, %c0_115, %c0_116] : memref<2x128x128xf32, #tpu.memory_space<vmem>>, vector<1x128x128xf32>
    %213 = vector.shape_cast %212 : vector<1x128x128xf32> to vector<128x128xf32>
    %cst_117 = arith.constant dense<0.000000e+00> : vector<8x128xf32>
    %214 = tpu.matmul %211, %213, %cst_117 {dimension_numbers = #tpu.dot_dimension_numbers<[1], [0], [0], [1], [0, 0, 1, 1], [], []>} : vector<8x128xf32>, vector<128x128xf32>, vector<8x128xf32> -> vector<8x128xf32>
    %215 = arith.addf %210, %214 : vector<8x128xf32>
    %c0_118 = arith.constant 0 : index
    %c0_119 = arith.constant 0 : index
    %216 = vector.load %arg11[%c0_118, %c0_119] : memref<1x128xf32, #tpu.memory_space<vmem>>, vector<1x128xf32>
    %217 = vector.broadcast %216 : vector<1x128xf32> to vector<8x128xf32>
    %218 = arith.addf %215, %217 : vector<8x128xf32>
    %cst_120 = arith.constant 0.000000e+00 : f32
    %219 = vector.broadcast %cst_120 : f32 to vector<8x128xf32>
    %220 = arith.cmpf oge, %218, %219 : vector<8x128xf32>
    %cst_121 = arith.constant 0.00999999977 : f32
    %221 = vector.broadcast %cst_121 : f32 to vector<8x128xf32>
    %222 = arith.mulf %221, %218 : vector<8x128xf32>
    %223 = arith.select %220, %218, %222 : vector<8x128xi1>, vector<8x128xf32>
    %c4_122 = arith.constant 4 : index
    %c0_123 = arith.constant 0 : index
    %224 = vector.load %arg14[%c4_122, %c0_123] : memref<6x128xf32, #tpu.memory_space<vmem>>, vector<1x128xf32>
    %225 = vector.broadcast %224 : vector<1x128xf32> to vector<8x128xf32>
    %226 = arith.mulf %223, %225 : vector<8x128xf32>
    %c4_124 = arith.constant 4 : index
    %c0_125 = arith.constant 0 : index
    %227 = vector.load %arg15[%c4_124, %c0_125] : memref<6x128xf32, #tpu.memory_space<vmem>>, vector<1x128xf32>
    %228 = vector.broadcast %227 : vector<1x128xf32> to vector<8x128xf32>
    %229 = arith.addf %226, %228 : vector<8x128xf32>
    %c0_126 = arith.constant 0 : index
    %c0_127 = arith.constant 0 : index
    %230 = vector.load %arg13[%c0_126, %c0_127] : memref<1x128xf32, #tpu.memory_space<vmem>>, vector<1x128xf32>
    %231 = tpu.iota {dimensions = array<i32: 0>} : vector<8x128xi32>
    %c8_i32_128 = arith.constant 8 : i32
    %c0_i32_129 = arith.constant 0 : i32
    %232 = arith.cmpi eq, %c8_i32_128, %c0_i32_129 : i32
    %c1_i32_130 = arith.constant 1 : i32
    %233 = arith.select %232, %c1_i32_130, %c8_i32_128 : i32
    %234 = vector.broadcast %233 : i32 to vector<8x128xi32>
    %235 = arith.remsi %231, %234 : vector<8x128xi32>
    %c0_i32_131 = arith.constant 0 : i32
    %236 = vector.broadcast %c0_i32_131 : i32 to vector<8x128xi32>
    %237 = arith.cmpi ne, %235, %236 : vector<8x128xi32>
    %c0_i32_132 = arith.constant 0 : i32
    %238 = vector.broadcast %c0_i32_132 : i32 to vector<8x128xi32>
    %239 = arith.cmpi slt, %235, %238 : vector<8x128xi32>
    %c0_i32_133 = arith.constant 0 : i32
    %240 = arith.cmpi slt, %233, %c0_i32_133 : i32
    %241 = vector.broadcast %240 : i1 to vector<8x128xi1>
    %242 = vector.broadcast %241 : vector<8x128xi1> to vector<8x128xi1>
    %243 = arith.xori %239, %242 : vector<8x128xi1>
    %244 = arith.andi %243, %237 : vector<8x128xi1>
    %245 = vector.broadcast %233 : i32 to vector<8x128xi32>
    %246 = arith.addi %235, %245 : vector<8x128xi32>
    %247 = arith.select %244, %246, %235 : vector<8x128xi1>, vector<8x128xi32>
    %c1_134 = arith.constant 1 : index
    %c0_135 = arith.constant 0 : index
    %c0_136 = arith.constant 0 : index
    %248 = vector.load %arg12[%c1_134, %c0_135, %c0_136] : memref<3x128x128xf32, #tpu.memory_space<vmem>>, vector<1x128x128xf32>
    %249 = vector.shape_cast %248 : vector<1x128x128xf32> to vector<128x128xf32>
    %cst_137 = arith.constant dense<0.000000e+00> : vector<8x128xf32>
    %250 = tpu.matmul %229, %249, %cst_137 {dimension_numbers = #tpu.dot_dimension_numbers<[1], [0], [0], [1], [0, 0, 1, 1], [], []>} : vector<8x128xf32>, vector<128x128xf32>, vector<8x128xf32> -> vector<8x128xf32>
    %251 = vector.broadcast %230 : vector<1x128xf32> to vector<8x128xf32>
    %252 = arith.addf %250, %251 : vector<8x128xf32>
    %c0_i32_138 = arith.constant 0 : i32
    %253 = vector.broadcast %c0_i32_138 : i32 to vector<8x128xi32>
    %254 = arith.cmpi eq, %247, %253 : vector<8x128xi32>
    %c1_i32_139 = arith.constant 1 : i32
    %255 = tpu.dynamic_rotate %229 by %c1_i32_139 dim 0 : vector<8x128xf32>, i32 -> vector<8x128xf32>
    %cst_140 = arith.constant 0.000000e+00 : f32
    %256 = vector.broadcast %cst_140 : f32 to vector<8x128xf32>
    %257 = arith.select %254, %256, %255 : vector<8x128xi1>, vector<8x128xf32>
    %c0_141 = arith.constant 0 : index
    %c0_142 = arith.constant 0 : index
    %c0_143 = arith.constant 0 : index
    %258 = vector.load %arg12[%c0_141, %c0_142, %c0_143] : memref<3x128x128xf32, #tpu.memory_space<vmem>>, vector<1x128x128xf32>
    %259 = vector.shape_cast %258 : vector<1x128x128xf32> to vector<128x128xf32>
    %cst_144 = arith.constant dense<0.000000e+00> : vector<8x128xf32>
    %260 = tpu.matmul %257, %259, %cst_144 {dimension_numbers = #tpu.dot_dimension_numbers<[1], [0], [0], [1], [0, 0, 1, 1], [], []>} : vector<8x128xf32>, vector<128x128xf32>, vector<8x128xf32> -> vector<8x128xf32>
    %261 = arith.addf %252, %260 : vector<8x128xf32>
    %c7_i32_145 = arith.constant 7 : i32
    %262 = vector.broadcast %c7_i32_145 : i32 to vector<8x128xi32>
    %263 = arith.cmpi eq, %247, %262 : vector<8x128xi32>
    %c7_i32_146 = arith.constant 7 : i32
    %264 = tpu.dynamic_rotate %229 by %c7_i32_146 dim 0 : vector<8x128xf32>, i32 -> vector<8x128xf32>
    %cst_147 = arith.constant 0.000000e+00 : f32
    %265 = vector.broadcast %cst_147 : f32 to vector<8x128xf32>
    %266 = arith.select %263, %265, %264 : vector<8x128xi1>, vector<8x128xf32>
    %c2_148 = arith.constant 2 : index
    %c0_149 = arith.constant 0 : index
    %c0_150 = arith.constant 0 : index
    %267 = vector.load %arg12[%c2_148, %c0_149, %c0_150] : memref<3x128x128xf32, #tpu.memory_space<vmem>>, vector<1x128x128xf32>
    %268 = vector.shape_cast %267 : vector<1x128x128xf32> to vector<128x128xf32>
    %cst_151 = arith.constant dense<0.000000e+00> : vector<8x128xf32>
    %269 = tpu.matmul %266, %268, %cst_151 {dimension_numbers = #tpu.dot_dimension_numbers<[1], [0], [0], [1], [0, 0, 1, 1], [], []>} : vector<8x128xf32>, vector<128x128xf32>, vector<8x128xf32> -> vector<8x128xf32>
    %270 = arith.addf %261, %269 : vector<8x128xf32>
    %cst_152 = arith.constant 0.000000e+00 : f32
    %271 = vector.broadcast %cst_152 : f32 to vector<8x128xf32>
    %272 = arith.cmpf oge, %270, %271 : vector<8x128xf32>
    %cst_153 = arith.constant 0.00999999977 : f32
    %273 = vector.broadcast %cst_153 : f32 to vector<8x128xf32>
    %274 = arith.mulf %273, %270 : vector<8x128xf32>
    %275 = arith.select %272, %270, %274 : vector<8x128xi1>, vector<8x128xf32>
    %c5_154 = arith.constant 5 : index
    %c0_155 = arith.constant 0 : index
    %276 = vector.load %arg14[%c5_154, %c0_155] : memref<6x128xf32, #tpu.memory_space<vmem>>, vector<1x128xf32>
    %277 = vector.broadcast %276 : vector<1x128xf32> to vector<8x128xf32>
    %278 = arith.mulf %275, %277 : vector<8x128xf32>
    %c5_156 = arith.constant 5 : index
    %c0_157 = arith.constant 0 : index
    %279 = vector.load %arg15[%c5_156, %c0_157] : memref<6x128xf32, #tpu.memory_space<vmem>>, vector<1x128xf32>
    %280 = vector.broadcast %279 : vector<1x128xf32> to vector<8x128xf32>
    %281 = arith.addf %278, %280 : vector<8x128xf32>
    %c0_158 = arith.constant 0 : index
    %c0_159 = arith.constant 0 : index
    %c0_160 = arith.constant 0 : index
    %282 = vector.load %arg16[%c0_158, %c0_159, %c0_160] : memref<1x8x128xf32, #tpu.memory_space<vmem>>, vector<1x8x128xf32>
    %283 = vector.shape_cast %282 : vector<1x8x128xf32> to vector<8x128xf32>
    %284 = vector.shape_cast %281 : vector<8x128xf32> to vector<1x8x128xf32>
    tpu.vector_store %arg16[%c0_158, %c0_159, %c0_160], %284 {strides = array<i32>} : memref<1x8x128xf32, #tpu.memory_space<vmem>>, vector<1x8x128xf32>,
    return
  }
  func.func @transform_0(%arg0: i32) -> (i32, i32, i32) {
    %c0_i32 = arith.constant 0 : i32
    %c0_i32_0 = arith.constant 0 : i32
    %c0_i32_1 = arith.constant 0 : i32
    return %arg0, %c0_i32, %c0_i32_0 : i32, i32, i32
  }
  func.func @transform_1(%arg0: i32) -> (i32, i32) {
    %c0_i32 = arith.constant 0 : i32
    %c0_i32_0 = arith.constant 0 : i32
    %c0_i32_1 = arith.constant 0 : i32
    return %c0_i32, %c0_i32_0 : i32, i32
  }
  func.func @transform_2(%arg0: i32) -> (i32, i32) {
    %c0_i32 = arith.constant 0 : i32
    %c0_i32_0 = arith.constant 0 : i32
    %c0_i32_1 = arith.constant 0 : i32
    return %c0_i32, %c0_i32_0 : i32, i32
  }
  func.func @transform_3(%arg0: i32) -> (i32, i32, i32) {
    %c0_i32 = arith.constant 0 : i32
    %c0_i32_0 = arith.constant 0 : i32
    %c0_i32_1 = arith.constant 0 : i32
    %c0_i32_2 = arith.constant 0 : i32
    return %c0_i32, %c0_i32_0, %c0_i32_1 : i32, i32, i32
  }
  func.func @transform_4(%arg0: i32) -> (i32, i32) {
    %c0_i32 = arith.constant 0 : i32
    %c0_i32_0 = arith.constant 0 : i32
    %c0_i32_1 = arith.constant 0 : i32
    return %c0_i32, %c0_i32_0 : i32, i32
  }
  func.func @transform_5(%arg0: i32) -> (i32, i32, i32) {
    %c0_i32 = arith.constant 0 : i32
    %c0_i32_0 = arith.constant 0 : i32
    %c0_i32_1 = arith.constant 0 : i32
    %c0_i32_2 = arith.constant 0 : i32
    return %c0_i32, %c0_i32_0, %c0_i32_1 : i32, i32, i32
  }
  func.func @transform_6(%arg0: i32) -> (i32, i32) {
    %c0_i32 = arith.constant 0 : i32
    %c0_i32_0 = arith.constant 0 : i32
    %c0_i32_1 = arith.constant 0 : i32
    return %c0_i32, %c0_i32_0 : i32, i32
  }
  func.func @transform_7(%arg0: i32) -> (i32, i32, i32) {
    %c0_i32 = arith.constant 0 : i32
    %c0_i32_0 = arith.constant 0 : i32
    %c0_i32_1 = arith.constant 0 : i32
    %c0_i32_2 = arith.constant 0 : i32
    return %c0_i32, %c0_i32_0, %c0_i32_1 : i32, i32, i32
  }
  func.func @transform_8(%arg0: i32) -> (i32, i32) {
    %c0_i32 = arith.constant 0 : i32
    %c0_i32_0 = arith.constant 0 : i32
    %c0_i32_1 = arith.constant 0 : i32
    return %c0_i32, %c0_i32_0 : i32, i32
  }
  func.func @transform_9(%arg0: i32) -> (i32, i32, i32) {
    %c0_i32 = arith.constant 0 : i32
    %c0_i32_0 = arith.constant 0 : i32
    %c0_i32_1 = arith.constant 0 : i32
    %c0_i32_2 = arith.constant 0 : i32
    return %c0_i32, %c0_i32_0, %c0_i32_1 : i32, i32, i32
  }
  func.func @transform_10(%arg0: i32) -> (i32, i32) {
    %c0_i32 = arith.constant 0 : i32
    %c0_i32_0 = arith.constant 0 : i32
    %c0_i32_1 = arith.constant 0 : i32
    return %c0_i32, %c0_i32_0 : i32, i32
  }
  func.func @transform_11(%arg0: i32) -> (i32, i32, i32) {
    %c0_i32 = arith.constant 0 : i32
    %c0_i32_0 = arith.constant 0 : i32
    %c0_i32_1 = arith.constant 0 : i32
    %c0_i32_2 = arith.constant 0 : i32
    return %c0_i32, %c0_i32_0, %c0_i32_1 : i32, i32, i32
  }
  func.func @transform_12(%arg0: i32) -> (i32, i32) {
    %c0_i32 = arith.constant 0 : i32
    %c0_i32_0 = arith.constant 0 : i32
    %c0_i32_1 = arith.constant 0 : i32
    return %c0_i32, %c0_i32_0 : i32, i32
  }
  func.func @transform_13(%arg0: i32) -> (i32, i32) {
    %c0_i32 = arith.constant 0 : i32
    %c0_i32_0 = arith.constant 0 : i32
    %c0_i32_1 = arith.constant 0 : i32
    return %c0_i32, %c0_i32_0 : i32, i32
  }
  func.func @transform_14(%arg0: i32) -> (i32, i32) {
    %c0_i32 = arith.constant 0 : i32
    %c0_i32_0 = arith.constant 0 : i32
    %c0_i32_1 = arith.constant 0 : i32
    return %c0_i32, %c0_i32_0 : i32, i32
  }
  func.func @transform_15(%arg0: i32) -> (i32, i32, i32) {
    %c0_i32 = arith.constant 0 : i32
    %c0_i32_0 = arith.constant 0 : i32
    %c0_i32_1 = arith.constant 0 : i32
    return %arg0, %c0_i32, %c0_i32_0 : i32, i32, i32
  }
}

</mosaic_0001>

<bundles_post_ra>
// kernel: embedding_stem_forward.1
= control target key start
LH: loop header
LB: loop body
LE: loop exit
PB: predicated region body
PF: predicated region fallthrough
CT: control target
= control target key end

     0   :  { %s6908_s0 = inlined_call_operand.vmem [shape: f32[2,160,2], index: 0, kind: input, shape index: {}]   ;;  %s6909_s1 = inlined_call_operand.vmem [shape: f32[2,128], index: 1, kind: input, shape index: {}]   ;;  %s6910_s2 = inlined_call_operand.vmem [shape: f32[1,128], index: 2, kind: input, shape index: {}]   ;;  %s6911_s3 = inlined_call_operand.vmem [shape: f32[3,128,128], index: 3, kind: input, shape index: {}]   ;;  %s6912_s4 = inlined_call_operand.vmem [shape: f32[1,128], index: 4, kind: input, shape index: {}]   ;;  %s6913_s5 = inlined_call_operand.hbm [shape: f32[10,128,128], index: 5, kind: input, shape index: {}]   ;;  %s6914_s6 = inlined_call_operand.vmem [shape: f32[1,128], index: 6, kind: input, shape index: {}]   ;;  %s6915_s7 = inlined_call_operand.hbm [shape: f32[3,128,128], index: 7, kind: input, shape index: {}]   ;;  %s6916_s8 = inlined_call_operand.vmem [shape: f32[1,128], index: 8, kind: input, shape index: {}]   ;;  %s6917_s9 = inlined_call_operand.hbm [shape: f32[2,128,128], index: 9, kind: input, shape index: {}]   ;;  %s6918_s10 = inlined_call_operand.vmem [shape: f32[1,128], index: 10, kind: input, shape index: {}]   ;;  %s6919_s11 = inlined_call_operand.hbm [shape: f32[3,128,128], index: 11, kind: input, shape index: {}]   ;;  %s6920_s12 = inlined_call_operand.vmem [shape: f32[1,128], index: 12, kind: input, shape index: {}]   ;;  %s6921_s13 = inlined_call_operand.vmem [shape: f32[6,128], index: 13, kind: input, shape index: {}]   ;;  %s6922_s14 = inlined_call_operand.vmem [shape: f32[6,128], index: 14, kind: input, shape index: {}]   ;;  %s6923_s15 = inlined_call_operand.hbm [shape: f32[2,8,128], index: 15, kind: output, shape index: {}]  }
   0x1   :  { %6930 = sst [smem:[#allocation21_spill]] %s6908_s0 }
   0x2   :  { %6931 = sst [smem:[#allocation22_spill]] %s6909_s1 }
   0x3   :  { %20 = vsyncpa [#allocation3], 0 }
   0x4   :  { %21 = vsyncpa [#allocation6], 0 }
   0x5   :  { %22 = vsyncpa [#allocation9], 0 }
   0x6   :  { %23 = vsyncpa [#allocation4], 0 }
   0x7   :  { %25 = vsyncpa [#allocation4 + $0x1], 0  ;;  %s5795_s18 = smov 0   ;;  %s5797_s19 = smov 0  }
   0x8   :  { %s5799_s20 = smov 0   ;;  %s5801_s21 = smov 0  }
   0x9 LB: > { %6932 = sst [smem:[#allocation15_spill]] %s5692_s18  ;;  %s5816_s22 = sadd.s32 4294967295, %s5704_s21   ;;  %s5704_s21 = sphi %s5801_s21, %s6993_s21   ;;  %s5700_s20 = sphi %s5799_s20, %s6995_s20   ;;  %s5696_s19 = sphi %s5797_s19, %s6997_s19   ;;  %s5692_s18 = sphi %s5795_s18, %s6996_s18  }
   0xa   : > { %6933 = sst [smem:[#allocation16_spill]] %s5700_s20  ;;  %s3926_s23 = sadd.s32 4294967294, %s5704_s21  }
   0xb   : > { %6934 = sst [smem:[#allocation17_spill]] %s5704_s21  ;;  %s5820_s24 = sadd.s32 1, %s5704_s21  }
   0xc   : > { %6935 = sst [smem:[#allocation18_spill]] %s5820_s24  ;;  %s358_s25 = sadd.s32 1, %s5700_s20 }
   0xd   : > { %s355_s26 = ssub.s32 %s5704_s21, %s5820_s24  ;;  %p368_p0 = scmp.ne.s32.totalorder %s5700_s20, %s5696_s19 }
   0xe   : > { %p356_p1 = scmp.eq.s32.totalorder %s355_s26, 0  ;;  %p369_p2 = scmp.eq.s32.totalorder %s5816_s22, 1 }
   0xf   : > { %p374_p3 = scmp.ne.s32.totalorder %s5696_s19, %s5692_s18  ;;  %p375_p4 = scmp.eq.s32.totalorder %s3926_s23, 1 }
  0x10   : > { %s5831_s27 = scalar_select %p356_p1, %s5700_s20, %s358_s25  }
  0x11   : > { %p5833_p5 = por %p369_p2, %p368_p0  ;;  %p5837_p6 = por %p375_p4, %p374_p3 }
  0x12   : > { %6936 = sst [smem:[#allocation19_spill]] %s5831_s27  ;;  %p3927_p7 = scmp.ge.s32.totalorder %s5704_s21, 1 }
  0x13   : > { %s6938_s29 = scalar_select %p5837_p6, 1, 0 }
  0x14   : > { %p382_p8 = scmp.lt.s32.totalorder %s5704_s21, 3  ;;  %p5479_p9 = scmp.eq.s32.totalorder %s5816_s22, 0 }
  0x15   : > { %6939 = sst [smem:[#allocation20_spill]] %s6938_s29  ;;  %s5706_s16 = smov [#allocation5]  }
  0x16   : > { %p5844_p10 = pnand %p3927_p7, %p382_p8  ;;  %s422_s17 = sshll.u32 %s5706_s16, 4  ;;  %s423_s17 = int_to_ptr.vmem [resolvable:$true] %s422_s17 }
  0x17   : > { %s5707_s25 = smov [#allocation2]   ;;  %s5708_s27 = smov [#allocation7]  }
  0x18   : > { %p5462_p11 = pneg %p5844_p10  ;;  %s406_s26 = sshll.u32 %s5707_s25, 4  ;;  %s407_s26 = int_to_ptr.vmem [resolvable:$true] %s406_s26 }
  0x19   : > { %s438_s20 = sshll.u32 %s5708_s27, 4  ;;  %s5539_s24 = scalar_lea.vmem %s423_s17, 6144  ;;  %s439_s20 = int_to_ptr.vmem [resolvable:$true] %s438_s20 }
  0x1a   : > { %p5852_p12 = pnand %p5479_p9, %p5462_p11  ;;  %p5540_p0 = scmp.ne.s32.totalorder %s423_s17, %s5539_s24 }
  0x1b   : > { %p5547_p3 = scmp.lt.s32.totalorder %s423_s17, %s423_s17  ;;  %p5548_p4 = scmp.lt.s32.totalorder %s5539_s24, %s5539_s24 }
  0x1c   : > { %p5530_p13 = pneg %p5852_p12 }
  0x1d   : > { %p5549_p7 = por %p5548_p4, %p5547_p3 }
  0x1e   : > { %p5542_p1 = pnand %p5540_p0, %p5530_p13 }
  0x20   : > { %p5543_p2 = pneg %p5542_p1 }
  0x22   : > { %p5550_p8 = pnand %p5549_p7, %p5543_p2 }
  0x24   : > { %5553 = shalt.err (!%p5550_p8)
}
  0x25   : > { %s5709_s16 = smov 128   ;;  %s5710_s25 = smov 8  }
  0x26   : > { %5468 = dma.hbm_to_vmem [thread:$0]  (!%p5852_p12), %s6915_s7, 6144, %s423_s17, [#allocation6], %s5709_s16, %s5709_s16, %s5710_s25  }
  0x27   : > { %s5565_s18 = scalar_lea.vmem %s407_s26, 20480  ;;  %p5573_p2 = scmp.lt.s32.totalorder %s407_s26, %s407_s26 }
  0x28   : > { %p5566_p11 = scmp.ne.s32.totalorder %s407_s26, %s5565_s18  ;;  %p5574_p3 = scmp.lt.s32.totalorder %s5565_s18, %s5565_s18 }
  0x2a   : > { %p5568_p0 = pnand %p5566_p11, %p5530_p13  ;;  %p5575_p4 = por %p5574_p3, %p5573_p2 }
  0x2c   : > { %p5569_p1 = pneg %p5568_p0 }
  0x2e   : > { %p5576_p7 = pnand %p5575_p4, %p5569_p1 }
  0x30   : > { %5579 = shalt.err (!%p5576_p7)
}
  0x31   : > { %5465 = dma.hbm_to_vmem [thread:$0]  (!%p5852_p12), %s6913_s5, 20480, %s407_s26, [#allocation3], %s5709_s16, %s5709_s16, %s5710_s25  }
  0x32   : > { %s5591_s29 = scalar_lea.vmem %s439_s20, 4096  ;;  %p5599_p2 = scmp.lt.s32.totalorder %s439_s20, %s439_s20 }
  0x33   : > { %p5592_p8 = scmp.ne.s32.totalorder %s439_s20, %s5591_s29  ;;  %p5600_p1 = scmp.lt.s32.totalorder %s5591_s29, %s5591_s29 }
  0x35   : > { %p5594_p11 = pnand %p5592_p8, %p5530_p13  ;;  %p5601_p3 = por %p5600_p1, %p5599_p2 }
  0x37   : > { %p5595_p0 = pneg %p5594_p11 }
  0x39   : > { %p5602_p4 = pnand %p5601_p3, %p5595_p0 }
  0x3b   : > { %5605 = shalt.err (!%p5602_p4)
}
  0x3c   : > { %5471 = dma.hbm_to_vmem [thread:$0]  (!%p5852_p12), %s6917_s9, 4096, %s439_s20, [#allocation6], %s5709_s16, %s5709_s16, %s5710_s25  }
  0x3d   : > { %s5711_s17 = smov [#allocation8]  }
  0x3e   : > { %s454_s26 = sshll.u32 %s5711_s17, 4  ;;  %s455_s26 = int_to_ptr.vmem [resolvable:$true] %s454_s26 }
  0x3f   : > { %s5617_s27 = scalar_lea.vmem %s455_s26, 6144  ;;  %p5625_p0 = scmp.lt.s32.totalorder %s455_s26, %s455_s26 }
  0x40   : > { %p5618_p7 = scmp.ne.s32.totalorder %s455_s26, %s5617_s27  ;;  %p5626_p2 = scmp.lt.s32.totalorder %s5617_s27, %s5617_s27 }
  0x42   : > { %p5620_p8 = pnand %p5618_p7, %p5530_p13  ;;  %p5627_p1 = por %p5626_p2, %p5625_p0 }
  0x44   : > { %p5621_p11 = pneg %p5620_p8 }
  0x46   : > { %p5628_p3 = pnand %p5627_p1, %p5621_p11 }
  0x48   : > { %5631 = shalt.err (!%p5628_p3)
}
  0x49   : > { %5474 = dma.hbm_to_vmem [thread:$0]  (!%p5852_p12), %s6919_s11, 6144, %s455_s26, [#allocation9], %s5709_s16, %s5709_s16, %s5710_s25  }
  0x4a   : > { %487 = sbr.rel (%p5844_p10) target bundleno = 1612 (0x64c), region = 80 }
  0x4f   : > { %5675 = dma.done.wait (%p5479_p9), [#allocation3], 20480  }
  0x50   : > { %5677 = vsyncadd (%p5479_p9), [#allocation3], 4294946816 }
  0x51   : > { %5679 = dma.done.wait (%p5479_p9), [#allocation6], 10240  }
  0x52   : > { %5681 = vsyncadd (%p5479_p9), [#allocation6], 4294957056 }
  0x53   : > { %5683 = dma.done.wait (%p5479_p9), [#allocation9], 6144  }
  0x54   : > { %5685 = vsyncadd (%p5479_p9), [#allocation9], 4294961152  ;;  %p547_p10 = scmp.lt.s32.totalorder %s5816_s22, 1  ;;  %vm641_vm0 = vcmask 1041408   ;;  %vm580_vm1 = vcmask 15360   ;;  %s6942_s0 = sld [smem:[#allocation21_spill]] }
  0x55   : > { %s6943_s1 = sld [smem:[#allocation22_spill]]  ;;  %v3979_v6 = vld [vmem:[%s6911_s3 + $0xf8] sm:$0xff]  ;;  %v3978_v7 = vld [vmem:[%s6911_s3 + $0xf0] sm:$0xff]  ;;  %v3977_v10 = vld [vmem:[%s6911_s3 + $0xe8] sm:$0xff]  ;;  %s544_s18 = sand.u32 1, %s5696_s19  }
  0x56   : > { %s548_s30 = scalar_select %p547_p10, %s5816_s22, 1  ;;  %4627 = vmatprep.subr.mxu1 %v3979_v6  ;;  %v3976_v11 = vld [vmem:[%s6911_s3 + $0xe0] sm:$0xff]  ;;  %v3975_v14 = vld [vmem:[%s6911_s3 + $0xd8] sm:$0xff]  ;;  %v3974_v15 = vld [vmem:[%s6911_s3 + $0xd0] sm:$0xff] }
  0x57   : > { %4628 = vmatpush3.msra.mxu1 %v3979_v6  ;;  %v3973_v18 = vld [vmem:[%s6911_s3 + $0xc8] sm:$0xff]  ;;  %v3972_v19 = vld [vmem:[%s6911_s3 + $0xc0] sm:$0xff]  ;;  %v3971_v22 = vld [vmem:[%s6911_s3 + $0xb8] sm:$0xff]  ;;  %s3938_s21 = sshll.u32 %s544_s18, 3  ;;  %s5714_s17 = smov [#allocation10]  }
  0x58   : > { %s5443_s23 = smul.u32 160, %s548_s30  ;;  %4629 = vmatprep.subr.mxu1 %v3978_v7  ;;  %v3970_v23 = vld [vmem:[%s6911_s3 + $0xb0] sm:$0xff]  ;;  %v3969_v31 = vld [vmem:[%s6911_s3 + $0xa8] sm:$0xff]  ;;  %v3968_v32 = vld [vmem:[%s6911_s3 + $0xa0] sm:$0xff]  ;;  %s546_s24 = scalar_lea.vmem [#allocation10], %s3938_s21 }
  0x59   : > { %4630 = vmatpush3.msra.mxu1 %v3978_v7  ;;  %v3967_v33 = vld [vmem:[%s6911_s3 + $0x98] sm:$0xff]  ;;  %v3966_v34 = vld [vmem:[%s6911_s3 + $0x90] sm:$0xff]  ;;  %v3965_v35 = vld [vmem:[%s6911_s3 + $0x88] sm:$0xff]  ;;  %s3826_s30 = sshll.u32 %s546_s24, 4  ;;  %s5636_s26 = sshll.u32 %s5714_s17, 4  ;;  %s3827_s30 = int_to_ptr.vmem [resolvable:$true] %s3826_s30  ;;  %s5637_s26 = int_to_ptr.vmem [resolvable:$false] %s5636_s26 }
  0x5a   : > { %s5921_s29 = scalar_lea.vmem %s6942_s0, %s5443_s23  ;;  %4631 = vmatprep.subr.mxu1 %v3977_v10  ;;  %v3964_v36 = vld [vmem:[%s6911_s3 + $0x80] sm:$0xff]  ;;  %v1466_v37 = vld [vmem:[%s6911_s3 + $0x78] sm:$0xff]  ;;  %v1465_v39 = vld [vmem:[%s6911_s3 + $0x70] sm:$0xff]  ;;  %s3813_s0 = scalar_lea.sflag [#allocation4], %s544_s18 }
  0x5b   : > { %v572_v0 = vld [vmem:[%s6943_s1] sm:$0x3]  ;;  %v553_v2 = vld [vmem:[%s5921_s29 + $0x8] sm:$0xff]  ;;  %v554_v3 = vld [vmem:[%s5921_s29 + $0x10] sm:$0xff]  ;;  %4632 = vmatpush3.msra.mxu1 %v3977_v10  ;;  %s5632_s1 = scalar_lea.vmem %s3827_s30, 128  ;;  %p5639_p4 = scmp.lt.s32.totalorder %s3827_s30, %s5637_s26 }
  0x5c   : > { %v552_v1 = vld [vmem:[%s5921_s29] sm:$0xff]  ;;  %4595 = vmatprep.subr.msk.mxu0 %vm641_vm0, %v572_v0  ;;  %v555_v4 = vld [vmem:[%s5921_s29 + $0x18] sm:$0xff]  ;;  %v557_v8 = vld [vmem:[%s5921_s29 + $0x28] sm:$0xff]  ;;  %4633 = vmatprep.subr.mxu1 %v3976_v11  ;;  %p5633_p9 = scmp.ne.s32.totalorder %s3827_s30, %s5632_s1 }
  0x5d   : > { %4597 = vmatprep.mubr.msk.f32.mxu0 %vm580_vm1, %v552_v1  ;;  %4596 = vmatpush3.msk.msra.mxu0 %vm641_vm0, %v572_v0  ;;  %v556_v5 = vld [vmem:[%s5921_s29 + $0x20] sm:$0xff]  ;;  %v558_v9 = vld [vmem:[%s5921_s29 + $0x30] sm:$0xff]  ;;  %v559_v12 = vld [vmem:[%s5921_s29 + $0x38] sm:$0xff] }
  0x5e   : > { %4598 = vmatmul.mubr.msk.f32.vlgmr.msra.gmra.mxu0 %vm580_vm1, %v553_v2  ;;  %v560_v13 = vld [vmem:[%s5921_s29 + $0x40] sm:$0xff]  ;;  %4634 = vmatpush3.msra.mxu1 %v3976_v11  ;;  %v561_v16 = vld [vmem:[%s5921_s29 + $0x48] sm:$0xff]  ;;  %v562_v17 = vld [vmem:[%s5921_s29 + $0x50] sm:$0xff]  ;;  %p5634_p12 = pnand %p5633_p9, %p5833_p5 }
  0x5f   : > { %4600 = vmatprep.mubr.msk.f32.mxu0 %vm580_vm1, %v554_v3  ;;  %4635 = vmatprep.subr.mxu1 %v3975_v14  ;;  %v563_v20 = vld [vmem:[%s5921_s29 + $0x58] sm:$0xff]  ;;  %v564_v21 = vld [vmem:[%s5921_s29 + $0x60] sm:$0xff]  ;;  %v565_v24 = vld [vmem:[%s5921_s29 + $0x68] sm:$0xff] }
  0x60   : > { %4636 = vmatpush3.msra.mxu1 %v3975_v14  ;;  %v566_v25 = vld [vmem:[%s5921_s29 + $0x70] sm:$0xff]  ;;  %v567_v26 = vld [vmem:[%s5921_s29 + $0x78] sm:$0xff]  ;;  %v568_v27 = vld [vmem:[%s5921_s29 + $0x80] sm:$0xff]  ;;  %4689 = vmatprep.subr.mxu0 %v1466_v37  ;;  %p5635_p13 = pneg %p5634_p12 }
  0x61   : > { %4637 = vmatprep.subr.mxu1 %v3974_v15  ;;  %v569_v28 = vld [vmem:[%s5921_s29 + $0x88] sm:$0xff]  ;;  %v570_v29 = vld [vmem:[%s5921_s29 + $0x90] sm:$0xff]  ;;  %v571_v30 = vld [vmem:[%s5921_s29 + $0x98] sm:$0xff]  ;;  %4690 = vmatpush3.msra.mxu0 %v1466_v37  ;;  %s4104_s29 = sshll.u32 %s5816_s22, 7  ;;  %s5638_s22 = scalar_lea.vmem %s5637_s26, 256 }
  0x62   : > { %4601 = vmatmul.mubr.msk.f32.gmra.mxu0 %vm580_vm1, %v555_v4  ;;  %4638 = vmatpush3.msra.mxu1 %v3974_v15  ;;  %v6020_v38 = vld [vmem:[%s6911_s3 + $0x178] sm:$0xff]  ;;  %v1464_v40 = vld [vmem:[%s6911_s3 + $0x68] sm:$0xff]  ;;  %v1463_v41 = vld [vmem:[%s6911_s3 + $0x60] sm:$0xff]  ;;  %s3824_s25 = scalar_lea.hbm %s6923_s15, %s4104_s29  ;;  %p5640_p7 = scmp.lt.s32.totalorder %s5638_s22, %s5632_s1 }
  0x63   : > { %4603 = vmatprep.mubr.msk.f32.mxu0 %vm580_vm1, %v556_v5  ;;  %4639 = vmatprep.subr.mxu1 %v3973_v18  ;;  %v1462_v42 = vld [vmem:[%s6911_s3 + $0x58] sm:$0xff]  ;;  %v1461_v43 = vld [vmem:[%s6911_s3 + $0x50] sm:$0xff]  ;;  %v1460_v44 = vld [vmem:[%s6911_s3 + $0x48] sm:$0xff] }
  0x64   : > { %4640 = vmatpush3.msra.mxu1 %v3973_v18  ;;  %4691 = vmatprep.subr.mxu0 %v1465_v39  ;;  %v1459_v45 = vld [vmem:[%s6911_s3 + $0x40] sm:$0xff]  ;;  %v1458_v46 = vld [vmem:[%s6911_s3 + $0x38] sm:$0xff]  ;;  %v1457_v47 = vld [vmem:[%s6911_s3 + $0x30] sm:$0xff]  ;;  %p5641_p8 = por %p5640_p7, %p5639_p4 }
  0x65   : > { %4641 = vmatprep.subr.mxu1 %v3972_v19  ;;  %4692 = vmatpush3.msra.mxu0 %v1465_v39  ;;  %v1456_v48 = vld [vmem:[%s6911_s3 + $0x28] sm:$0xff]  ;;  %v1455_v49 = vld [vmem:[%s6911_s3 + $0x20] sm:$0xff]  ;;  %v1454_v50 = vld [vmem:[%s6911_s3 + $0x18] sm:$0xff] }
  0x66   : > { %4604 = vmatmul.mubr.msk.f32.gmra.mxu0 %vm580_vm1, %v557_v8  ;;  %4642 = vmatpush3.msra.mxu1 %v3972_v19  ;;  %v1453_v51 = vld [vmem:[%s6911_s3 + $0x10] sm:$0xff]  ;;  %v1452_v52 = vld [vmem:[%s6911_s3 + $0x8] sm:$0xff]  ;;  %v1451_v53 = vld [vmem:[%s6911_s3] sm:$0xff]  ;;  %p5642_p11 = pnand %p5641_p8, %p5635_p13 }
  0x67   : > { %4606 = vmatprep.mubr.msk.f32.mxu0 %vm580_vm1, %v558_v9  ;;  %4643 = vmatprep.subr.mxu1 %v3971_v22  ;;  %v6071_v54 = vld [vmem:[%s6910_s2] ss:$0 sm:$0xff] }
  0x68   : > { %4644 = vmatpush3.msra.mxu1 %v3971_v22  ;;  %4693 = vmatprep.subr.mxu0 %v1464_v40  ;;  %v6078_v60 = vld [vmem:[%s6921_s13] ss:$0 sm:$0xff] }
  0x69   : > { %4645 = vmatprep.subr.mxu1 %v3970_v23  ;;  %4694 = vmatpush3.msra.mxu0 %v1464_v40  ;;  %v6086_v6 = vld [vmem:[%s6922_s14] ss:$0 sm:$0xff] }
  0x6a   : > { %4607 = vmatmul.mubr.msk.f32.gmra.mxu0 %vm580_vm1, %v559_v12  ;;  %4646 = vmatpush3.msra.mxu1 %v3970_v23 }
  0x6b   : > { %4609 = vmatprep.mubr.msk.f32.mxu0 %vm580_vm1, %v560_v13  ;;  %4647 = vmatprep.subr.mxu1 %v3969_v31 }
  0x6c   : > { %4648 = vmatpush3.msra.mxu1 %v3969_v31  ;;  %4695 = vmatprep.subr.mxu0 %v1463_v41 }
  0x6d   : > { %4649 = vmatprep.subr.mxu1 %v3968_v32  ;;  %4696 = vmatpush3.msra.mxu0 %v1463_v41 }
  0x6e   : > { %4610 = vmatmul.mubr.msk.f32.gmra.mxu0 %vm580_vm1, %v561_v16  ;;  %4650 = vmatpush3.msra.mxu1 %v3968_v32 }
  0x6f   : > { %4612 = vmatprep.mubr.msk.f32.mxu0 %vm580_vm1, %v562_v17  ;;  %4651 = vmatprep.subr.mxu1 %v3967_v33 }
  0x70   : > { %4652 = vmatpush3.msra.mxu1 %v3967_v33  ;;  %4697 = vmatprep.subr.mxu0 %v1462_v42 }
  0x71   : > { %4653 = vmatprep.subr.mxu1 %v3966_v34  ;;  %4698 = vmatpush3.msra.mxu0 %v1462_v42  ;;  %v4032_v42 = vld [vmem:[%s6911_s3 + $0x158] sm:$0xff] }
  0x72   : > { %4613 = vmatmul.mubr.msk.f32.gmra.mxu0 %vm580_vm1, %v563_v20  ;;  %4654 = vmatpush3.msra.mxu1 %v3966_v34  ;;  %v4035_v20 = vld [vmem:[%s6911_s3 + $0x170] sm:$0xff] }
  0x73   : > { %4615 = vmatprep.mubr.msk.f32.mxu0 %vm580_vm1, %v564_v21  ;;  %4655 = vmatprep.subr.mxu1 %v3965_v35 }
  0x74   : > { %4656 = vmatpush3.msra.mxu1 %v3965_v35  ;;  %4699 = vmatprep.subr.mxu0 %v1461_v43  ;;  %v4033_v35 = vld [vmem:[%s6911_s3 + $0x160] sm:$0xff] }
  0x75   : > { %4657 = vmatprep.subr.mxu1 %v3964_v36  ;;  %4700 = vmatpush3.msra.mxu0 %v1461_v43 }
  0x76   : > { %4616 = vmatmul.mubr.msk.f32.gmra.mxu0 %vm580_vm1, %v565_v24  ;;  %4658 = vmatpush3.msra.mxu1 %v3964_v36 }
  0x77   : > { %4618 = vmatprep.mubr.msk.f32.mxu0 %vm580_vm1, %v566_v25  ;;  %4751 = vmatprep.subr.mxu1 %v6020_v38 }
  0x78   : > { %4701 = vmatprep.subr.mxu0 %v1460_v44 }
  0x79   : > { %4702 = vmatpush3.msra.mxu0 %v1460_v44 }
  0x7a   : > { %4619 = vmatmul.mubr.msk.f32.gmra.mxu0 %vm580_vm1, %v567_v26  ;;  %4703 = vmatprep.subr.mxu0 %v1459_v45 }
  0x7b   : > { %4621 = vmatprep.mubr.msk.f32.mxu0 %vm580_vm1, %v568_v27  ;;  %4704 = vmatpush3.msra.mxu0 %v1459_v45 }
  0x7c   : > { %4705 = vmatprep.subr.mxu0 %v1458_v46 }
  0x7d   : > { %4706 = vmatpush3.msra.mxu0 %v1458_v46 }
  0x7e   : > { %4622 = vmatmul.mubr.msk.f32.gmra.mxu0 %vm580_vm1, %v569_v28  ;;  %4707 = vmatprep.subr.mxu0 %v1457_v47  ;;  %v4034_v28 = vld [vmem:[%s6911_s3 + $0x168] sm:$0xff] }
  0x7f   : > { %4624 = vmatprep.mubr.msk.f32.mxu0 %vm580_vm1, %v570_v29  ;;  %4708 = vmatpush3.msra.mxu0 %v1457_v47 }
  0x80   : > { %4709 = vmatprep.subr.mxu0 %v1456_v48 }
  0x81   : > { %4710 = vmatpush3.msra.mxu0 %v1456_v48 }
  0x82   : > { %4625 = vmatmul.mubr.msk.f32.gmra.mxu0 %vm580_vm1, %v571_v30  ;;  %4711 = vmatprep.subr.mxu0 %v1455_v49 }
  0x83   : > { %4712 = vmatpush3.msra.mxu0 %v1455_v49  ;;  %v4031_v49 = vld [vmem:[%s6911_s3 + $0x150] sm:$0xff] }
  0x84   : > { %4713 = vmatprep.subr.mxu0 %v1454_v50 }
  0x85   : > { %4714 = vmatpush3.msra.mxu0 %v1454_v50 }
  0x86   : > { %4715 = vmatprep.subr.mxu0 %v1453_v51 }
  0x87   : > { %4716 = vmatpush3.msra.mxu0 %v1453_v51 }
  0x88   : > { %4717 = vmatprep.subr.mxu0 %v1452_v52 }
  0x89   : > { %4718 = vmatpush3.msra.mxu0 %v1452_v52 }
  0x8a   : > { %4719 = vmatprep.subr.mxu0 %v1451_v53 }
  0x8b   : > { %4720 = vmatpush3.msra.mxu0 %v1451_v53 }
 0x11e   : > { %v4599_v55 = vpop.f32.mrf.mxu0 }
 0x11f   : > { %v717_v56 = vadd.f32 %v4599_v55, %v6071_v54 }
 0x120   : > { %v711_v57 = vpop.f32.mrf.mxu0 }
 0x121   : > { %vm811_vm2 = vcmp.ge.f32.partialorder %v717_v56, 0.0  ;;  %v831_v58 = vmul.f32 0.01, %v717_v56  ;;  %v712_v59 = vadd.f32 %v6071_v54, %v711_v57  ;;  %v4030_v57 = vld [vmem:[%s6911_s3 + $0x148] sm:$0xff] }
 0x122   : > { %v4602_v61 = vpop.f32.mrf.mxu0 }
 0x123   : > { %v851_v62 = vsel %vm811_vm2, %v717_v56, %v831_v58  ;;  %vm810_vm3 = vcmp.ge.f32.partialorder %v712_v59, 0.0  ;;  %v830_v63 = vmul.f32 0.01, %v712_v59  ;;  %v727_v0 = vadd.f32 %v4602_v61, %v6071_v54 }
 0x124   : > { %v721_v1 = vpop.f32.mrf.mxu0  ;;  %v876_v2 = vmul.f32 %v6078_v60, %v851_v62 }
 0x125   : > { %v850_v3 = vsel %vm810_vm3, %v712_v59, %v830_v63  ;;  %vm813_vm4 = vcmp.ge.f32.partialorder %v727_v0, 0.0  ;;  %v833_v4 = vmul.f32 0.01, %v727_v0  ;;  %v722_v5 = vadd.f32 %v6071_v54, %v721_v1  ;;  %v4029_v1 = vld [vmem:[%s6911_s3 + $0x140] sm:$0xff] }
 0x126   : > { %v4605_v7 = vpop.f32.mrf.mxu0  ;;  %v875_v8 = vmul.f32 %v6078_v60, %v850_v3  ;;  %v6094_v14 = vadd.f32 %v6086_v6, %v876_v2 }
 0x127   : > { %v853_v9 = vsel %vm813_vm4, %v727_v0, %v833_v4  ;;  %vm812_vm5 = vcmp.ge.f32.partialorder %v722_v5, 0.0  ;;  %v832_v10 = vmul.f32 0.01, %v722_v5  ;;  %v737_v11 = vadd.f32 %v4605_v7, %v6071_v54 }
 0x128   : > { %v731_v12 = vpop.f32.mrf.mxu0  ;;  %v6091_v13 = vadd.f32 %v6086_v6, %v875_v8  ;;  %v878_v15 = vmul.f32 %v6078_v60, %v853_v9  ;;  %v4028_v9 = vld [vmem:[%s6911_s3 + $0x138] sm:$0xff] }
 0x129   : > { %v852_v16 = vsel %vm812_vm5, %v722_v5, %v832_v10  ;;  %vm815_vm6 = vcmp.ge.f32.partialorder %v737_v11, 0.0  ;;  %v835_v17 = vmul.f32 0.01, %v737_v11  ;;  %v732_v18 = vadd.f32 %v6071_v54, %v731_v12 }
 0x12a   : > { %v4608_v19 = vpop.f32.mrf.mxu0  ;;  %4659 = vmatprep.mubr.f32.mxu1 %v6091_v13  ;;  %v877_v21 = vmul.f32 %v6078_v60, %v852_v16  ;;  %v6110_v27 = vadd.f32 %v6086_v6, %v878_v15 }
 0x12b   : > { %v855_v22 = vsel %vm815_vm6, %v737_v11, %v835_v17  ;;  %vm814_vm7 = vcmp.ge.f32.partialorder %v732_v18, 0.0  ;;  %v834_v23 = vmul.f32 0.01, %v732_v18  ;;  %v747_v24 = vadd.f32 %v4608_v19, %v6071_v54  ;;  %4660 = vmatmul.mubr.f32.vlgmr.msra.gmra.mxu1 %v6094_v14 }
 0x12c   : > { %4752 = vmatpush3.msra.mxu1 %v6020_v38  ;;  %v741_v25 = vpop.f32.mrf.mxu0  ;;  %v6107_v26 = vadd.f32 %v6086_v6, %v877_v21  ;;  %v880_v29 = vmul.f32 %v6078_v60, %v855_v22 }
 0x12d   : > { %v854_v30 = vsel %vm814_vm7, %v732_v18, %v834_v23  ;;  %vm817_vm8 = vcmp.ge.f32.partialorder %v747_v24, 0.0  ;;  %v837_v31 = vmul.f32 0.01, %v747_v24  ;;  %v742_v32 = vadd.f32 %v6071_v54, %v741_v25  ;;  %4753 = vmatprep.subr.mxu1 %v4035_v20  ;;  %v4027_v18 = vld [vmem:[%s6911_s3 + $0x130] sm:$0xff] }
 0x12e   : > { %v4611_v33 = vpop.f32.mrf.mxu0  ;;  %4662 = vmatprep.mubr.f32.mxu1 %v6107_v26  ;;  %4754 = vmatpush3.msra.mxu1 %v4035_v20  ;;  %v879_v34 = vmul.f32 %v6078_v60, %v854_v30  ;;  %v6128_v41 = vadd.f32 %v6086_v6, %v880_v29  ;;  %v921_v29 = vlaneseq }
 0x12f   : > { %v857_v36 = vsel %vm817_vm8, %v747_v24, %v837_v31  ;;  %vm816_vm9 = vcmp.ge.f32.partialorder %v742_v32, 0.0  ;;  %v836_v37 = vmul.f32 0.01, %v742_v32  ;;  %v757_v38 = vadd.f32 %v4611_v33, %v6071_v54  ;;  %4663 = vmatmul.mubr.f32.gmra.mxu1 %v6110_v27  ;;  %4755 = vmatprep.subr.mxu1 %v4034_v28 }
 0x130   : > { %v751_v39 = vpop.f32.mrf.mxu0  ;;  %4756 = vmatpush3.msra.mxu1 %v4034_v28  ;;  %v6125_v40 = vadd.f32 %v6086_v6, %v879_v34  ;;  %v882_v43 = vmul.f32 %v6078_v60, %v857_v36  ;;  %v4026_v28 = vld [vmem:[%s6911_s3 + $0x128] sm:$0xff] }
 0x131   : > { %v856_v44 = vsel %vm816_vm9, %v742_v32, %v836_v37  ;;  %vm819_vm10 = vcmp.ge.f32.partialorder %v757_v38, 0.0  ;;  %v839_v45 = vmul.f32 0.01, %v757_v38  ;;  %v752_v46 = vadd.f32 %v6071_v54, %v751_v39  ;;  %4757 = vmatprep.subr.mxu1 %v4033_v35 }
 0x132   : > { %v4614_v47 = vpop.f32.mrf.mxu0  ;;  %4665 = vmatprep.mubr.f32.mxu1 %v6125_v40  ;;  %4758 = vmatpush3.msra.mxu1 %v4033_v35  ;;  %v881_v48 = vmul.f32 %v6078_v60, %v856_v44  ;;  %v6146_v56 = vadd.f32 %v6086_v6, %v882_v43  ;;  %v4025_v35 = vld [vmem:[%s6911_s3 + $0x120] sm:$0xff] }
 0x133   : > { %v859_v50 = vsel %vm819_vm10, %v757_v38, %v839_v45  ;;  %vm818_vm11 = vcmp.ge.f32.partialorder %v752_v46, 0.0  ;;  %v838_v51 = vmul.f32 0.01, %v752_v46  ;;  %v767_v52 = vadd.f32 %v4614_v47, %v6071_v54  ;;  %4666 = vmatmul.mubr.f32.gmra.mxu1 %v6128_v41  ;;  %4759 = vmatprep.subr.mxu1 %v4032_v42  ;;  %v4024_v45 = vld [vmem:[%s6911_s3 + $0x118] sm:$0xff] }
 0x134   : > { %v761_v53 = vpop.f32.mrf.mxu0  ;;  %4760 = vmatpush3.msra.mxu1 %v4032_v42  ;;  %v6143_v55 = vadd.f32 %v6086_v6, %v881_v48  ;;  %v884_v58 = vmul.f32 %v6078_v60, %v859_v50 }
 0x135   : > { %v858_v59 = vsel %vm818_vm11, %v752_v46, %v838_v51  ;;  %vm821_vm12 = vcmp.ge.f32.partialorder %v767_v52, 0.0  ;;  %v841_v61 = vmul.f32 0.01, %v767_v52  ;;  %v762_v62 = vadd.f32 %v6071_v54, %v761_v53  ;;  %4761 = vmatprep.subr.mxu1 %v4031_v49 }
 0x136   : > { %v4617_v63 = vpop.f32.mrf.mxu0  ;;  %4668 = vmatprep.mubr.f32.mxu1 %v6143_v55  ;;  %4762 = vmatpush3.msra.mxu1 %v4031_v49  ;;  %v883_v0 = vmul.f32 %v6078_v60, %v858_v59  ;;  %v6164_v8 = vadd.f32 %v6086_v6, %v884_v58  ;;  %v6206_v46 = vshrl.u32 %v921_v29, 7 }
 0x137   : > { %v861_v2 = vsel %vm821_vm12, %v767_v52, %v841_v61  ;;  %vm820_vm13 = vcmp.ge.f32.partialorder %v762_v62, 0.0  ;;  %v840_v3 = vmul.f32 0.01, %v762_v62  ;;  %v777_v4 = vadd.f32 %v4617_v63, %v6071_v54  ;;  %4669 = vmatmul.mubr.f32.gmra.mxu1 %v6146_v56  ;;  %4763 = vmatprep.subr.mxu1 %v4030_v57  ;;  %v4023_v52 = vld [vmem:[%s6911_s3 + $0x110] sm:$0xff] }
 0x138   : > { %v771_v5 = vpop.f32.mrf.mxu0  ;;  %v6161_v7 = vadd.f32 %v6086_v6, %v883_v0  ;;  %4764 = vmatpush3.msra.mxu1 %v4030_v57  ;;  %v886_v10 = vmul.f32 %v6078_v60, %v861_v2  ;;  %v6215_v53 = vadd.s32 8, %v6206_v46  ;;  %v924_v2 = vadd.s32 16, %v6206_v46 }
 0x139   : > { %v860_v11 = vsel %vm820_vm13, %v762_v62, %v840_v3  ;;  %vm823_vm14 = vcmp.ge.f32.partialorder %v777_v4, 0.0  ;;  %v843_v12 = vmul.f32 0.01, %v777_v4  ;;  %v772_v15 = vadd.f32 %v6071_v54, %v771_v5  ;;  %4765 = vmatprep.subr.mxu1 %v4029_v1 }
 0x13a   : > { %v4620_v16 = vpop.f32.mrf.mxu0  ;;  %4671 = vmatprep.mubr.f32.mxu1 %v6161_v7  ;;  %4766 = vmatpush3.msra.mxu1 %v4029_v1  ;;  %v885_v17 = vmul.f32 %v6078_v60, %v860_v11  ;;  %v6182_v24 = vadd.f32 %v6086_v6, %v886_v10  ;;  %v4022_v1 = vld [vmem:[%s6911_s3 + $0x108] sm:$0xff]  ;;  %v946_v10 = vand.u32 7, %v6206_v46  ;;  %v953_v11 = vand.u32 7, %v6215_v53 }
 0x13b   : > { %v863_v19 = vsel %vm823_vm14, %v777_v4, %v843_v12  ;;  %vm822_vm15 = vcmp.ge.f32.partialorder %v772_v15, 0.0  ;;  %v842_v20 = vmul.f32 0.01, %v772_v15  ;;  %v787_v21 = vadd.f32 %v4620_v16, %v6071_v54  ;;  %4672 = vmatmul.mubr.f32.gmra.mxu1 %v6164_v8  ;;  %4767 = vmatprep.subr.mxu1 %v4028_v9  ;;  %v4021_v12 = vld [vmem:[%s6911_s3 + $0x100] sm:$0xff] }
 0x13c   : > { %v781_v22 = vpop.f32.mrf.mxu0  ;;  %v6179_v23 = vadd.f32 %v6086_v6, %v885_v17  ;;  %4768 = vmatpush3.msra.mxu1 %v4028_v9  ;;  %v888_v25 = vmul.f32 %v6078_v60, %v863_v19  ;;  %vm1410_vm6 = vcmp.lt.s32.totalorder %v6206_v46, 1  ;;  %vm1692_vm7 = vcmp.lt.s32.totalorder %v6206_v46, 7 }
 0x13d   : > { %v862_v30 = vsel %vm822_vm15, %v772_v15, %v842_v20  ;;  %vm825_vm0 = vcmp.ge.f32.partialorder %v787_v21, 0.0  ;;  %v845_v31 = vmul.f32 0.01, %v787_v21  ;;  %v782_v32 = vadd.f32 %v6071_v54, %v781_v22  ;;  %4769 = vmatprep.subr.mxu1 %v4027_v18 }
 0x13e   : > { %v4623_v33 = vpop.f32.mrf.mxu0  ;;  %4674 = vmatprep.mubr.f32.mxu1 %v6179_v23  ;;  %v887_v34 = vmul.f32 %v6078_v60, %v862_v30  ;;  %4770 = vmatpush3.msra.mxu1 %v4027_v18  ;;  %v6200_v43 = vadd.f32 %v6086_v6, %v888_v25  ;;  %vm6254_vm8 = vcmp.ne.s32.totalorder %v946_v10, 0  ;;  %v926_v29 = vadd.s32 32, %v6206_v46 }
 0x13f   : > { %v865_v36 = vsel %vm825_vm0, %v787_v21, %v845_v31  ;;  %vm824_vm1 = vcmp.ge.f32.partialorder %v782_v32, 0.0  ;;  %v844_v37 = vmul.f32 0.01, %v782_v32  ;;  %v797_v38 = vadd.f32 %v4623_v33, %v6071_v54  ;;  %4675 = vmatmul.mubr.f32.gmra.mxu1 %v6182_v24  ;;  %4771 = vmatprep.subr.mxu1 %v4026_v28  ;;  %v3219_v31 = vld [vmem:[#allocation5 + $0x128] sm:$0xff] }
 0x140   : > { %v791_v39 = vpop.f32.mrf.mxu0  ;;  %v6197_v42 = vadd.f32 %v6086_v6, %v887_v34  ;;  %4772 = vmatpush3.msra.mxu1 %v4026_v28  ;;  %v890_v44 = vmul.f32 %v6078_v60, %v865_v36  ;;  %v960_v21 = vand.u32 7, %v924_v2  ;;  %v1390_v30 = vrot.slane %v6091_v13, 7  ;;  %v3717_v28 = vld [vmem:[#allocation8 + $0x140] sm:$0xff] }
 0x141   : > { %v864_v47 = vsel %vm824_vm1, %v782_v32, %v844_v37  ;;  %vm827_vm2 = vcmp.ge.f32.partialorder %v797_v38, 0.0  ;;  %v847_v48 = vmul.f32 0.01, %v797_v38  ;;  %v792_v49 = vadd.f32 %v6071_v54, %v791_v39  ;;  %4773 = vmatprep.subr.mxu1 %v4025_v35 }
 0x142   : > { %v4626_v50 = vpop.f32.mrf.mxu0  ;;  %4677 = vmatprep.mubr.f32.mxu1 %v6197_v42  ;;  %v889_v51 = vmul.f32 %v6078_v60, %v864_v47  ;;  %4774 = vmatpush3.msra.mxu1 %v4025_v35  ;;  %v6223_v63 = vadd.f32 %v6086_v6, %v890_v44  ;;  %vm6261_vm9 = vcmp.ne.s32.totalorder %v953_v11, 0  ;;  %vm6270_vm10 = vcmp.ne.s32.totalorder %v946_v10, 7 }
 0x143   : > { %v867_v57 = vsel %vm827_vm2, %v797_v38, %v847_v48  ;;  %vm826_vm3 = vcmp.ge.f32.partialorder %v792_v49, 0.0  ;;  %v846_v58 = vmul.f32 0.01, %v792_v49  ;;  %v807_v59 = vadd.f32 %v4626_v50, %v6071_v54  ;;  %4678 = vmatmul.mubr.f32.gmra.mxu1 %v6200_v43  ;;  %4775 = vmatprep.subr.mxu1 %v4024_v45 }
 0x144   : > { %v801_v61 = vpop.f32.mrf.mxu0  ;;  %v6220_v62 = vadd.f32 %v6086_v6, %v889_v51  ;;  %4776 = vmatpush3.msra.mxu1 %v4024_v45  ;;  %v892_v0 = vmul.f32 %v6078_v60, %v867_v57  ;;  %v1392_v36 = vrot.slane %v6107_v26, 7  ;;  %v1391_v37 = vrot.slane %v6094_v14, 7 }
 0x145   : > { %v866_v3 = vsel %vm826_vm3, %v792_v49, %v846_v58  ;;  %vm829_vm4 = vcmp.ge.f32.partialorder %v807_v59, 0.0  ;;  %v849_v4 = vmul.f32 0.01, %v807_v59  ;;  %v802_v5 = vadd.f32 %v6071_v54, %v801_v61  ;;  %4777 = vmatprep.subr.mxu1 %v4023_v52  ;;  %v3356_v49 = vld [vmem:[#allocation7 + $0xe0] sm:$0xff] }
 0x146   : > { %4680 = vmatprep.mubr.f32.mxu1 %v6220_v62  ;;  %v891_v9 = vmul.f32 %v6078_v60, %v866_v3  ;;  %4778 = vmatpush3.msra.mxu1 %v4023_v52  ;;  %v925_v54 = vadd.s32 24, %v6206_v46  ;;  %v6246_v20 = vadd.f32 %v6086_v6, %v892_v0  ;;  %v1673_v38 = vrot.slane %v6094_v14, 1 }
 0x147   : > { %v869_v15 = vsel %vm829_vm4, %v807_v59, %v849_v4  ;;  %vm828_vm5 = vcmp.ge.f32.partialorder %v802_v5, 0.0  ;;  %v848_v16 = vmul.f32 0.01, %v802_v5  ;;  %4681 = vmatmul.mubr.f32.gmra.mxu1 %v6223_v63  ;;  %4779 = vmatprep.subr.mxu1 %v4022_v1  ;;  %vm6277_vm11 = vcmp.ne.s32.totalorder %v960_v21, 0 }
 0x148   : > { %v6241_v17 = vadd.f32 %v6086_v6, %v891_v9  ;;  %4780 = vmatpush3.msra.mxu1 %v4022_v1  ;;  %v894_v18 = vmul.f32 %v6078_v60, %v869_v15  ;;  %v967_v32 = vand.u32 7, %v925_v54  ;;  %v927_v44 = vadd.s32 40, %v6206_v46 }
 0x149   : > { %v868_v19 = vsel %vm828_vm5, %v802_v5, %v848_v16  ;;  %4781 = vmatprep.subr.mxu1 %v4021_v12  ;;  %v974_v47 = vand.u32 7, %v926_v29  ;;  %v928_v48 = vadd.s32 48, %v6206_v46  ;;  %v1429_v14 = vsel %vm1410_vm6, %v1390_v30, %v1391_v37 }
 0x14a   : > { %4683 = vmatprep.mubr.f32.mxu1 %v6241_v17  ;;  %v893_v22 = vmul.f32 %v6078_v60, %v868_v19  ;;  %v6252_v25 = vadd.f32 %v6086_v6, %v894_v18  ;;  %4782 = vmatpush3.msra.mxu1 %v4021_v12  ;;  %v1672_v60 = vrot.slane %v6091_v13, 1  ;;  %vm6298_vm12 = vcmp.ne.s32.totalorder %v953_v11, 7  ;;  %v2074_v13 = vld [vmem:[#allocation2 + $0xe0] sm:$0xff] }
 0x14b   : > { %4684 = vmatmul.mubr.f32.gmra.mxu1 %v6246_v20  ;;  %vm6302_vm13 = vcmp.ne.s32.totalorder %v967_v32, 0  ;;  %v1428_v51 = vsel %vm1410_vm6, %v1391_v37, %v1392_v36  ;;  %vm6312_vm14 = vcmp.ne.s32.totalorder %v960_v21, 7  ;;  %v1394_v53 = vrot.slane %v6125_v40, 7 }
 0x14c   : > { %v6267_v33 = vadd.f32 %v6086_v6, %v893_v22  ;;  %v1409_v34 = vrot.slane %v6252_v25, 7  ;;  %v1674_v6 = vrot.slane %v6107_v26, 1  ;;  %v1711_v26 = vsel %vm1692_vm7, %v1672_v60, %v1673_v38 }
 0x14d   : > { %v929_v57 = vadd.s32 56, %v6206_v46  ;;  %v1393_v58 = vrot.slane %v6110_v27, 7  ;;  %v1675_v59 = vrot.slane %v6110_v27, 1  ;;  %v981_v61 = vand.u32 7, %v927_v44 }
 0x14e   : > { %4686 = vmatprep.mubr.f32.mxu1 %v6267_v33  ;;  %v1430_v45 = vsel %vm1410_vm6, %v1409_v34, %v1390_v30  ;;  %v930_v0 = vadd.s32 64, %v6206_v46  ;;  %v1710_v1 = vsel %vm1692_vm7, %v1673_v38, %v1674_v6  ;;  %vm4109_vm15 = vcmp.ne.s32.totalorder %v974_v47, 0 }
 0x14f   : > { %4687 = vmatmul.mubr.f32.gmra.mxu1 %v6252_v25  ;;  %4721 = vmatprep.mubr.msk.f32.mxu0 %vm6254_vm8, %v1430_v45  ;;  %v1676_v2 = vrot.slane %v6125_v40, 1  ;;  %v988_v3 = vand.u32 7, %v928_v48  ;;  %v1427_v4 = vsel %vm1410_vm6, %v1392_v36, %v1393_v58  ;;  %v1709_v5 = vsel %vm1692_vm7, %v1674_v6, %v1675_v59 }
 0x150   : > { %4722 = vmatmul.mubr.msk.f32.vlgmr.msra.gmra.mxu0 %vm6261_vm9, %v1429_v14  ;;  %4783 = vmatprep.mubr.msk.f32.mxu1 %vm6270_vm10, %v1711_v26  ;;  %vm6332_vm0 = vcmp.ne.s32.totalorder %v967_v32, 7  ;;  %vm6336_vm1 = vcmp.ne.s32.totalorder %v974_v47, 7  ;;  %v1426_v40 = vsel %vm1410_vm6, %v1393_v58, %v1394_v53  ;;  %v1396_v10 = vrot.slane %v6143_v55, 7 }
 0x151   : > { %4724 = vmatprep.mubr.msk.f32.mxu0 %vm6277_vm11, %v1428_v51  ;;  %v995_v11 = vand.u32 7, %v929_v57  ;;  %v931_v12 = vadd.s32 72, %v6206_v46  ;;  %v1395_v15 = vrot.slane %v6128_v41, 7  ;;  %vm4110_vm2 = vcmp.ne.s32.totalorder %v981_v61, 0 }
 0x152   : > { %v1677_v16 = vrot.slane %v6128_v41, 1  ;;  %v1002_v54 = vand.u32 7, %v930_v0  ;;  %v1708_v18 = vsel %vm1692_vm7, %v1675_v59, %v1676_v2  ;;  %vm4111_vm3 = vcmp.ne.s32.totalorder %v988_v3, 0 }
 0x153   : > { %4784 = vmatmul.mubr.msk.f32.vlgmr.msra.gmra.mxu1 %vm6298_vm12, %v1710_v1  ;;  %v1678_v19 = vrot.slane %v6143_v55, 1  ;;  %v932_v21 = vadd.s32 80, %v6206_v46  ;;  %v1425_v22 = vsel %vm1410_vm6, %v1394_v53, %v1395_v15  ;;  %vm6360_vm4 = vcmp.ne.s32.totalorder %v981_v61, 7 }
 0x154   : > { %4725 = vmatmul.mubr.msk.f32.gmra.mxu0 %vm6302_vm13, %v1427_v4  ;;  %4786 = vmatprep.mubr.msk.f32.mxu1 %vm6312_vm14, %v1709_v5  ;;  %v1707_v29 = vsel %vm1692_vm7, %v1676_v2, %v1677_v16  ;;  %vm6364_vm5 = vcmp.ne.s32.totalorder %v988_v3, 7  ;;  %v1424_v55 = vsel %vm1410_vm6, %v1395_v15, %v1396_v10  ;;  %vm6372_vm11 = vcmp.ne.s32.totalorder %v995_v11, 0 }
 0x155   : > { %4727 = vmatprep.mubr.msk.f32.mxu0 %vm4109_vm15, %v1426_v40  ;;  %v1398_v36 = vrot.slane %v6161_v7, 7  ;;  %v1009_v37 = vand.u32 7, %v931_v12  ;;  %v1397_v38 = vrot.slane %v6146_v56, 7  ;;  %v1679_v39 = vrot.slane %v6146_v56, 1 }
 0x156   : > { %vm6379_vm13 = vcmp.ne.s32.totalorder %v1002_v54, 0  ;;  %v933_v6 = vadd.s32 88, %v6206_v46  ;;  %v1706_v45 = vsel %vm1692_vm7, %v1677_v16, %v1678_v19  ;;  %v1680_v47 = vrot.slane %v6161_v7, 1 }
 0x157   : > { %4787 = vmatmul.mubr.msk.f32.gmra.mxu1 %vm6332_vm0, %v1708_v18  ;;  %v1016_v48 = vand.u32 7, %v932_v21  ;;  %v934_v14 = vadd.s32 96, %v6206_v46  ;;  %v1423_v56 = vsel %vm1410_vm6, %v1396_v10, %v1397_v38  ;;  %v1705_v26 = vsel %vm1692_vm7, %v1678_v19, %v1679_v39 }
 0x158   : > { %4728 = vmatmul.mubr.msk.f32.gmra.mxu0 %vm4110_vm2, %v1425_v22  ;;  %4789 = vmatprep.mubr.msk.f32.mxu1 %vm6336_vm1, %v1707_v29  ;;  %vm6394_vm14 = vcmp.ne.s32.totalorder %v995_v11, 7  ;;  %vm6398_vm15 = vcmp.ne.s32.totalorder %v1002_v54, 7  ;;  %v1422_v7 = vsel %vm1410_vm6, %v1397_v38, %v1398_v36  ;;  %vm6408_vm0 = vcmp.ne.s32.totalorder %v1009_v37, 0  ;;  %v2068_v22 = vld [vmem:[#allocation2 + $0xb0] sm:$0xff]  ;;  %v2067_v29 = vld [vmem:[#allocation2 + $0xa8] sm:$0xff] }
 0x159   : > { %4730 = vmatprep.mubr.msk.f32.mxu0 %vm4111_vm3, %v1424_v55  ;;  %v1400_v53 = vrot.slane %v6179_v23, 7  ;;  %v935_v57 = vadd.s32 104, %v6206_v46  ;;  %v1399_v58 = vrot.slane %v6164_v8, 7  ;;  %v1681_v59 = vrot.slane %v6164_v8, 1 }
 0x15a   : > { %v1023_v61 = vand.u32 7, %v933_v6  ;;  %v936_v0 = vadd.s32 112, %v6206_v46  ;;  %v1704_v1 = vsel %vm1692_vm7, %v1679_v39, %v1680_v47  ;;  %vm4115_vm1 = vcmp.ne.s32.totalorder %v1016_v48, 0 }
 0x15b   : > { %4790 = vmatmul.mubr.msk.f32.gmra.mxu1 %vm6360_vm4, %v1706_v45  ;;  %v1682_v2 = vrot.slane %v6179_v23, 1  ;;  %v1030_v3 = vand.u32 7, %v934_v14  ;;  %v1421_v4 = vsel %vm1410_vm6, %v1398_v36, %v1399_v58  ;;  %v1703_v5 = vsel %vm1692_vm7, %v1680_v47, %v1681_v59  ;;  %v2064_v36 = vld [vmem:[#allocation2 + $0x90] sm:$0xff]  ;;  %v2154_v47 = vld [vmem:[#allocation2 + $0x100] sm:$0xff] }
 0x15c   : > { %4731 = vmatmul.mubr.msk.f32.gmra.mxu0 %vm6372_vm11, %v1423_v56  ;;  %4792 = vmatprep.mubr.msk.f32.mxu1 %vm6364_vm5, %v1705_v26  ;;  %vm6428_vm2 = vcmp.ne.s32.totalorder %v1009_v37, 7  ;;  %vm6432_vm3 = vcmp.ne.s32.totalorder %v1016_v48, 7  ;;  %v1420_v23 = vsel %vm1410_vm6, %v1399_v58, %v1400_v53  ;;  %v1402_v9 = vrot.slane %v6197_v42, 7 }
 0x15d   : > { %4733 = vmatprep.mubr.msk.f32.mxu0 %vm6379_vm13, %v1422_v7  ;;  %v1037_v40 = vand.u32 7, %v935_v57  ;;  %v937_v10 = vadd.s32 120, %v6206_v46  ;;  %v1401_v11 = vrot.slane %v6182_v24, 7  ;;  %vm4116_vm4 = vcmp.ne.s32.totalorder %v1023_v61, 0 }
 0x15e   : > { %v1683_v12 = vrot.slane %v6182_v24, 1  ;;  %v1044_v15 = vand.u32 7, %v936_v0  ;;  %v1702_v16 = vsel %vm1692_vm7, %v1681_v59, %v1682_v2  ;;  %vm4117_vm5 = vcmp.ne.s32.totalorder %v1030_v3, 0  ;;  %v2162_v24 = vld [vmem:[#allocation2 + $0x140] sm:$0xff] }
 0x15f   : > { %4793 = vmatmul.mubr.msk.f32.gmra.mxu1 %vm6394_vm14, %v1704_v1  ;;  %v1684_v54 = vrot.slane %v6197_v42, 1  ;;  %v938_v18 = vadd.s32 128, %v6206_v46  ;;  %v1419_v19 = vsel %vm1410_vm6, %v1400_v53, %v1401_v11  ;;  %vm6456_vm11 = vcmp.ne.s32.totalorder %v1023_v61, 7 }
 0x160   : > { %4734 = vmatmul.mubr.msk.f32.gmra.mxu0 %vm6408_vm0, %v1421_v4  ;;  %4795 = vmatprep.mubr.msk.f32.mxu1 %vm6398_vm15, %v1703_v5  ;;  %v1701_v21 = vsel %vm1692_vm7, %v1682_v2, %v1683_v12  ;;  %vm6460_vm13 = vcmp.ne.s32.totalorder %v1030_v3, 7  ;;  %v1418_v42 = vsel %vm1410_vm6, %v1401_v11, %v1402_v9  ;;  %vm6468_vm14 = vcmp.ne.s32.totalorder %v1037_v40, 0  ;;  %v2073_v11 = vld [vmem:[#allocation2 + $0xd8] sm:$0xff] }
 0x161   : > { %4736 = vmatprep.mubr.msk.f32.mxu0 %vm4115_vm1, %v1420_v23  ;;  %v1404_v41 = vrot.slane %v6220_v62, 7  ;;  %v1051_v30 = vand.u32 7, %v937_v10  ;;  %v1403_v55 = vrot.slane %v6200_v43, 7  ;;  %v1685_v32 = vrot.slane %v6200_v43, 1  ;;  %v2169_v23 = vld [vmem:[#allocation2 + $0x178] sm:$0xff]  ;;  %v2075_v10 = vld [vmem:[#allocation2 + $0xe8] sm:$0xff] }
 0x162   : > { %vm6475_vm15 = vcmp.ne.s32.totalorder %v1044_v15, 0  ;;  %v939_v37 = vadd.s32 136, %v6206_v46  ;;  %v1700_v38 = vsel %vm1692_vm7, %v1683_v12, %v1684_v54  ;;  %v1686_v39 = vrot.slane %v6220_v62, 1  ;;  %4848 = vmatprep.subr.mxu1 %v2169_v23  ;;  %v2165_v12 = vld [vmem:[#allocation2 + $0x158] sm:$0xff] }
 0x163   : > { %4796 = vmatmul.mubr.msk.f32.gmra.mxu1 %vm6428_vm2, %v1702_v16  ;;  %v1058_v44 = vand.u32 7, %v938_v18  ;;  %v940_v6 = vadd.s32 144, %v6206_v46  ;;  %v1417_v43 = vsel %vm1410_vm6, %v1402_v9, %v1403_v55  ;;  %v1699_v45 = vsel %vm1692_vm7, %v1684_v54, %v1685_v32  ;;  %v2077_v9 = vld [vmem:[#allocation2 + $0xf8] sm:$0xff]  ;;  %v2164_v16 = vld [vmem:[#allocation2 + $0x150] sm:$0xff]  ;;  %v2071_v54 = vld [vmem:[#allocation2 + $0xc8] sm:$0xff] }
 0x164   : > { %4737 = vmatmul.mubr.msk.f32.gmra.mxu0 %vm4116_vm4, %v1419_v19  ;;  %4798 = vmatprep.mubr.msk.f32.mxu1 %vm6432_vm3, %v1701_v21  ;;  %vm6490_vm0 = vcmp.ne.s32.totalorder %v1037_v40, 7  ;;  %v1416_v62 = vsel %vm1410_vm6, %v1403_v55, %v1404_v41  ;;  %vm4120_vm1 = vcmp.ne.s32.totalorder %v1051_v30, 0  ;;  %vm4137_vm2 = vcmp.ne.s32.totalorder %v1044_v15, 7  ;;  %v2167_v40 = vld [vmem:[#allocation2 + $0x168] sm:$0xff]  ;;  %v2072_v15 = vld [vmem:[#allocation2 + $0xd0] sm:$0xff]  ;;  %v2070_v19 = vld [vmem:[#allocation2 + $0xc0] sm:$0xff] }
 0x165   : > { %4739 = vmatprep.mubr.msk.f32.mxu0 %vm4117_vm5, %v1418_v42  ;;  %v1406_v48 = vrot.slane %v6241_v17, 7  ;;  %v1405_v14 = vrot.slane %v6223_v63, 7  ;;  %v1687_v56 = vrot.slane %v6223_v63, 1  ;;  %v1065_v26 = vand.u32 7, %v939_v37  ;;  %4849 = vmatpush3.msra.mxu1 %v2169_v23  ;;  %v2163_v18 = vld [vmem:[#allocation2 + $0x148] sm:$0xff]  ;;  %v2069_v21 = vld [vmem:[#allocation2 + $0xb8] sm:$0xff] }
 0x166   : > { %v941_v50 = vadd.s32 152, %v6206_v46  ;;  %v1698_v51 = vsel %vm1692_vm7, %v1685_v32, %v1686_v39  ;;  %vm4121_vm3 = vcmp.ne.s32.totalorder %v1058_v44, 0  ;;  %v1688_v7 = vrot.slane %v6241_v17, 1  ;;  %4813 = vmatprep.subr.mxu0 %v2077_v9  ;;  %v2161_v42 = vld [vmem:[#allocation2 + $0x138] sm:$0xff]  ;;  %v2159_v55 = vld [vmem:[#allocation2 + $0x128] sm:$0xff]  ;;  %v2158_v37 = vld [vmem:[#allocation2 + $0x120] sm:$0xff] }
 0x167   : > { %4799 = vmatmul.mubr.msk.f32.gmra.mxu1 %vm6456_vm11, %v1700_v38  ;;  %v1072_v52 = vand.u32 7, %v940_v6  ;;  %v1415_v53 = vsel %vm1410_vm6, %v1404_v41, %v1405_v14  ;;  %v1697_v57 = vsel %vm1692_vm7, %v1686_v39, %v1687_v56  ;;  %v1414_v63 = vsel %vm1410_vm6, %v1405_v14, %v1406_v48  ;;  %4814 = vmatpush3.msra.mxu0 %v2077_v9  ;;  %v2160_v41 = vld [vmem:[#allocation2 + $0x130] sm:$0xff]  ;;  %v2065_v32 = vld [vmem:[#allocation2 + $0x98] sm:$0xff]  ;;  %v2063_v38 = vld [vmem:[#allocation2 + $0x88] sm:$0xff] }
 0x168   : > { %4740 = vmatmul.mubr.msk.f32.gmra.mxu0 %vm6468_vm14, %v1417_v43  ;;  %4801 = vmatprep.mubr.msk.f32.mxu1 %vm6460_vm13, %v1699_v45  ;;  %vm4138_vm4 = vcmp.ne.s32.totalorder %v1051_v30, 7  ;;  %vm4139_vm5 = vcmp.ne.s32.totalorder %v1058_v44, 7  ;;  %v1408_v58 = vrot.slane %v6267_v33, 7  ;;  %v1407_v17 = vrot.slane %v6246_v20, 7  ;;  %v2066_v30 = vld [vmem:[#allocation2 + $0xa0] sm:$0xff]  ;;  %v2157_v39 = vld [vmem:[#allocation2 + $0x118] sm:$0xff] }
 0x169   : > { %4742 = vmatprep.mubr.msk.f32.mxu0 %vm6475_vm15, %v1416_v62  ;;  %vm4122_vm11 = vcmp.ne.s32.totalorder %v1065_v26, 0  ;;  %v1689_v59 = vrot.slane %v6246_v20, 1  ;;  %v1079_v61 = vand.u32 7, %v941_v50  ;;  %v1696_v0 = vsel %vm1692_vm7, %v1687_v56, %v1688_v7  ;;  %v2062_v44 = vld [vmem:[#allocation2 + $0x80] sm:$0xff]  ;;  %v2156_v6 = vld [vmem:[#allocation2 + $0x110] sm:$0xff]  ;;  %v6542_v43 = vld [vmem:[#allocation2 + $0x1f8] sm:$0xff] }
 0x16a   : > { %vm4123_vm13 = vcmp.ne.s32.totalorder %v1072_v52, 0  ;;  %v1690_v1 = vrot.slane %v6267_v33, 1  ;;  %v1413_v2 = vsel %vm1410_vm6, %v1406_v48, %v1407_v17  ;;  %v1412_v4 = vsel %vm1410_vm6, %v1407_v17, %v1408_v58  ;;  %v2155_v45 = vld [vmem:[#allocation2 + $0x108] sm:$0xff]  ;;  %v6545_v62 = vld [vmem:[#allocation2 + $0x278] sm:$0xff]  ;;  %v6551_v14 = vld [vmem:[%s6912_s4] ss:$0 sm:$0xff] }
 0x16b   : > { %4802 = vmatmul.mubr.msk.f32.gmra.mxu1 %vm6490_vm0, %v1698_v51  ;;  %v1695_v3 = vsel %vm1692_vm7, %v1688_v7, %v1689_v59  ;;  %vm4140_vm14 = vcmp.ne.s32.totalorder %v1065_v26, 7  ;;  %vm4124_vm15 = vcmp.ne.s32.totalorder %v1079_v61, 0  ;;  %v1691_v20 = vrot.slane %v6252_v25, 1  ;;  %v2168_v25 = vld [vmem:[#allocation2 + $0x170] sm:$0xff]  ;;  %v3357_v46 = vld [vmem:[#allocation7 + $0xe8] sm:$0xff] }
 0x16c   : > { %4743 = vmatmul.mubr.msk.f32.gmra.mxu0 %vm4120_vm1, %v1415_v53  ;;  %4804 = vmatprep.mubr.msk.f32.mxu1 %vm4137_vm2, %v1697_v57  ;;  %vm4141_vm0 = vcmp.ne.s32.totalorder %v1072_v52, 7  ;;  %v1694_v33 = vsel %vm1692_vm7, %v1689_v59, %v1690_v1  ;;  %v1411_v5 = vsel %vm1410_vm6, %v1408_v58, %v1409_v34  ;;  %vm4142_vm1 = vcmp.ne.s32.totalorder %v1079_v61, 7  ;;  %v2076_v34 = vld [vmem:[#allocation2 + $0xf0] sm:$0xff] }
 0x16d   : > { %4745 = vmatprep.mubr.msk.f32.mxu0 %vm4121_vm3, %v1414_v63  ;;  %v1693_v8 = vsel %vm1692_vm7, %v1690_v1, %v1691_v20  ;;  %v1712_v27 = vsel %vm1692_vm7, %v1691_v20, %v1672_v60  ;;  %4850 = vmatprep.subr.mxu1 %v2168_v25  ;;  %v2166_v60 = vld [vmem:[#allocation2 + $0x160] sm:$0xff] }
 0x16e   : > { %4815 = vmatprep.subr.mxu0 %v2076_v34  ;;  %4851 = vmatpush3.msra.mxu1 %v2168_v25 }
 0x16f   : > { %4805 = vmatmul.mubr.msk.f32.gmra.mxu1 %vm4138_vm4, %v1696_v0  ;;  %4816 = vmatpush3.msra.mxu0 %v2076_v34 }
 0x170   : > { %4746 = vmatmul.mubr.msk.f32.gmra.mxu0 %vm4122_vm11, %v1413_v2  ;;  %4807 = vmatprep.mubr.msk.f32.mxu1 %vm4139_vm5, %v1695_v3 }
 0x171   : > { %4748 = vmatprep.mubr.msk.f32.mxu0 %vm4123_vm13, %v1412_v4  ;;  %4852 = vmatprep.subr.mxu1 %v2167_v40 }
 0x172   : > { %4817 = vmatprep.subr.mxu0 %v2075_v10  ;;  %4853 = vmatpush3.msra.mxu1 %v2167_v40 }
 0x173   : > { %4808 = vmatmul.mubr.msk.f32.gmra.mxu1 %vm4140_vm14, %v1694_v33  ;;  %4818 = vmatpush3.msra.mxu0 %v2075_v10 }
 0x174   : > { %4749 = vmatmul.mubr.msk.f32.gmra.mxu0 %vm4124_vm15, %v1411_v5  ;;  %4810 = vmatprep.mubr.msk.f32.mxu1 %vm4141_vm0, %v1693_v8 }
 0x175   : > { %4819 = vmatprep.subr.mxu0 %v2074_v13  ;;  %4854 = vmatprep.subr.mxu1 %v2166_v60 }
 0x176   : > { %4820 = vmatpush3.msra.mxu0 %v2074_v13  ;;  %4855 = vmatpush3.msra.mxu1 %v2166_v60 }
 0x177   : > { %4811 = vmatmul.mubr.msk.f32.gmra.mxu1 %vm4142_vm1, %v1712_v27  ;;  %4821 = vmatprep.subr.mxu0 %v2073_v11 }
 0x178   : > { %4856 = vmatprep.subr.mxu1 %v2165_v12  ;;  %4822 = vmatpush3.msra.mxu0 %v2073_v11 }
 0x179   : > { %4857 = vmatpush3.msra.mxu1 %v2165_v12  ;;  %4823 = vmatprep.subr.mxu0 %v2072_v15 }
 0x17a   : > { %4824 = vmatpush3.msra.mxu0 %v2072_v15  ;;  %4858 = vmatprep.subr.mxu1 %v2164_v16 }
 0x17b   : > { %4825 = vmatprep.subr.mxu0 %v2071_v54  ;;  %4859 = vmatpush3.msra.mxu1 %v2164_v16 }
 0x17c   : > { %4826 = vmatpush3.msra.mxu0 %v2071_v54  ;;  %4860 = vmatprep.subr.mxu1 %v2163_v18 }
 0x17d   : > { %4827 = vmatprep.subr.mxu0 %v2070_v19  ;;  %4861 = vmatpush3.msra.mxu1 %v2163_v18 }
 0x17e   : > { %4828 = vmatpush3.msra.mxu0 %v2070_v19  ;;  %4862 = vmatprep.subr.mxu1 %v2162_v24 }
 0x17f   : > { %4829 = vmatprep.subr.mxu0 %v2069_v21  ;;  %4863 = vmatpush3.msra.mxu1 %v2162_v24 }
 0x180   : > { %4830 = vmatpush3.msra.mxu0 %v2069_v21  ;;  %4864 = vmatprep.subr.mxu1 %v2161_v42 }
 0x181   : > { %4831 = vmatprep.subr.mxu0 %v2068_v22  ;;  %4865 = vmatpush3.msra.mxu1 %v2161_v42 }
 0x182   : > { %4832 = vmatpush3.msra.mxu0 %v2068_v22  ;;  %4866 = vmatprep.subr.mxu1 %v2160_v41 }
 0x183   : > { %4833 = vmatprep.subr.mxu0 %v2067_v29  ;;  %4867 = vmatpush3.msra.mxu1 %v2160_v41 }
 0x184   : > { %4834 = vmatpush3.msra.mxu0 %v2067_v29  ;;  %4868 = vmatprep.subr.mxu1 %v2159_v55  ;;  %v6598_v29 = vld [vmem:[%s6921_s13 + $0x1] ss:$0 sm:$0xff] }
 0x185   : > { %4835 = vmatprep.subr.mxu0 %v2066_v30  ;;  %4869 = vmatpush3.msra.mxu1 %v2159_v55 }
 0x186   : > { %4836 = vmatpush3.msra.mxu0 %v2066_v30  ;;  %4870 = vmatprep.subr.mxu1 %v2158_v37 }
 0x187   : > { %4837 = vmatprep.subr.mxu0 %v2065_v32  ;;  %4871 = vmatpush3.msra.mxu1 %v2158_v37  ;;  %v6605_v37 = vld [vmem:[%s6922_s14 + $0x1] ss:$0 sm:$0xff] }
 0x188   : > { %4838 = vmatpush3.msra.mxu0 %v2065_v32  ;;  %4872 = vmatprep.subr.mxu1 %v2157_v39 }
 0x189   : > { %4839 = vmatprep.subr.mxu0 %v2064_v36  ;;  %4873 = vmatpush3.msra.mxu1 %v2157_v39 }
 0x18a   : > { %4840 = vmatpush3.msra.mxu0 %v2064_v36  ;;  %4874 = vmatprep.subr.mxu1 %v2156_v6 }
 0x18b   : > { %4841 = vmatprep.subr.mxu0 %v2063_v38  ;;  %4875 = vmatpush3.msra.mxu1 %v2156_v6 }
 0x18c   : > { %4842 = vmatpush3.msra.mxu0 %v2063_v38  ;;  %4876 = vmatprep.subr.mxu1 %v2155_v45 }
 0x18d   : > { %4843 = vmatprep.subr.mxu0 %v2062_v44  ;;  %4877 = vmatpush3.msra.mxu1 %v2155_v45 }
 0x18e   : > { %4844 = vmatpush3.msra.mxu0 %v2062_v44  ;;  %4878 = vmatprep.subr.mxu1 %v2154_v47 }
 0x18f   : > { %4883 = vmatprep.subr.mxu0 %v6542_v43  ;;  %4879 = vmatpush3.msra.mxu1 %v2154_v47 }
 0x190   : > { %4918 = vmatprep.subr.mxu1 %v6545_v62 }
 0x1eb   : > { %v4661_v48 = vpop.f32.mrf.mxu1 }
 0x1ec   : > { %v1277_v25 = vadd.f32 %v4661_v48, %v6551_v14 }
 0x1ed   : > { %v1271_v56 = vpop.f32.mrf.mxu1 }
 0x1ee   : > { %v1272_v26 = vadd.f32 %v6551_v14, %v1271_v56 }
 0x1ef   : > { %v4664_v50 = vpop.f32.mrf.mxu1 }
 0x1f0   : > { %v1287_v38 = vadd.f32 %v4664_v50, %v6551_v14 }
 0x1f1   : > { %v1281_v51 = vpop.f32.mrf.mxu1 }
 0x1f2   : > { %v1282_v19 = vadd.f32 %v6551_v14, %v1281_v51 }
 0x1f3   : > { %v6554_v7 = vpop.f32.mrf.mxu1 }
 0x1f5   : > { %v6556_v52 = vpop.f32.mrf.mxu1 }
 0x1f7   : > { %v4670_v53 = vpop.f32.mrf.mxu1 }
 0x1f8   : > { %v1307_v57 = vadd.f32 %v4670_v53, %v6551_v14 }
 0x1f9   : > { %v6559_v63 = vpop.f32.mrf.mxu1 }
 0x1fb   : > { %v4673_v58 = vpop.f32.mrf.mxu1 }
 0x1fc   : > { %v6562_v17 = vadd.f32 %v4673_v58, %v6551_v14 }
 0x1fd   : > { %v1311_v59 = vpop.f32.mrf.mxu1 }
 0x1fe   : > { %v6565_v61 = vadd.f32 %v6551_v14, %v1311_v59 }
 0x1ff   : > { %v6567_v0 = vpop.f32.mrf.mxu1 }
 0x201   : > { %v1321_v1 = vpop.f32.mrf.mxu1 }
 0x202   : > { %v6570_v2 = vadd.f32 %v6551_v14, %v1321_v1 }
 0x203   : > { %v6572_v3 = vpop.f32.mrf.mxu1 }
 0x205   : > { %v6574_v4 = vpop.f32.mrf.mxu1 }
 0x207   : > { %v4682_v20 = vpop.f32.mrf.mxu1 }
 0x208   : > { %v6577_v33 = vadd.f32 %v4682_v20, %v6551_v14 }
 0x209   : > { %v6579_v5 = vpop.f32.mrf.mxu1 }
 0x20b   : > { %v4685_v8 = vpop.f32.mrf.mxu1 }
 0x20c   : > { %v6582_v27 = vadd.f32 %v4685_v8, %v6551_v14 }
 0x20d   : > { %v1351_v23 = vpop.f32.mrf.mxu1 }
 0x20e   : > { %v6585_v9 = vadd.f32 %v6551_v14, %v1351_v23 }
 0x20f   : > { %v4688_v34 = vpop.f32.mrf.mxu1 }
 0x210   : > { %v6589_v40 = vadd.f32 %v4688_v34, %v6551_v14  ;;  %v4723_v10 = vpop.f32.mrf.mxu0 }
 0x211   : > { %v1633_v13 = vadd.f32 %v4723_v10, %v1277_v25  ;;  %v1361_v60 = vpop.f32.mrf.mxu1 }
 0x212   : > { %v6592_v11 = vadd.f32 %v6551_v14, %v1361_v60  ;;  %v1533_v12 = vpop.f32.mrf.mxu0  ;;  %v1292_v60 = vadd.f32 %v6551_v14, %v6556_v52 }
 0x213   : > { %v1632_v15 = vadd.f32 %v1533_v12, %v1272_v26  ;;  %v4785_v16 = vpop.f32.mrf.mxu1 }
 0x214   : > { %v1916_v54 = vadd.f32 %v4785_v16, %v1633_v13  ;;  %v4726_v18 = vpop.f32.mrf.mxu0 }
 0x215   : > { %v1816_v21 = vpop.f32.mrf.mxu1  ;;  %v1635_v48 = vadd.f32 %v4726_v18, %v1287_v38  ;;  %v1327_v18 = vadd.f32 %v6567_v0, %v6551_v14 }
 0x216   : > { %vm1936_vm2 = vcmp.ge.f32.partialorder %v1916_v54, 0.0  ;;  %v1956_v24 = vmul.f32 0.01, %v1916_v54  ;;  %v1915_v22 = vadd.f32 %v1816_v21, %v1632_v15  ;;  %v1543_v42 = vpop.f32.mrf.mxu0 }
 0x217   : > { %v1634_v41 = vadd.f32 %v1543_v42, %v1282_v19  ;;  %v4788_v30 = vpop.f32.mrf.mxu1 }
 0x218   : > { %v1976_v55 = vsel %vm1936_vm2, %v1916_v54, %v1956_v24  ;;  %vm1935_vm3 = vcmp.ge.f32.partialorder %v1915_v22, 0.0  ;;  %v1955_v32 = vmul.f32 0.01, %v1915_v22  ;;  %v6600_v36 = vpop.f32.mrf.mxu0  ;;  %v1918_v23 = vadd.f32 %v4788_v30, %v1635_v48 }
 0x219   : > { %v1826_v39 = vpop.f32.mrf.mxu1  ;;  %v2001_v44 = vmul.f32 %v6598_v29, %v1976_v55 }
 0x21a   : > { %v1975_v6 = vsel %vm1935_vm3, %v1915_v22, %v1955_v32  ;;  %v1917_v45 = vadd.f32 %v1826_v39, %v1634_v41  ;;  %v1553_v47 = vpop.f32.mrf.mxu0  ;;  %v1958_v19 = vmul.f32 0.01, %v1918_v23  ;;  %vm1938_vm11 = vcmp.ge.f32.partialorder %v1918_v23, 0.0 }
 0x21b   : > { %v6609_v56 = vpop.f32.mrf.mxu1  ;;  %v2026_v26 = vadd.f32 %v6605_v37, %v2001_v44  ;;  %v2000_v51 = vmul.f32 %v6598_v29, %v1975_v6  ;;  %v1636_v21 = vadd.f32 %v1553_v47, %v1292_v60 }
 0x21c   : > { %vm1937_vm4 = vcmp.ge.f32.partialorder %v1917_v45, 0.0  ;;  %v1957_v53 = vmul.f32 0.01, %v1917_v45  ;;  %v4732_v58 = vpop.f32.mrf.mxu0  ;;  %v1978_v44 = vsel %vm1938_vm11, %v1918_v23, %v1958_v19 }
 0x21d   : > { %v1639_v59 = vadd.f32 %v4732_v58, %v1307_v57  ;;  %v1836_v1 = vpop.f32.mrf.mxu1  ;;  %4845 = vmatprep.mubr.f32.mxu0 %v2026_v26  ;;  %v6614_v50 = vadd.f32 %v6605_v37, %v2000_v51 }
 0x21e   : > { %v1977_v20 = vsel %vm1937_vm4, %v1917_v45, %v1957_v53  ;;  %v6616_v8 = vpop.f32.mrf.mxu0  ;;  %v1919_v0 = vadd.f32 %v1836_v1, %v1636_v21  ;;  %v1332_v53 = vadd.f32 %v6551_v14, %v6574_v4 }
 0x21f   : > { %v4794_v25 = vpop.f32.mrf.mxu1  ;;  %v2002_v34 = vmul.f32 %v6598_v29, %v1977_v20 }
 0x220   : > { %v1922_v10 = vadd.f32 %v4794_v25, %v1639_v59  ;;  %v4735_v13 = vpop.f32.mrf.mxu0  ;;  %vm1939_vm1 = vcmp.ge.f32.partialorder %v1919_v0, 0.0 }
 0x221   : > { %v1641_v12 = vadd.f32 %v4735_v13, %v6562_v17  ;;  %v6622_v57 = vpop.f32.mrf.mxu1  ;;  %v2027_v15 = vadd.f32 %v6605_v37, %v2002_v34 }
 0x222   : > { %vm1942_vm5 = vcmp.ge.f32.partialorder %v1922_v10, 0.0  ;;  %v1962_v16 = vmul.f32 0.01, %v1922_v10  ;;  %v1573_v54 = vpop.f32.mrf.mxu0 }
 0x223   : > { %v1640_v24 = vadd.f32 %v1573_v54, %v6565_v61  ;;  %v4797_v22 = vpop.f32.mrf.mxu1  ;;  %4880 = vmatprep.mubr.f32.mxu1 %v2027_v15 }
 0x224   : > { %v1982_v52 = vsel %vm1942_vm5, %v1922_v10, %v1962_v16  ;;  %v1924_v42 = vadd.f32 %v4797_v22, %v1641_v12  ;;  %v4738_v17 = vpop.f32.mrf.mxu0  ;;  %v2003_v10 = vmul.f32 %v6598_v29, %v1978_v44  ;;  %v1959_v12 = vmul.f32 0.01, %v1919_v0 }
 0x225   : > { %v1643_v41 = vadd.f32 %v4738_v17, %v1327_v18  ;;  %v1856_v30 = vpop.f32.mrf.mxu1  ;;  %v2007_v55 = vmul.f32 %v6598_v29, %v1982_v52 }
 0x226   : > { %vm1944_vm13 = vcmp.ge.f32.partialorder %v1924_v42, 0.0  ;;  %v1964_v32 = vmul.f32 0.01, %v1924_v42  ;;  %v1923_v38 = vadd.f32 %v1856_v30, %v1640_v24  ;;  %v1583_v39 = vpop.f32.mrf.mxu0  ;;  %v2028_v30 = vadd.f32 %v6605_v37, %v2003_v10 }
 0x227   : > { %v1642_v6 = vadd.f32 %v1583_v39, %v6570_v2  ;;  %v4800_v45 = vpop.f32.mrf.mxu1  ;;  %v6631_v61 = vadd.f32 %v6605_v37, %v2007_v55  ;;  %v1979_v55 = vsel %vm1939_vm1, %v1919_v0, %v1959_v12  ;;  %v2260_v39 = vld [vmem:[#allocation2 + $0x1f0] sm:$0xff]  ;;  %v2259_v0 = vld [vmem:[#allocation2 + $0x1e8] sm:$0xff] }
 0x228   : > { %v1984_v47 = vsel %vm1944_vm13, %v1924_v42, %v1964_v32  ;;  %vm1943_vm14 = vcmp.ge.f32.partialorder %v1923_v38, 0.0  ;;  %v1963_v48 = vmul.f32 0.01, %v1923_v38  ;;  %v1926_v26 = vadd.f32 %v4800_v45, %v1643_v41  ;;  %v6633_v51 = vpop.f32.mrf.mxu0 }
 0x229   : > { %v1866_v58 = vpop.f32.mrf.mxu1  ;;  %v2009_v59 = vmul.f32 %v6598_v29, %v1984_v47 }
 0x22a   : > { %v1983_v20 = vsel %vm1943_vm14, %v1923_v38, %v1963_v48  ;;  %vm1946_vm15 = vcmp.ge.f32.partialorder %v1926_v26, 0.0  ;;  %v1966_v1 = vmul.f32 0.01, %v1926_v26  ;;  %v1925_v2 = vadd.f32 %v1866_v58, %v1642_v6  ;;  %v1593_v23 = vpop.f32.mrf.mxu0 }
 0x22b   : > { %v1644_v25 = vadd.f32 %v1593_v23, %v1332_v53  ;;  %v6638_v34 = vpop.f32.mrf.mxu1  ;;  %v2008_v13 = vmul.f32 %v6598_v29, %v1983_v20  ;;  %v6643_v60 = vadd.f32 %v6605_v37, %v2009_v59  ;;  %v2004_v59 = vmul.f32 %v6598_v29, %v1979_v55  ;;  %v2258_v23 = vld [vmem:[#allocation2 + $0x1e0] sm:$0xff]  ;;  %v2351_v55 = vld [vmem:[#allocation2 + $0x268] sm:$0xff] }
 0x22c   : > { %v1986_v4 = vsel %vm1946_vm15, %v1926_v26, %v1966_v1  ;;  %vm1945_vm0 = vcmp.ge.f32.partialorder %v1925_v2, 0.0  ;;  %v1965_v15 = vmul.f32 0.01, %v1925_v2  ;;  %v4744_v16 = vpop.f32.mrf.mxu0 }
 0x22d   : > { %v2011_v54 = vmul.f32 %v6598_v29, %v1986_v4  ;;  %v1647_v18 = vadd.f32 %v4744_v16, %v6577_v33  ;;  %v1876_v19 = vpop.f32.mrf.mxu1  ;;  %v6648_v21 = vadd.f32 %v6605_v37, %v2008_v13  ;;  %v2352_v16 = vld [vmem:[#allocation2 + $0x270] sm:$0xff] }
 0x22e   : > { %v1985_v24 = vsel %vm1945_vm0, %v1925_v2, %v1965_v15  ;;  %v1927_v22 = vadd.f32 %v1876_v19, %v1644_v25  ;;  %v6650_v52 = vpop.f32.mrf.mxu0  ;;  %v2257_v15 = vld [vmem:[#allocation2 + $0x1d8] sm:$0xff]  ;;  %v2029_v19 = vadd.f32 %v6605_v37, %v2004_v59 }
 0x22f   : > { %v2036_v42 = vadd.f32 %v6605_v37, %v2011_v54  ;;  %v2010_v17 = vmul.f32 %v6598_v29, %v1985_v24  ;;  %v4806_v41 = vpop.f32.mrf.mxu1 }
 0x230   : > { %vm1947_vm2 = vcmp.ge.f32.partialorder %v1927_v22, 0.0  ;;  %v1967_v32 = vmul.f32 0.01, %v1927_v22  ;;  %v1930_v38 = vadd.f32 %v4806_v41, %v1647_v18  ;;  %v4747_v33 = vpop.f32.mrf.mxu0  ;;  %v1337_v41 = vadd.f32 %v6572_v3, %v6551_v14 }
 0x231   : > { %v1649_v44 = vadd.f32 %v4747_v33, %v6582_v27  ;;  %v6656_v6 = vpop.f32.mrf.mxu1  ;;  %4846 = vmatmul.mubr.f32.vlgmr.msra.gmra.mxu0 %v2036_v42  ;;  %v6659_v45 = vadd.f32 %v6605_v37, %v2010_v17  ;;  %v2256_v17 = vld [vmem:[#allocation2 + $0x1d0] sm:$0xff] }
 0x232   : > { %v1987_v47 = vsel %vm1947_vm2, %v1927_v22, %v1967_v32  ;;  %vm1950_vm3 = vcmp.ge.f32.partialorder %v1930_v38, 0.0  ;;  %v1970_v48 = vmul.f32 0.01, %v1930_v38  ;;  %4884 = vmatpush3.msra.mxu0 %v6542_v43  ;;  %v1613_v26 = vpop.f32.mrf.mxu0  ;;  %4915 = vmatprep.mubr.f32.mxu0 %v2028_v30 }
 0x233   : > { %v2012_v53 = vmul.f32 %v6598_v29, %v1987_v47  ;;  %v1648_v58 = vadd.f32 %v1613_v26, %v6585_v9  ;;  %4885 = vmatprep.subr.mxu0 %v2260_v39  ;;  %v4809_v27 = vpop.f32.mrf.mxu1  ;;  %v1645_v47 = vadd.f32 %v6633_v51, %v1337_v41  ;;  %v2253_v51 = vld [vmem:[#allocation2 + $0x1b8] sm:$0xff] }
 0x234   : > { %v1990_v20 = vsel %vm1950_vm3, %v1930_v38, %v1970_v48  ;;  %v1932_v1 = vadd.f32 %v4809_v27, %v1649_v44  ;;  %4886 = vmatpush3.msra.mxu0 %v2260_v39  ;;  %v4750_v2 = vpop.f32.mrf.mxu0  ;;  %v2255_v39 = vld [vmem:[#allocation2 + $0x1c8] sm:$0xff]  ;;  %v2349_v27 = vld [vmem:[#allocation2 + $0x258] sm:$0xff] }
 0x235   : > { %v2037_v25 = vadd.f32 %v6605_v37, %v2012_v53  ;;  %v2015_v43 = vmul.f32 %v6598_v29, %v1990_v20  ;;  %v1651_v10 = vadd.f32 %v4750_v2, %v6589_v40  ;;  %4887 = vmatprep.subr.mxu0 %v2259_v0  ;;  %v1896_v13 = vpop.f32.mrf.mxu1  ;;  %v1297_v53 = vadd.f32 %v6554_v7, %v6551_v14 }
 0x236   : > { %vm1952_vm4 = vcmp.ge.f32.partialorder %v1932_v1, 0.0  ;;  %v1972_v12 = vmul.f32 0.01, %v1932_v1  ;;  %v1931_v9 = vadd.f32 %v1896_v13, %v1648_v58  ;;  %4888 = vmatpush3.msra.mxu0 %v2259_v0  ;;  %v1623_v4 = vpop.f32.mrf.mxu0  ;;  %v2254_v0 = vld [vmem:[#allocation2 + $0x1c0] sm:$0xff]  ;;  %v2347_v13 = vld [vmem:[#allocation2 + $0x248] sm:$0xff] }
 0x237   : > { %v1650_v54 = vadd.f32 %v1623_v4, %v6592_v11  ;;  %4889 = vmatprep.subr.mxu0 %v2258_v23  ;;  %v4812_v18 = vpop.f32.mrf.mxu1  ;;  %4881 = vmatmul.mubr.f32.vlgmr.msra.gmra.mxu1 %v2037_v25  ;;  %v6671_v24 = vadd.f32 %v6605_v37, %v2015_v43  ;;  %v1928_v25 = vadd.f32 %v6638_v34, %v1645_v47  ;;  %v2252_v43 = vld [vmem:[#allocation2 + $0x1b0] sm:$0xff]  ;;  %v2346_v34 = vld [vmem:[#allocation2 + $0x240] sm:$0xff] }
 0x238   : > { %v1992_v40 = vsel %vm1952_vm4, %v1932_v1, %v1972_v12  ;;  %vm1951_vm5 = vcmp.ge.f32.partialorder %v1931_v9, 0.0  ;;  %v1971_v22 = vmul.f32 0.01, %v1931_v9  ;;  %v1934_v42 = vadd.f32 %v4812_v18, %v1651_v10  ;;  %4890 = vmatpush3.msra.mxu0 %v2258_v23  ;;  %4919 = vmatpush3.msra.mxu1 %v6545_v62  ;;  %v2350_v62 = vld [vmem:[#allocation2 + $0x260] sm:$0xff]  ;;  %v2348_v23 = vld [vmem:[#allocation2 + $0x250] sm:$0xff]  ;;  %v2251_v12 = vld [vmem:[#allocation2 + $0x1a8] sm:$0xff] }
 0x239   : > { %v2017_v11 = vmul.f32 %v6598_v29, %v1992_v40  ;;  %4891 = vmatprep.subr.mxu0 %v2257_v15  ;;  %4920 = vmatprep.subr.mxu1 %v2352_v16  ;;  %v1906_v30 = vpop.f32.mrf.mxu1  ;;  %v1637_v1 = vadd.f32 %v6600_v36, %v1297_v53  ;;  %v1342_v10 = vadd.f32 %v6551_v14, %v6579_v5  ;;  %v1968_v5 = vmul.f32 0.01, %v1928_v25  ;;  %v2344_v40 = vld [vmem:[#allocation2 + $0x230] sm:$0xff]  ;;  %v2338_v53 = vld [vmem:[#allocation2 + $0x200] sm:$0xff] }
 0x23a   : > { %v1991_v32 = vsel %vm1951_vm5, %v1931_v9, %v1971_v22  ;;  %vm1954_vm11 = vcmp.ge.f32.partialorder %v1934_v42, 0.0  ;;  %v1974_v38 = vmul.f32 0.01, %v1934_v42  ;;  %4950 = vmatprep.mubr.f32.mxu1 %v2029_v19  ;;  %v1933_v33 = vadd.f32 %v1906_v30, %v1650_v54  ;;  %4892 = vmatpush3.msra.mxu0 %v2257_v15  ;;  %v2345_v54 = vld [vmem:[#allocation2 + $0x238] sm:$0xff]  ;;  %v2343_v22 = vld [vmem:[#allocation2 + $0x228] sm:$0xff]  ;;  %v2246_v30 = vld [vmem:[#allocation2 + $0x180] sm:$0xff] }
 0x23b   : > { %v2016_v44 = vmul.f32 %v6598_v29, %v1991_v32  ;;  %4921 = vmatpush3.msra.mxu1 %v2352_v16  ;;  %4893 = vmatprep.subr.mxu0 %v2256_v17  ;;  %v6679_v3 = vadd.f32 %v6605_v37, %v2017_v11  ;;  %v1920_v9 = vadd.f32 %v6609_v56, %v1637_v1  ;;  %v2250_v16 = vld [vmem:[#allocation2 + $0x1a0] sm:$0xff]  ;;  %vm1948_vm14 = vcmp.ge.f32.partialorder %v1928_v25, 0.0  ;;  %v2249_v56 = vld [vmem:[#allocation2 + $0x198] sm:$0xff] }
 0x23c   : > { %v1994_v48 = vsel %vm1954_vm11, %v1934_v42, %v1974_v38  ;;  %vm1953_vm13 = vcmp.ge.f32.partialorder %v1933_v33, 0.0  ;;  %v1973_v26 = vmul.f32 0.01, %v1933_v33  ;;  %4922 = vmatprep.subr.mxu1 %v2351_v55  ;;  %4894 = vmatpush3.msra.mxu0 %v2256_v17  ;;  %v1646_v4 = vadd.f32 %v6650_v52, %v1342_v10  ;;  %v2342_v11 = vld [vmem:[#allocation2 + $0x220] sm:$0xff]  ;;  %v2537_v1 = vld [vmem:[#allocation2 + $0x378] sm:$0xff]  ;;  %v2439_v10 = vld [vmem:[#allocation2 + $0x2c8] sm:$0xff] }
 0x23d   : > { %v2019_v58 = vmul.f32 %v6598_v29, %v1994_v48  ;;  %4923 = vmatpush3.msra.mxu1 %v2351_v55  ;;  %4895 = vmatprep.subr.mxu0 %v2255_v39  ;;  %v6686_v59 = vadd.f32 %v6605_v37, %v2016_v44  ;;  %v1302_v15 = vadd.f32 %v6551_v14, %v6559_v63  ;;  %v1960_v52 = vmul.f32 0.01, %v1920_v9  ;;  %v2248_v63 = vld [vmem:[#allocation2 + $0x190] sm:$0xff]  ;;  %v2341_v55 = vld [vmem:[#allocation2 + $0x218] sm:$0xff] }
 0x23e   : > { %v1993_v20 = vsel %vm1953_vm13, %v1933_v33, %v1973_v26  ;;  %4924 = vmatprep.subr.mxu1 %v2350_v62  ;;  %4896 = vmatpush3.msra.mxu0 %v2255_v39  ;;  %v1929_v19 = vadd.f32 %v6656_v6, %v1646_v4  ;;  %vm1940_vm15 = vcmp.ge.f32.partialorder %v1920_v9, 0.0  ;;  %v1988_v14 = vsel %vm1948_vm14, %v1928_v25, %v1968_v5  ;;  %v2340_v39 = vld [vmem:[#allocation2 + $0x210] sm:$0xff]  ;;  %v2445_v44 = vld [vmem:[#allocation2 + $0x2f8] sm:$0xff]  ;;  %v2435_v5 = vld [vmem:[#allocation2 + $0x2a8] sm:$0xff] }
 0x23f   : > { %v2018_v2 = vmul.f32 %v6598_v29, %v1993_v20  ;;  %4925 = vmatpush3.msra.mxu1 %v2350_v62  ;;  %4897 = vmatprep.subr.mxu0 %v2254_v0  ;;  %v6691_v7 = vadd.f32 %v6605_v37, %v2019_v58  ;;  %v1638_v18 = vadd.f32 %v6616_v8, %v1302_v15  ;;  %v2247_v8 = vld [vmem:[#allocation2 + $0x188] sm:$0xff]  ;;  %v2536_v25 = vld [vmem:[#allocation2 + $0x370] sm:$0xff] }
 0x240   : > { %4926 = vmatprep.subr.mxu1 %v2349_v27  ;;  %4898 = vmatpush3.msra.mxu0 %v2254_v0  ;;  %v1980_v17 = vsel %vm1940_vm15, %v1920_v9, %v1960_v52  ;;  %v2013_v41 = vmul.f32 %v6598_v29, %v1988_v14  ;;  %v1969_v6 = vmul.f32 0.01, %v1929_v19  ;;  %vm1949_vm0 = vcmp.ge.f32.partialorder %v1929_v19, 0.0  ;;  %v2339_v62 = vld [vmem:[#allocation2 + $0x208] sm:$0xff]  ;;  %v2444_v0 = vld [vmem:[#allocation2 + $0x2f0] sm:$0xff]  ;;  %v2533_v9 = vld [vmem:[#allocation2 + $0x358] sm:$0xff] }
 0x241   : > { %4927 = vmatpush3.msra.mxu1 %v2349_v27  ;;  %4899 = vmatprep.subr.mxu0 %v2253_v51  ;;  %v6697_v36 = vadd.f32 %v6605_v37, %v2018_v2  ;;  %v1921_v42 = vadd.f32 %v6622_v57, %v1638_v18  ;;  %v2005_v57 = vmul.f32 %v6598_v29, %v1980_v17  ;;  %v2443_v58 = vld [vmem:[#allocation2 + $0x2e8] sm:$0xff]  ;;  %v2441_v2 = vld [vmem:[#allocation2 + $0x2d8] sm:$0xff]  ;;  %v2532_v4 = vld [vmem:[#allocation2 + $0x350] sm:$0xff] }
 0x242   : > { %4928 = vmatprep.subr.mxu1 %v2348_v23  ;;  %4900 = vmatpush3.msra.mxu0 %v2253_v51  ;;  %v1989_v38 = vsel %vm1949_vm0, %v1929_v19, %v1969_v6  ;;  %v2038_v33 = vadd.f32 %v6605_v37, %v2013_v41  ;;  %v2442_v51 = vld [vmem:[#allocation2 + $0x2e0] sm:$0xff]  ;;  %v2531_v15 = vld [vmem:[#allocation2 + $0x348] sm:$0xff]  ;;  %v2529_v18 = vld [vmem:[#allocation2 + $0x338] sm:$0xff] }
 0x243   : > { %4929 = vmatpush3.msra.mxu1 %v2348_v23  ;;  %4901 = vmatprep.subr.mxu0 %v2252_v43  ;;  %v1961_v32 = vmul.f32 0.01, %v1921_v42  ;;  %vm1941_vm1 = vcmp.ge.f32.partialorder %v1921_v42, 0.0  ;;  %v2014_v48 = vmul.f32 %v6598_v29, %v1989_v38  ;;  %v2030_v26 = vadd.f32 %v6605_v37, %v2005_v57  ;;  %v2528_v52 = vld [vmem:[#allocation2 + $0x330] sm:$0xff]  ;;  %v2431_v14 = vld [vmem:[#allocation2 + $0x288] sm:$0xff]  ;;  %v2629_v17 = vld [vmem:[#allocation2 + $0x3f8] sm:$0xff] }
 0x244   : > { %4930 = vmatprep.subr.mxu1 %v2347_v13  ;;  %4902 = vmatpush3.msra.mxu0 %v2252_v43  ;;  %v2440_v43 = vld [vmem:[#allocation2 + $0x2d0] sm:$0xff]  ;;  %v2523_v41 = vld [vmem:[#allocation2 + $0x308] sm:$0xff] }
 0x245   : > { %4931 = vmatpush3.msra.mxu1 %v2347_v13  ;;  %4903 = vmatprep.subr.mxu0 %v2251_v12  ;;  %v1981_v47 = vsel %vm1941_vm1, %v1921_v42, %v1961_v32  ;;  %v2039_v20 = vadd.f32 %v6605_v37, %v2014_v48  ;;  %v2534_v13 = vld [vmem:[#allocation2 + $0x360] sm:$0xff]  ;;  %v2432_v19 = vld [vmem:[#allocation2 + $0x290] sm:$0xff]  ;;  %v2525_v42 = vld [vmem:[#allocation2 + $0x318] sm:$0xff] }
 0x246   : > { %4932 = vmatprep.subr.mxu1 %v2346_v34  ;;  %4904 = vmatpush3.msra.mxu0 %v2251_v12  ;;  %v2006_v27 = vmul.f32 %v6598_v29, %v1981_v47  ;;  %v2535_v29 = vld [vmem:[#allocation2 + $0x368] sm:$0xff]  ;;  %v2438_v12 = vld [vmem:[#allocation2 + $0x2c0] sm:$0xff]  ;;  %v2628_v6 = vld [vmem:[#allocation2 + $0x3f0] sm:$0xff] }
 0x247   : > { %4933 = vmatpush3.msra.mxu1 %v2346_v34  ;;  %4905 = vmatprep.subr.mxu0 %v2250_v16  ;;  %v2436_v34 = vld [vmem:[#allocation2 + $0x2b0] sm:$0xff]  ;;  %v2721_v32 = vld [vmem:[#allocation2 + $0x478] sm:$0xff]  ;;  %v2719_v38 = vld [vmem:[#allocation2 + $0x468] sm:$0xff] }
 0x248   : > { %4934 = vmatprep.subr.mxu1 %v2345_v54  ;;  %4906 = vmatpush3.msra.mxu0 %v2250_v16  ;;  %v2031_v23 = vadd.f32 %v6605_v37, %v2006_v27  ;;  %v2437_v37 = vld [vmem:[#allocation2 + $0x2b8] sm:$0xff]  ;;  %v2530_v16 = vld [vmem:[#allocation2 + $0x340] sm:$0xff]  ;;  %v2720_v57 = vld [vmem:[#allocation2 + $0x470] sm:$0xff] }
 0x249   : > { %4935 = vmatpush3.msra.mxu1 %v2345_v54  ;;  %4907 = vmatprep.subr.mxu0 %v2249_v56  ;;  %v2434_v54 = vld [vmem:[#allocation2 + $0x2a0] sm:$0xff]  ;;  %v2620_v47 = vld [vmem:[#allocation2 + $0x3b0] sm:$0xff]  ;;  %v2715_v48 = vld [vmem:[#allocation2 + $0x448] sm:$0xff] }
 0x24a   : > { %4936 = vmatprep.subr.mxu1 %v2344_v40  ;;  %4908 = vmatpush3.msra.mxu0 %v2249_v56  ;;  %v2433_v56 = vld [vmem:[#allocation2 + $0x298] sm:$0xff] }
 0x24b   : > { %4937 = vmatpush3.msra.mxu1 %v2344_v40  ;;  %4909 = vmatprep.subr.mxu0 %v2248_v63  ;;  %v2527_v40 = vld [vmem:[#allocation2 + $0x328] sm:$0xff]  ;;  %v2617_v27 = vld [vmem:[#allocation2 + $0x398] sm:$0xff] }
 0x24c   : > { %4938 = vmatprep.subr.mxu1 %v2343_v22  ;;  %4910 = vmatpush3.msra.mxu0 %v2248_v63  ;;  %v2526_v63 = vld [vmem:[#allocation2 + $0x320] sm:$0xff] }
 0x24d   : > { %4939 = vmatpush3.msra.mxu1 %v2343_v22  ;;  %4911 = vmatprep.subr.mxu0 %v2247_v8  ;;  %v2430_v22 = vld [vmem:[#allocation2 + $0x280] sm:$0xff] }
 0x24e   : > { %4940 = vmatprep.subr.mxu1 %v2342_v11  ;;  %4912 = vmatpush3.msra.mxu0 %v2247_v8  ;;  %v2524_v8 = vld [vmem:[#allocation2 + $0x310] sm:$0xff] }
 0x24f   : > { %4941 = vmatpush3.msra.mxu1 %v2342_v11  ;;  %4913 = vmatprep.subr.mxu0 %v2246_v30  ;;  %v2522_v11 = vld [vmem:[#allocation2 + $0x300] sm:$0xff] }
 0x250   : > { %4942 = vmatprep.subr.mxu1 %v2341_v55  ;;  %4914 = vmatpush3.msra.mxu0 %v2246_v30  ;;  %v2627_v30 = vld [vmem:[#allocation2 + $0x3e8] sm:$0xff] }
 0x251   : > { %4943 = vmatpush3.msra.mxu1 %v2341_v55  ;;  %4916 = vmatmul.mubr.f32.vlgmr.msra.gmra.mxu0 %v2038_v33  ;;  %v2626_v55 = vld [vmem:[#allocation2 + $0x3e0] sm:$0xff]  ;;  %v2623_v33 = vld [vmem:[#allocation2 + $0x3c8] sm:$0xff] }
 0x252   : > { %4944 = vmatprep.subr.mxu1 %v2340_v39  ;;  %4953 = vmatprep.subr.mxu0 %v2445_v44 }
 0x253   : > { %4945 = vmatpush3.msra.mxu1 %v2340_v39  ;;  %4954 = vmatpush3.msra.mxu0 %v2445_v44  ;;  %v2718_v39 = vld [vmem:[#allocation2 + $0x460] sm:$0xff]  ;;  %v2717_v44 = vld [vmem:[#allocation2 + $0x458] sm:$0xff] }
 0x254   : > { %4985 = vmatprep.mubr.f32.mxu0 %v2030_v26  ;;  %4946 = vmatprep.subr.mxu1 %v2339_v62  ;;  %v2619_v26 = vld [vmem:[#allocation2 + $0x3a8] sm:$0xff] }
 0x255   : > { %4955 = vmatprep.subr.mxu0 %v2444_v0  ;;  %4947 = vmatpush3.msra.mxu1 %v2339_v62  ;;  %v2621_v62 = vld [vmem:[#allocation2 + $0x3b8] sm:$0xff] }
 0x256   : > { %4956 = vmatpush3.msra.mxu0 %v2444_v0  ;;  %4948 = vmatprep.subr.mxu1 %v2338_v53  ;;  %v2714_v0 = vld [vmem:[#allocation2 + $0x440] sm:$0xff] }
 0x257   : > { %4957 = vmatprep.subr.mxu0 %v2443_v58  ;;  %4949 = vmatpush3.msra.mxu1 %v2338_v53  ;;  %v2618_v53 = vld [vmem:[#allocation2 + $0x3a0] sm:$0xff] }
 0x258   : > { %4958 = vmatpush3.msra.mxu0 %v2443_v58  ;;  %4951 = vmatmul.mubr.f32.vlgmr.msra.gmra.mxu1 %v2039_v20  ;;  %v2713_v58 = vld [vmem:[#allocation2 + $0x438] sm:$0xff]  ;;  %v2712_v20 = vld [vmem:[#allocation2 + $0x430] sm:$0xff] }
 0x259   : > { %4959 = vmatprep.subr.mxu0 %v2442_v51  ;;  %4988 = vmatprep.subr.mxu1 %v2537_v1 }
 0x25a   : > { %4960 = vmatpush3.msra.mxu0 %v2442_v51  ;;  %4989 = vmatpush3.msra.mxu1 %v2537_v1  ;;  %v2616_v51 = vld [vmem:[#allocation2 + $0x390] sm:$0xff]  ;;  %v2711_v1 = vld [vmem:[#allocation2 + $0x428] sm:$0xff] }
 0x25b   : > { %5020 = vmatprep.mubr.f32.mxu1 %v2031_v23  ;;  %4961 = vmatprep.subr.mxu0 %v2441_v2  ;;  %v2710_v23 = vld [vmem:[#allocation2 + $0x420] sm:$0xff] }
 0x25c   : > { %4990 = vmatprep.subr.mxu1 %v2536_v25  ;;  %4962 = vmatpush3.msra.mxu0 %v2441_v2  ;;  %v2615_v2 = vld [vmem:[#allocation2 + $0x388] sm:$0xff] }
 0x25d   : > { %4991 = vmatpush3.msra.mxu1 %v2536_v25  ;;  %4963 = vmatprep.subr.mxu0 %v2440_v43  ;;  %v2614_v25 = vld [vmem:[#allocation2 + $0x380] sm:$0xff] }
 0x25e   : > { %4992 = vmatprep.subr.mxu1 %v2535_v29  ;;  %4964 = vmatpush3.msra.mxu0 %v2440_v43  ;;  %v2709_v43 = vld [vmem:[#allocation2 + $0x418] sm:$0xff] }
 0x25f   : > { %4993 = vmatpush3.msra.mxu1 %v2535_v29  ;;  %4965 = vmatprep.subr.mxu0 %v2439_v10  ;;  %v2708_v29 = vld [vmem:[#allocation2 + $0x410] sm:$0xff] }
 0x260   : > { %4994 = vmatprep.subr.mxu1 %v2534_v13  ;;  %4966 = vmatpush3.msra.mxu0 %v2439_v10  ;;  %v2813_v10 = vld [vmem:[#allocation2 + $0x4f8] sm:$0xff] }
 0x261   : > { %4995 = vmatpush3.msra.mxu1 %v2534_v13  ;;  %4967 = vmatprep.subr.mxu0 %v2438_v12  ;;  %v2707_v13 = vld [vmem:[#allocation2 + $0x408] sm:$0xff] }
 0x262   : > { %4996 = vmatprep.subr.mxu1 %v2533_v9  ;;  %4968 = vmatpush3.msra.mxu0 %v2438_v12  ;;  %v2812_v12 = vld [vmem:[#allocation2 + $0x4f0] sm:$0xff] }
 0x263   : > { %4997 = vmatpush3.msra.mxu1 %v2533_v9  ;;  %4969 = vmatprep.subr.mxu0 %v2437_v37  ;;  %v2706_v9 = vld [vmem:[#allocation2 + $0x400] sm:$0xff] }
 0x264   : > { %4998 = vmatprep.subr.mxu1 %v2532_v4  ;;  %4970 = vmatpush3.msra.mxu0 %v2437_v37  ;;  %v2811_v37 = vld [vmem:[#allocation2 + $0x4e8] sm:$0xff] }
 0x265   : > { %4999 = vmatpush3.msra.mxu1 %v2532_v4  ;;  %4971 = vmatprep.subr.mxu0 %v2436_v34  ;;  %v2810_v4 = vld [vmem:[#allocation2 + $0x4e0] sm:$0xff] }
 0x266   : > { %5000 = vmatprep.subr.mxu1 %v2531_v15  ;;  %4972 = vmatpush3.msra.mxu0 %v2436_v34  ;;  %v2060_v34 = vld [vmem:[#allocation2 + $0x78] sm:$0xff] }
 0x267   : > { %5001 = vmatpush3.msra.mxu1 %v2531_v15  ;;  %4973 = vmatprep.subr.mxu0 %v2435_v5  ;;  %v2059_v15 = vld [vmem:[#allocation2 + $0x70] sm:$0xff] }
 0x268   : > { %5002 = vmatprep.subr.mxu1 %v2530_v16  ;;  %4974 = vmatpush3.msra.mxu0 %v2435_v5  ;;  %v2058_v5 = vld [vmem:[#allocation2 + $0x68] sm:$0xff] }
 0x269   : > { %5003 = vmatpush3.msra.mxu1 %v2530_v16  ;;  %4975 = vmatprep.subr.mxu0 %v2434_v54  ;;  %v2807_v16 = vld [vmem:[#allocation2 + $0x4c8] sm:$0xff] }
 0x26a   : > { %5004 = vmatprep.subr.mxu1 %v2529_v18  ;;  %4976 = vmatpush3.msra.mxu0 %v2434_v54  ;;  %v2057_v54 = vld [vmem:[#allocation2 + $0x60] sm:$0xff] }
 0x26b   : > { %5005 = vmatpush3.msra.mxu1 %v2529_v18  ;;  %4977 = vmatprep.subr.mxu0 %v2433_v56  ;;  %v2056_v18 = vld [vmem:[#allocation2 + $0x58] sm:$0xff] }
 0x26c   : > { %5006 = vmatprep.subr.mxu1 %v2528_v52  ;;  %4978 = vmatpush3.msra.mxu0 %v2433_v56  ;;  %v2805_v56 = vld [vmem:[#allocation2 + $0x4b8] sm:$0xff] }
 0x26d   : > { %5007 = vmatpush3.msra.mxu1 %v2528_v52  ;;  %4979 = vmatprep.subr.mxu0 %v2432_v19  ;;  %v2804_v52 = vld [vmem:[#allocation2 + $0x4b0] sm:$0xff] }
 0x26e   : > { %5008 = vmatprep.subr.mxu1 %v2527_v40  ;;  %4980 = vmatpush3.msra.mxu0 %v2432_v19  ;;  %v2054_v19 = vld [vmem:[#allocation2 + $0x48] sm:$0xff] }
 0x26f   : > { %5009 = vmatpush3.msra.mxu1 %v2527_v40  ;;  %4981 = vmatprep.subr.mxu0 %v2431_v14  ;;  %v2803_v40 = vld [vmem:[#allocation2 + $0x4a8] sm:$0xff] }
 0x270   : > { %5010 = vmatprep.subr.mxu1 %v2526_v63  ;;  %4982 = vmatpush3.msra.mxu0 %v2431_v14  ;;  %v2053_v14 = vld [vmem:[#allocation2 + $0x40] sm:$0xff] }
 0x271   : > { %5011 = vmatpush3.msra.mxu1 %v2526_v63  ;;  %4983 = vmatprep.subr.mxu0 %v2430_v22  ;;  %v2802_v63 = vld [vmem:[#allocation2 + $0x4a0] sm:$0xff] }
 0x272   : > { %5012 = vmatprep.subr.mxu1 %v2525_v42  ;;  %4984 = vmatpush3.msra.mxu0 %v2430_v22  ;;  %v2052_v22 = vld [vmem:[#allocation2 + $0x38] sm:$0xff] }
 0x273   : > { %5013 = vmatpush3.msra.mxu1 %v2525_v42  ;;  %4986 = vmatmul.mubr.f32.vlgmr.msra.gmra.mxu0 %v6671_v24  ;;  %v2625_v24 = vld [vmem:[#allocation2 + $0x3d8] sm:$0xff] }
 0x274   : > { %5014 = vmatprep.subr.mxu1 %v2524_v8  ;;  %5023 = vmatprep.subr.mxu0 %v2629_v17  ;;  %v2801_v42 = vld [vmem:[#allocation2 + $0x498] sm:$0xff] }
 0x275   : > { %5015 = vmatpush3.msra.mxu1 %v2524_v8  ;;  %5024 = vmatpush3.msra.mxu0 %v2629_v17  ;;  %v2051_v8 = vld [vmem:[#allocation2 + $0x30] sm:$0xff] }
 0x276   : > { %5055 = vmatprep.mubr.f32.mxu0 %v6631_v61  ;;  %5016 = vmatprep.subr.mxu1 %v2523_v41  ;;  %v2624_v61 = vld [vmem:[#allocation2 + $0x3d0] sm:$0xff] }
 0x277   : > { %5025 = vmatprep.subr.mxu0 %v2628_v6  ;;  %5017 = vmatpush3.msra.mxu1 %v2523_v41  ;;  %v2800_v17 = vld [vmem:[#allocation2 + $0x490] sm:$0xff]  ;;  %v2050_v41 = vld [vmem:[#allocation2 + $0x28] sm:$0xff] }
 0x278   : > { %5026 = vmatpush3.msra.mxu0 %v2628_v6  ;;  %5018 = vmatprep.subr.mxu1 %v2522_v11  ;;  %v2799_v6 = vld [vmem:[#allocation2 + $0x488] sm:$0xff] }
 0x279   : > { %5027 = vmatprep.subr.mxu0 %v2627_v30  ;;  %5019 = vmatpush3.msra.mxu1 %v2522_v11  ;;  %v2049_v11 = vld [vmem:[#allocation2 + $0x20] sm:$0xff] }
 0x27a   : > { %5028 = vmatpush3.msra.mxu0 %v2627_v30  ;;  %5021 = vmatmul.mubr.f32.vlgmr.msra.gmra.mxu1 %v6686_v59  ;;  %v2622_v59 = vld [vmem:[#allocation2 + $0x3c0] sm:$0xff] }
 0x27b   : > { %5029 = vmatprep.subr.mxu0 %v2626_v55  ;;  %5058 = vmatprep.subr.mxu1 %v2721_v32  ;;  %v2798_v30 = vld [vmem:[#allocation2 + $0x480] sm:$0xff] }
 0x27c   : > { %5030 = vmatpush3.msra.mxu0 %v2626_v55  ;;  %5059 = vmatpush3.msra.mxu1 %v2721_v32  ;;  %v2048_v55 = vld [vmem:[#allocation2 + $0x18] sm:$0xff]  ;;  %v2047_v32 = vld [vmem:[#allocation2 + $0x10] sm:$0xff] }
 0x27d   : > { %5090 = vmatprep.mubr.f32.mxu1 %v6648_v21  ;;  %5031 = vmatprep.subr.mxu0 %v2625_v24  ;;  %v2716_v21 = vld [vmem:[#allocation2 + $0x450] sm:$0xff] }
 0x27e   : > { %5060 = vmatprep.subr.mxu1 %v2720_v57  ;;  %5032 = vmatpush3.msra.mxu0 %v2625_v24  ;;  %v2046_v24 = vld [vmem:[#allocation2 + $0x8] sm:$0xff] }
 0x27f   : > { %5061 = vmatpush3.msra.mxu1 %v2720_v57  ;;  %5033 = vmatprep.subr.mxu0 %v2624_v61  ;;  %v2045_v57 = vld [vmem:[#allocation2] sm:$0xff] }
 0x280   : > { %5062 = vmatprep.subr.mxu1 %v2719_v38  ;;  %5034 = vmatpush3.msra.mxu0 %v2624_v61  ;;  %v3026_v61 = vld [vmem:[#allocation5 + $0xf8] sm:$0xff] }
 0x281   : > { %5063 = vmatpush3.msra.mxu1 %v2719_v38  ;;  %5035 = vmatprep.subr.mxu0 %v2623_v33  ;;  %v3025_v38 = vld [vmem:[#allocation5 + $0xf0] sm:$0xff] }
 0x282   : > { %5064 = vmatprep.subr.mxu1 %v2718_v39  ;;  %5036 = vmatpush3.msra.mxu0 %v2623_v33  ;;  %v3024_v33 = vld [vmem:[#allocation5 + $0xe8] sm:$0xff] }
 0x283   : > { %5065 = vmatpush3.msra.mxu1 %v2718_v39  ;;  %5037 = vmatprep.subr.mxu0 %v2622_v59  ;;  %v3129_v39 = vld [vmem:[#allocation5 + $0x78] sm:$0xff] }
 0x284   : > { %5066 = vmatprep.subr.mxu1 %v2717_v44  ;;  %5038 = vmatpush3.msra.mxu0 %v2622_v59  ;;  %v3128_v59 = vld [vmem:[#allocation5 + $0x70] sm:$0xff] }
 0x285   : > { %5067 = vmatpush3.msra.mxu1 %v2717_v44  ;;  %5039 = vmatprep.subr.mxu0 %v2621_v62  ;;  %v3022_v44 = vld [vmem:[#allocation5 + $0xd8] sm:$0xff] }
 0x286   : > { %5068 = vmatprep.subr.mxu1 %v2716_v21  ;;  %5040 = vmatpush3.msra.mxu0 %v2621_v62  ;;  %v3021_v62 = vld [vmem:[#allocation5 + $0xd0] sm:$0xff] }
 0x287   : > { %5069 = vmatpush3.msra.mxu1 %v2716_v21  ;;  %5041 = vmatprep.subr.mxu0 %v2620_v47  ;;  %v3126_v21 = vld [vmem:[#allocation5 + $0x60] sm:$0xff] }
 0x288   : > { %5070 = vmatprep.subr.mxu1 %v2715_v48  ;;  %5042 = vmatpush3.msra.mxu0 %v2620_v47  ;;  %v3020_v47 = vld [vmem:[#allocation5 + $0xc8] sm:$0xff] }
 0x289   : > { %5071 = vmatpush3.msra.mxu1 %v2715_v48  ;;  %5043 = vmatprep.subr.mxu0 %v2619_v26  ;;  %v3125_v48 = vld [vmem:[#allocation5 + $0x58] sm:$0xff] }
 0x28a   : > { %5072 = vmatprep.subr.mxu1 %v2714_v0  ;;  %5044 = vmatpush3.msra.mxu0 %v2619_v26  ;;  %v3019_v26 = vld [vmem:[#allocation5 + $0xc0] sm:$0xff] }
 0x28b   : > { %5073 = vmatpush3.msra.mxu1 %v2714_v0  ;;  %5045 = vmatprep.subr.mxu0 %v2618_v53  ;;  %v3124_v0 = vld [vmem:[#allocation5 + $0x50] sm:$0xff] }
 0x28c   : > { %5074 = vmatprep.subr.mxu1 %v2713_v58  ;;  %5046 = vmatpush3.msra.mxu0 %v2618_v53  ;;  %v3018_v53 = vld [vmem:[#allocation5 + $0xb8] sm:$0xff] }
 0x28d   : > { %5075 = vmatpush3.msra.mxu1 %v2713_v58  ;;  %5047 = vmatprep.subr.mxu0 %v2617_v27  ;;  %v3123_v58 = vld [vmem:[#allocation5 + $0x48] sm:$0xff] }
 0x28e   : > { %5076 = vmatprep.subr.mxu1 %v2712_v20  ;;  %5048 = vmatpush3.msra.mxu0 %v2617_v27  ;;  %v3017_v27 = vld [vmem:[#allocation5 + $0xb0] sm:$0xff] }
 0x28f   : > { %5077 = vmatpush3.msra.mxu1 %v2712_v20  ;;  %5049 = vmatprep.subr.mxu0 %v2616_v51  ;;  %v3122_v20 = vld [vmem:[#allocation5 + $0x40] sm:$0xff] }
 0x290   : > { %5078 = vmatprep.subr.mxu1 %v2711_v1  ;;  %5050 = vmatpush3.msra.mxu0 %v2616_v51  ;;  %v3016_v51 = vld [vmem:[#allocation5 + $0xa8] sm:$0xff] }
 0x291   : > { %5079 = vmatpush3.msra.mxu1 %v2711_v1  ;;  %5051 = vmatprep.subr.mxu0 %v2615_v2  ;;  %v3121_v1 = vld [vmem:[#allocation5 + $0x38] sm:$0xff] }
 0x292   : > { %5080 = vmatprep.subr.mxu1 %v2710_v23  ;;  %5052 = vmatpush3.msra.mxu0 %v2615_v2  ;;  %v3015_v2 = vld [vmem:[#allocation5 + $0xa0] sm:$0xff] }
 0x293   : > { %5081 = vmatpush3.msra.mxu1 %v2710_v23  ;;  %5053 = vmatprep.subr.mxu0 %v2614_v25  ;;  %v3120_v23 = vld [vmem:[#allocation5 + $0x30] sm:$0xff] }
 0x294   : > { %5082 = vmatprep.subr.mxu1 %v2709_v43  ;;  %5054 = vmatpush3.msra.mxu0 %v2614_v25  ;;  %v3014_v25 = vld [vmem:[#allocation5 + $0x98] sm:$0xff] }
 0x295   : > { %5083 = vmatpush3.msra.mxu1 %v2709_v43  ;;  %5056 = vmatmul.mubr.f32.vlgmr.msra.gmra.mxu0 %v6679_v3  ;;  %v2809_v3 = vld [vmem:[#allocation2 + $0x4d8] sm:$0xff]  ;;  %v3119_v43 = vld [vmem:[#allocation5 + $0x28] sm:$0xff] }
 0x296   : > { %5084 = vmatprep.subr.mxu1 %v2708_v29  ;;  %5093 = vmatprep.subr.mxu0 %v2813_v10 }
 0x297   : > { %5085 = vmatpush3.msra.mxu1 %v2708_v29  ;;  %5094 = vmatpush3.msra.mxu0 %v2813_v10  ;;  %v3013_v29 = vld [vmem:[#allocation5 + $0x90] sm:$0xff]  ;;  %v3118_v10 = vld [vmem:[#allocation5 + $0x20] sm:$0xff] }
 0x298   : > { %5125 = vmatprep.mubr.f32.mxu0 %v6643_v60  ;;  %5086 = vmatprep.subr.mxu1 %v2707_v13  ;;  %v2808_v60 = vld [vmem:[#allocation2 + $0x4d0] sm:$0xff] }
 0x299   : > { %5095 = vmatprep.subr.mxu0 %v2812_v12  ;;  %5087 = vmatpush3.msra.mxu1 %v2707_v13  ;;  %v3012_v13 = vld [vmem:[#allocation5 + $0x88] sm:$0xff] }
 0x29a   : > { %5096 = vmatpush3.msra.mxu0 %v2812_v12  ;;  %5088 = vmatprep.subr.mxu1 %v2706_v9  ;;  %v3117_v12 = vld [vmem:[#allocation5 + $0x18] sm:$0xff] }
 0x29b   : > { %5097 = vmatprep.subr.mxu0 %v2811_v37  ;;  %5089 = vmatpush3.msra.mxu1 %v2706_v9  ;;  %v3011_v9 = vld [vmem:[#allocation5 + $0x80] sm:$0xff] }
 0x29c   : > { %5098 = vmatpush3.msra.mxu0 %v2811_v37  ;;  %5091 = vmatmul.mubr.f32.vlgmr.msra.gmra.mxu1 %v6697_v36  ;;  %v2806_v36 = vld [vmem:[#allocation2 + $0x4c0] sm:$0xff]  ;;  %v3116_v37 = vld [vmem:[#allocation5 + $0x10] sm:$0xff] }
 0x29d   : > { %5099 = vmatprep.subr.mxu0 %v2810_v4  ;;  %5128 = vmatprep.subr.mxu1 %v2060_v34 }
 0x29e   : > { %5100 = vmatpush3.msra.mxu0 %v2810_v4  ;;  %5129 = vmatpush3.msra.mxu1 %v2060_v34  ;;  %v3115_v4 = vld [vmem:[#allocation5 + $0x8] sm:$0xff]  ;;  %v6724_v34 = vld [vmem:[#allocation5 + $0x178] sm:$0xff] }
 0x29f   : > { %5160 = vmatprep.mubr.f32.mxu1 %v6614_v50  ;;  %5101 = vmatprep.subr.mxu0 %v2809_v3  ;;  %v2055_v50 = vld [vmem:[#allocation2 + $0x50] sm:$0xff] }
 0x2a0   : > { %5130 = vmatprep.subr.mxu1 %v2059_v15  ;;  %5102 = vmatpush3.msra.mxu0 %v2809_v3  ;;  %v3114_v3 = vld [vmem:[#allocation5] sm:$0xff] }
 0x2a1   : > { %5131 = vmatpush3.msra.mxu1 %v2059_v15  ;;  %5103 = vmatprep.subr.mxu0 %v2808_v60 }
 0x2a2   : > { %5132 = vmatprep.subr.mxu1 %v2058_v5  ;;  %5104 = vmatpush3.msra.mxu0 %v2808_v60 }
 0x2a3   : > { %5133 = vmatpush3.msra.mxu1 %v2058_v5  ;;  %5105 = vmatprep.subr.mxu0 %v2807_v16 }
 0x2a4   : > { %5134 = vmatprep.subr.mxu1 %v2057_v54  ;;  %5106 = vmatpush3.msra.mxu0 %v2807_v16 }
 0x2a5   : > { %5135 = vmatpush3.msra.mxu1 %v2057_v54  ;;  %5107 = vmatprep.subr.mxu0 %v2806_v36 }
 0x2a6   : > { %5136 = vmatprep.subr.mxu1 %v2056_v18  ;;  %5108 = vmatpush3.msra.mxu0 %v2806_v36 }
 0x2a7   : > { %5137 = vmatpush3.msra.mxu1 %v2056_v18  ;;  %5109 = vmatprep.subr.mxu0 %v2805_v56 }
 0x2a8   : > { %5138 = vmatprep.subr.mxu1 %v2055_v50  ;;  %5110 = vmatpush3.msra.mxu0 %v2805_v56 }
 0x2a9   : > { %5139 = vmatpush3.msra.mxu1 %v2055_v50  ;;  %5111 = vmatprep.subr.mxu0 %v2804_v52 }
 0x2aa   : > { %5140 = vmatprep.subr.mxu1 %v2054_v19  ;;  %5112 = vmatpush3.msra.mxu0 %v2804_v52 }
 0x2ab   : > { %5141 = vmatpush3.msra.mxu1 %v2054_v19  ;;  %5113 = vmatprep.subr.mxu0 %v2803_v40 }
 0x2ac   : > { %5142 = vmatprep.subr.mxu1 %v2053_v14  ;;  %5114 = vmatpush3.msra.mxu0 %v2803_v40 }
 0x2ad   : > { %5143 = vmatpush3.msra.mxu1 %v2053_v14  ;;  %5115 = vmatprep.subr.mxu0 %v2802_v63 }
 0x2ae   : > { %5144 = vmatprep.subr.mxu1 %v2052_v22  ;;  %5116 = vmatpush3.msra.mxu0 %v2802_v63 }
 0x2af   : > { %5145 = vmatpush3.msra.mxu1 %v2052_v22  ;;  %5117 = vmatprep.subr.mxu0 %v2801_v42 }
 0x2b0   : > { %5146 = vmatprep.subr.mxu1 %v2051_v8  ;;  %5118 = vmatpush3.msra.mxu0 %v2801_v42 }
 0x2b1   : > { %5147 = vmatpush3.msra.mxu1 %v2051_v8  ;;  %5119 = vmatprep.subr.mxu0 %v2800_v17 }
 0x2b2   : > { %5148 = vmatprep.subr.mxu1 %v2050_v41  ;;  %5120 = vmatpush3.msra.mxu0 %v2800_v17 }
 0x2b3   : > { %5149 = vmatpush3.msra.mxu1 %v2050_v41  ;;  %5121 = vmatprep.subr.mxu0 %v2799_v6 }
 0x2b4   : > { %5150 = vmatprep.subr.mxu1 %v2049_v11  ;;  %5122 = vmatpush3.msra.mxu0 %v2799_v6 }
 0x2b5   : > { %5151 = vmatpush3.msra.mxu1 %v2049_v11  ;;  %5123 = vmatprep.subr.mxu0 %v2798_v30 }
 0x2b6   : > { %5152 = vmatprep.subr.mxu1 %v2048_v55  ;;  %5124 = vmatpush3.msra.mxu0 %v2798_v30 }
 0x2b7   : > { %5153 = vmatpush3.msra.mxu1 %v2048_v55  ;;  %5126 = vmatmul.mubr.f32.vlgmr.msra.gmra.mxu0 %v6691_v7  ;;  %v3023_v7 = vld [vmem:[#allocation5 + $0xe0] sm:$0xff] }
 0x2b8   : > { %5154 = vmatprep.subr.mxu1 %v2047_v32  ;;  %5163 = vmatprep.subr.mxu0 %v3026_v61 }
 0x2b9   : > { %5155 = vmatpush3.msra.mxu1 %v2047_v32  ;;  %5164 = vmatpush3.msra.mxu0 %v3026_v61 }
 0x2ba   : > { %5156 = vmatprep.subr.mxu1 %v2046_v24  ;;  %5165 = vmatprep.subr.mxu0 %v3025_v38 }
 0x2bb   : > { %5157 = vmatpush3.msra.mxu1 %v2046_v24  ;;  %5166 = vmatpush3.msra.mxu0 %v3025_v38 }
 0x2bc   : > { %5158 = vmatprep.subr.mxu1 %v2045_v57  ;;  %5167 = vmatprep.subr.mxu0 %v3024_v33 }
 0x2bd   : > { %5159 = vmatpush3.msra.mxu1 %v2045_v57  ;;  %5168 = vmatpush3.msra.mxu0 %v3024_v33 }
 0x2be   : > { %5161 = vmatmul.mubr.f32.vlgmr.msra.gmra.mxu1 %v6659_v45  ;;  %5198 = vmatprep.subr.mxu1 %v3129_v39  ;;  %v3127_v45 = vld [vmem:[#allocation5 + $0x68] sm:$0xff] }
 0x2bf   : > { %5199 = vmatpush3.msra.mxu1 %v3129_v39  ;;  %5169 = vmatprep.subr.mxu0 %v3023_v7 }
 0x2c0   : > { %5200 = vmatprep.subr.mxu1 %v3128_v59  ;;  %5170 = vmatpush3.msra.mxu0 %v3023_v7 }
 0x2c1   : > { %5201 = vmatpush3.msra.mxu1 %v3128_v59  ;;  %5171 = vmatprep.subr.mxu0 %v3022_v44 }
 0x2c2   : > { %5202 = vmatprep.subr.mxu1 %v3127_v45  ;;  %5172 = vmatpush3.msra.mxu0 %v3022_v44 }
 0x2c3   : > { %5203 = vmatpush3.msra.mxu1 %v3127_v45  ;;  %5173 = vmatprep.subr.mxu0 %v3021_v62 }
 0x2c4   : > { %5204 = vmatprep.subr.mxu1 %v3126_v21  ;;  %5174 = vmatpush3.msra.mxu0 %v3021_v62  ;;  %v4079_v62 = vld [vmem:[%s6914_s6] ss:$0 sm:$0xff] }
 0x2c5   : > { %5205 = vmatpush3.msra.mxu1 %v3126_v21  ;;  %5175 = vmatprep.subr.mxu0 %v3020_v47 }
 0x2c6   : > { %5206 = vmatprep.subr.mxu1 %v3125_v48  ;;  %5176 = vmatpush3.msra.mxu0 %v3020_v47 }
 0x2c7   : > { %5207 = vmatpush3.msra.mxu1 %v3125_v48  ;;  %5177 = vmatprep.subr.mxu0 %v3019_v26 }
 0x2c8   : > { %5208 = vmatprep.subr.mxu1 %v3124_v0  ;;  %5178 = vmatpush3.msra.mxu0 %v3019_v26 }
 0x2c9   : > { %5209 = vmatpush3.msra.mxu1 %v3124_v0  ;;  %5179 = vmatprep.subr.mxu0 %v3018_v53 }
 0x2ca   : > { %5210 = vmatprep.subr.mxu1 %v3123_v58  ;;  %5180 = vmatpush3.msra.mxu0 %v3018_v53 }
 0x2cb   : > { %5211 = vmatpush3.msra.mxu1 %v3123_v58  ;;  %5181 = vmatprep.subr.mxu0 %v3017_v27 }
 0x2cc   : > { %5212 = vmatprep.subr.mxu1 %v3122_v20  ;;  %5182 = vmatpush3.msra.mxu0 %v3017_v27  ;;  %v4080_v27 = vld [vmem:[%s6921_s13 + $0x2] ss:$0 sm:$0xff] }
 0x2cd   : > { %5213 = vmatpush3.msra.mxu1 %v3122_v20  ;;  %5183 = vmatprep.subr.mxu0 %v3016_v51 }
 0x2ce   : > { %5214 = vmatprep.subr.mxu1 %v3121_v1  ;;  %5184 = vmatpush3.msra.mxu0 %v3016_v51 }
 0x2cf   : > { %5215 = vmatpush3.msra.mxu1 %v3121_v1  ;;  %5185 = vmatprep.subr.mxu0 %v3015_v2  ;;  %v4081_v1 = vld [vmem:[%s6922_s14 + $0x2] ss:$0 sm:$0xff] }
 0x2d0   : > { %5216 = vmatprep.subr.mxu1 %v3120_v23  ;;  %5186 = vmatpush3.msra.mxu0 %v3015_v2 }
 0x2d1   : > { %5217 = vmatpush3.msra.mxu1 %v3120_v23  ;;  %5187 = vmatprep.subr.mxu0 %v3014_v25 }
 0x2d2   : > { %5218 = vmatprep.subr.mxu1 %v3119_v43  ;;  %5188 = vmatpush3.msra.mxu0 %v3014_v25 }
 0x2d3   : > { %5219 = vmatpush3.msra.mxu1 %v3119_v43  ;;  %5189 = vmatprep.subr.mxu0 %v3013_v29 }
 0x2d4   : > { %5220 = vmatprep.subr.mxu1 %v3118_v10  ;;  %5190 = vmatpush3.msra.mxu0 %v3013_v29 }
 0x2d5   : > { %5221 = vmatpush3.msra.mxu1 %v3118_v10  ;;  %5191 = vmatprep.subr.mxu0 %v3012_v13  ;;  %v3228_v10 = vld [vmem:[#allocation5 + $0x170] sm:$0xff] }
 0x2d6   : > { %5222 = vmatprep.subr.mxu1 %v3117_v12  ;;  %5192 = vmatpush3.msra.mxu0 %v3012_v13 }
 0x2d7   : > { %5223 = vmatpush3.msra.mxu1 %v3117_v12  ;;  %5193 = vmatprep.subr.mxu0 %v3011_v9 }
 0x2d8   : > { %5224 = vmatprep.subr.mxu1 %v3116_v37  ;;  %5194 = vmatpush3.msra.mxu0 %v3011_v9 }
 0x2d9   : > { %5225 = vmatpush3.msra.mxu1 %v3116_v37  ;;  %5233 = vmatprep.subr.mxu0 %v6724_v34 }
 0x2da   : > { %5226 = vmatprep.subr.mxu1 %v3115_v4 }
 0x2db   : > { %5227 = vmatpush3.msra.mxu1 %v3115_v4 }
 0x2dc   : > { %5228 = vmatprep.subr.mxu1 %v3114_v3 }
 0x2dd   : > { %5229 = vmatpush3.msra.mxu1 %v3114_v3 }
 0x2f1   : > { %v4847_v36 = vpop.f32.mrf.mxu0 }
 0x2f3   : > { %v2144_v56 = vpop.f32.mrf.mxu0 }
 0x2f7   : > { %v4882_v15 = vpop.f32.mrf.mxu1 }
 0x2f9   : > { %v2236_v60 = vpop.f32.mrf.mxu1 }
 0x311   : > { %v4917_v52 = vpop.f32.mrf.mxu0 }
 0x313   : > { %v2328_v40 = vpop.f32.mrf.mxu0 }
 0x318   : > { %v4952_v5 = vpop.f32.mrf.mxu1 }
 0x31a   : > { %v2420_v16 = vpop.f32.mrf.mxu1 }
 0x333   : > { %v4987_v22 = vpop.f32.mrf.mxu0 }
 0x335   : > { %v2512_v11 = vpop.f32.mrf.mxu0 }
 0x33a   : > { %v5022_v54 = vpop.f32.mrf.mxu1 }
 0x33c   : > { %v2604_v18 = vpop.f32.mrf.mxu1 }
 0x355   : > { %v5057_v32 = vpop.f32.mrf.mxu0 }
 0x357   : > { %v2696_v33 = vpop.f32.mrf.mxu0 }
 0x35c   : > { %v5092_v50 = vpop.f32.mrf.mxu1 }
 0x35e   : > { %v2788_v19 = vpop.f32.mrf.mxu1 }
 0x377   : > { %v5127_v59 = vpop.f32.mrf.mxu0 }
 0x379   : > { %v2880_v48 = vpop.f32.mrf.mxu0 }
 0x37e   : > { %v5162_v14 = vpop.f32.mrf.mxu1 }
 0x37f   : > { %v2961_v63 = vadd.f32 %v5162_v14, %v4847_v36  ;;  %v3222_v36 = vld [vmem:[#allocation5 + $0x140] sm:$0xff] }
 0x380   : > { %v2955_v42 = vpop.f32.mrf.mxu1  ;;  %v3214_v14 = vld [vmem:[#allocation5 + $0x100] sm:$0xff] }
 0x381   : > { %v2965_v8 = vadd.f32 %v4882_v15, %v2961_v63  ;;  %v2956_v17 = vadd.f32 %v2955_v42, %v2144_v56  ;;  %v3220_v56 = vld [vmem:[#allocation5 + $0x130] sm:$0xff]  ;;  %v3342_v42 = vld [vmem:[#allocation7 + $0x78] sm:$0xff] }
 0x383   : > { %v2967_v41 = vadd.f32 %v4917_v52, %v2965_v8  ;;  %v2964_v6 = vadd.f32 %v2956_v17, %v2236_v60  ;;  %v3227_v60 = vld [vmem:[#allocation5 + $0x168] sm:$0xff]  ;;  %v3217_v52 = vld [vmem:[#allocation5 + $0x118] sm:$0xff]  ;;  %v5712_v8 = vmov 0.0   ;;  %v3358_v17 = vld [vmem:[#allocation7 + $0xf0] sm:$0xff] }
 0x384   : > { %5268 = vmatprep.subr.mxu1 %v5712_v8 }
 0x385   : > { %v2969_v30 = vadd.f32 %v4952_v5, %v2967_v41  ;;  %v2966_v55 = vadd.f32 %v2964_v6, %v2328_v40  ;;  %v3226_v5 = vld [vmem:[#allocation5 + $0x160] sm:$0xff]  ;;  %v3215_v40 = vld [vmem:[#allocation5 + $0x108] sm:$0xff]  ;;  %v3341_v41 = vld [vmem:[#allocation7 + $0x70] sm:$0xff] }
 0x386   : > { %v3340_v6 = vld [vmem:[#allocation7 + $0x68] sm:$0xff] }
 0x387   : > { %v2971_v24 = vadd.f32 %v4987_v22, %v2969_v30  ;;  %v2968_v57 = vadd.f32 %v2966_v55, %v2420_v16  ;;  %v3224_v16 = vld [vmem:[#allocation5 + $0x150] sm:$0xff]  ;;  %v3359_v22 = vld [vmem:[#allocation7 + $0xf8] sm:$0xff] }
 0x388   : > { %v3355_v30 = vld [vmem:[#allocation7 + $0xd8] sm:$0xff] }
 0x389   : > { %v2973_v61 = vadd.f32 %v5022_v54, %v2971_v24  ;;  %v2970_v38 = vadd.f32 %v2968_v57, %v2512_v11  ;;  %v3223_v54 = vld [vmem:[#allocation5 + $0x148] sm:$0xff]  ;;  %v3339_v11 = vld [vmem:[#allocation7 + $0x60] sm:$0xff]  ;;  %v3338_v55 = vld [vmem:[#allocation7 + $0x58] sm:$0xff] }
 0x38a   : > { %v3337_v24 = vld [vmem:[#allocation7 + $0x50] sm:$0xff]  ;;  %v3353_v57 = vld [vmem:[#allocation7 + $0xc8] sm:$0xff] }
 0x38b   : > { %v2975_v39 = vadd.f32 %v5057_v32, %v2973_v61  ;;  %v2972_v7 = vadd.f32 %v2970_v38, %v2604_v18  ;;  %v3221_v18 = vld [vmem:[#allocation5 + $0x138] sm:$0xff]  ;;  %v3354_v32 = vld [vmem:[#allocation7 + $0xd0] sm:$0xff]  ;;  %v3336_v61 = vld [vmem:[#allocation7 + $0x48] sm:$0xff] }
 0x38c   : > { %v3352_v38 = vld [vmem:[#allocation7 + $0xc0] sm:$0xff] }
 0x38d   : > { %v2977_v44 = vadd.f32 %v5092_v50, %v2975_v39  ;;  %v2974_v45 = vadd.f32 %v2972_v7, %v2696_v33  ;;  %v3218_v50 = vld [vmem:[#allocation5 + $0x120] sm:$0xff]  ;;  %v3351_v39 = vld [vmem:[#allocation7 + $0xb8] sm:$0xff] }
 0x38e   : > { %v3335_v33 = vld [vmem:[#allocation7 + $0x40] sm:$0xff]  ;;  %v3334_v7 = vld [vmem:[#allocation7 + $0x38] sm:$0xff] }
 0x38f   : > { %v2976_v21 = vadd.f32 %v2974_v45, %v2788_v19  ;;  %v2979_v47 = vadd.f32 %v5127_v59, %v2977_v44  ;;  %v3216_v19 = vld [vmem:[#allocation5 + $0x110] sm:$0xff]  ;;  %v3349_v45 = vld [vmem:[#allocation7 + $0xa8] sm:$0xff] }
 0x390   : > { %v3350_v59 = vld [vmem:[#allocation7 + $0xb0] sm:$0xff] }
 0x391   : > { %v2978_v26 = vadd.f32 %v2976_v21, %v2880_v48  ;;  %v2988_v0 = vadd.f32 %v4079_v62, %v2979_v47  ;;  %v3333_v44 = vld [vmem:[#allocation7 + $0x30] sm:$0xff]  ;;  %v3332_v21 = vld [vmem:[#allocation7 + $0x28] sm:$0xff]  ;;  %v3347_v47 = vld [vmem:[#allocation7 + $0x98] sm:$0xff] }
 0x392   : > { %v3331_v48 = vld [vmem:[#allocation7 + $0x20] sm:$0xff] }
 0x393   : > { %v2987_v53 = vadd.f32 %v4079_v62, %v2978_v26  ;;  %vm2990_vm2 = vcmp.ge.f32.partialorder %v2988_v0, 0.0  ;;  %v2992_v58 = vmul.f32 0.01, %v2988_v0  ;;  %v3348_v62 = vld [vmem:[#allocation7 + $0xa0] sm:$0xff]  ;;  %v3346_v26 = vld [vmem:[#allocation7 + $0x90] sm:$0xff] }
 0x395   : > { %vm2989_vm3 = vcmp.ge.f32.partialorder %v2987_v53, 0.0  ;;  %v2991_v20 = vmul.f32 0.01, %v2987_v53  ;;  %v2994_v51 = vsel %vm2990_vm2, %v2988_v0, %v2992_v58  ;;  %v3330_v0 = vld [vmem:[#allocation7 + $0x18] sm:$0xff]  ;;  %v3329_v58 = vld [vmem:[#allocation7 + $0x10] sm:$0xff] }
 0x396   : > { %v3001_v2 = vmul.f32 %v4080_v27, %v2994_v51  ;;  %v3327_v51 = vld [vmem:[#allocation7] sm:$0xff] }
 0x397   : > { %v2993_v23 = vsel %vm2989_vm3, %v2987_v53, %v2991_v20  ;;  %v3345_v53 = vld [vmem:[#allocation7 + $0x88] sm:$0xff] }
 0x398   : > { %v3000_v25 = vmul.f32 %v4080_v27, %v2993_v23  ;;  %v3008_v43 = vadd.f32 %v4081_v1, %v3001_v2  ;;  %v3344_v27 = vld [vmem:[#allocation7 + $0x80] sm:$0xff]  ;;  %v3328_v20 = vld [vmem:[#allocation7 + $0x8] sm:$0xff] }
 0x399   : > { %v4082_v2 = vld [vmem:[%s6916_s8] ss:$0 sm:$0xff] }
 0x39a   : > { %v3007_v29 = vadd.f32 %v4081_v1, %v3000_v25  ;;  %v3109_v12 = vrot.slane %v3008_v43, 7  ;;  %v3208_v37 = vrot.slane %v3008_v43, 1 }
 0x39c   : > { %5195 = vmatprep.mubr.f32.mxu0 %v3007_v29  ;;  %v3108_v13 = vrot.slane %v3007_v29, 7  ;;  %v3207_v9 = vrot.slane %v3007_v29, 1 }
 0x39d   : > { %5196 = vmatmul.mubr.f32.vlgmr.msra.gmra.mxu0 %v3008_v43 }
 0x39e   : > { %5234 = vmatpush3.msra.mxu0 %v6724_v34  ;;  %v3111_v4 = vsel %vm1410_vm6, %v3109_v12, %v3108_v13  ;;  %v3209_v3 = vsel %vm1692_vm7, %v3207_v9, %v3208_v37  ;;  %v3110_v15 = vsel %vm1410_vm6, %v3108_v13, %v3109_v12  ;;  %v3225_v34 = vld [vmem:[#allocation5 + $0x158] sm:$0xff]  ;;  %v3210_v63 = vsel %vm1692_vm7, %v3208_v37, %v3207_v9 }
 0x39f   : > { %5235 = vmatprep.subr.mxu0 %v3228_v10  ;;  %5230 = vmatprep.mubr.msk.f32.mxu1 %vm6254_vm8, %v3111_v4  ;;  %vm5713_vm6 = vmmov 0  }
 0x3a0   : > { %5236 = vmatpush3.msra.mxu0 %v3228_v10  ;;  %5265 = vmatprep.mubr.msk.f32.mxu0 %vm6270_vm10, %v3209_v3 }
 0x3a1   : > { %5231 = vmatmul.mubr.msk.f32.vlgmr.msra.gmra.mxu1 %vm6261_vm9, %v3110_v15  ;;  %5237 = vmatprep.subr.mxu0 %v3227_v60  ;;  %v4091_v15 = vld [vmem:[%s6921_s13 + $0x3] ss:$0 sm:$0xff] }
 0x3a2   : > { %5238 = vmatpush3.msra.mxu0 %v3227_v60  ;;  %5269 = vmatpush3.msra.mxu1 %v3359_v22  ;;  %v3632_v22 = vld [vmem:[#allocation8 + $0x68] sm:$0xff] }
 0x3a3   : > { %5239 = vmatprep.subr.mxu0 %v3226_v5  ;;  %5270 = vmatprep.subr.mxu1 %v5712_v8 }
 0x3a4   : > { %5240 = vmatpush3.msra.mxu0 %v3226_v5  ;;  %5271 = vmatpush3.msra.mxu1 %v3358_v17  ;;  %v3631_v17 = vld [vmem:[#allocation8 + $0x60] sm:$0xff] }
 0x3a5   : > { %5241 = vmatprep.subr.mxu0 %v3225_v34  ;;  %5272 = vmatprep.subr.mxu1 %v5712_v8 }
 0x3a6   : > { %5242 = vmatpush3.msra.mxu0 %v3225_v34  ;;  %5273 = vmatpush3.msra.mxu1 %v3357_v46  ;;  %v3630_v46 = vld [vmem:[#allocation8 + $0x58] sm:$0xff] }
 0x3a7   : > { %5243 = vmatprep.subr.mxu0 %v3224_v16  ;;  %5274 = vmatprep.subr.mxu1 %v5712_v8 }
 0x3a8   : > { %5244 = vmatpush3.msra.mxu0 %v3224_v16  ;;  %5275 = vmatpush3.msra.mxu1 %v3356_v49  ;;  %v4092_v16 = vld [vmem:[%s6922_s14 + $0x3] ss:$0 sm:$0xff]  ;;  %v3629_v49 = vld [vmem:[#allocation8 + $0x50] sm:$0xff] }
 0x3a9   : > { %5245 = vmatprep.subr.mxu0 %v3223_v54  ;;  %5276 = vmatprep.subr.mxu1 %v5712_v8 }
 0x3aa   : > { %5246 = vmatpush3.msra.mxu0 %v3223_v54  ;;  %5277 = vmatpush3.msra.mxu1 %v3355_v30  ;;  %v3628_v30 = vld [vmem:[#allocation8 + $0x48] sm:$0xff] }
 0x3ab   : > { %5247 = vmatprep.subr.mxu0 %v3222_v36  ;;  %5278 = vmatprep.subr.mxu1 %v5712_v8 }
 0x3ac   : > { %5248 = vmatpush3.msra.mxu0 %v3222_v36  ;;  %5279 = vmatpush3.msra.mxu1 %v3354_v32  ;;  %v3627_v32 = vld [vmem:[#allocation8 + $0x40] sm:$0xff] }
 0x3ad   : > { %5249 = vmatprep.subr.mxu0 %v3221_v18  ;;  %5280 = vmatprep.subr.mxu1 %v5712_v8 }
 0x3ae   : > { %5250 = vmatpush3.msra.mxu0 %v3221_v18  ;;  %5281 = vmatpush3.msra.mxu1 %v3353_v57  ;;  %v3626_v57 = vld [vmem:[#allocation8 + $0x38] sm:$0xff] }
 0x3af   : > { %5251 = vmatprep.subr.mxu0 %v3220_v56  ;;  %5282 = vmatprep.subr.mxu1 %v5712_v8 }
 0x3b0   : > { %5252 = vmatpush3.msra.mxu0 %v3220_v56  ;;  %5283 = vmatpush3.msra.mxu1 %v3352_v38  ;;  %v3625_v38 = vld [vmem:[#allocation8 + $0x30] sm:$0xff] }
 0x3b1   : > { %5253 = vmatprep.subr.mxu0 %v3219_v31  ;;  %5284 = vmatprep.subr.mxu1 %v5712_v8 }
 0x3b2   : > { %5254 = vmatpush3.msra.mxu0 %v3219_v31  ;;  %5285 = vmatpush3.msra.mxu1 %v3351_v39  ;;  %v3540_v31 = vld [vmem:[#allocation8 + $0xf8] sm:$0xff]  ;;  %v3624_v39 = vld [vmem:[#allocation8 + $0x28] sm:$0xff] }
 0x3b3   : > { %5255 = vmatprep.subr.mxu0 %v3218_v50  ;;  %5286 = vmatprep.subr.mxu1 %v5712_v8 }
 0x3b4   : > { %5256 = vmatpush3.msra.mxu0 %v3218_v50  ;;  %5287 = vmatpush3.msra.mxu1 %v3350_v59  ;;  %v3623_v59 = vld [vmem:[#allocation8 + $0x20] sm:$0xff] }
 0x3b5   : > { %5257 = vmatprep.subr.mxu0 %v3217_v52  ;;  %5288 = vmatprep.subr.mxu1 %v5712_v8 }
 0x3b6   : > { %5258 = vmatpush3.msra.mxu0 %v3217_v52  ;;  %5289 = vmatpush3.msra.mxu1 %v3349_v45  ;;  %v3539_v52 = vld [vmem:[#allocation8 + $0xf0] sm:$0xff]  ;;  %v3622_v45 = vld [vmem:[#allocation8 + $0x18] sm:$0xff] }
 0x3b7   : > { %5259 = vmatprep.subr.mxu0 %v3216_v19  ;;  %5290 = vmatprep.subr.mxu1 %v5712_v8 }
 0x3b8   : > { %5260 = vmatpush3.msra.mxu0 %v3216_v19  ;;  %5291 = vmatpush3.msra.mxu1 %v3348_v62  ;;  %v3634_v19 = vld [vmem:[#allocation8 + $0x78] sm:$0xff]  ;;  %v3526_v62 = vld [vmem:[#allocation8 + $0x88] sm:$0xff] }
 0x3b9   : > { %5261 = vmatprep.subr.mxu0 %v3215_v40  ;;  %5292 = vmatprep.subr.mxu1 %v5712_v8 }
 0x3ba   : > { %5262 = vmatpush3.msra.mxu0 %v3215_v40  ;;  %5293 = vmatpush3.msra.mxu1 %v3347_v47  ;;  %v3538_v40 = vld [vmem:[#allocation8 + $0xe8] sm:$0xff]  ;;  %v3525_v47 = vld [vmem:[#allocation8 + $0x80] sm:$0xff] }
 0x3bb   : > { %5263 = vmatprep.subr.mxu0 %v3214_v14  ;;  %5294 = vmatprep.subr.mxu1 %v5712_v8 }
 0x3bc   : > { %5264 = vmatpush3.msra.mxu0 %v3214_v14  ;;  %5295 = vmatpush3.msra.mxu1 %v3346_v26  ;;  %v3633_v14 = vld [vmem:[#allocation8 + $0x70] sm:$0xff]  ;;  %v3619_v26 = vld [vmem:[#allocation8] sm:$0xff] }
 0x3bd   : > { %5266 = vmatmul.mubr.msk.f32.vlgmr.msra.gmra.mxu0 %vm6298_vm12, %v3210_v63  ;;  %5303 = vmatprep.subr.mxu0 %v5712_v8  ;;  %v3537_v63 = vld [vmem:[#allocation8 + $0xe0] sm:$0xff] }
 0x3be   : > { %5304 = vmatpush3.msra.mxu0 %v3342_v42  ;;  %5296 = vmatprep.subr.mxu1 %v5712_v8  ;;  %v3536_v42 = vld [vmem:[#allocation8 + $0xd8] sm:$0xff] }
 0x3bf   : > { %5305 = vmatprep.subr.mxu0 %v5712_v8  ;;  %5297 = vmatpush3.msra.mxu1 %v3345_v53 }
 0x3c0   : > { %5306 = vmatpush3.msra.mxu0 %v3341_v41  ;;  %5298 = vmatprep.subr.mxu1 %v5712_v8  ;;  %v3535_v41 = vld [vmem:[#allocation8 + $0xd0] sm:$0xff] }
 0x3c1   : > { %5307 = vmatprep.subr.mxu0 %v5712_v8  ;;  %5299 = vmatpush3.msra.mxu1 %v3344_v27  ;;  %v4093_v27 = vld [vmem:[%s6918_s10] ss:$0 sm:$0xff] }
 0x3c2   : > { %5308 = vmatpush3.msra.mxu0 %v3340_v6  ;;  %5300 = vmatprep.mubr.msk.f32.mxu1 %vm5713_vm6, %v5712_v8  ;;  %v3534_v6 = vld [vmem:[#allocation8 + $0xc8] sm:$0xff] }
 0x3c3   : > { %5309 = vmatprep.subr.mxu0 %v5712_v8  ;;  %5335 = vmatprep.mubr.msk.f32.mxu0 %vm5713_vm6, %v5712_v8 }
 0x3c4   : > { %5310 = vmatpush3.msra.mxu0 %v3339_v11  ;;  %5338 = vmatprep.subr.mxu1 %v5712_v8  ;;  %v3533_v11 = vld [vmem:[#allocation8 + $0xc0] sm:$0xff] }
 0x3c5   : > { %5311 = vmatprep.subr.mxu0 %v5712_v8 }
 0x3c6   : > { %5312 = vmatpush3.msra.mxu0 %v3338_v55  ;;  %v3532_v55 = vld [vmem:[#allocation8 + $0xb8] sm:$0xff] }
 0x3c7   : > { %5313 = vmatprep.subr.mxu0 %v5712_v8 }
 0x3c8   : > { %5314 = vmatpush3.msra.mxu0 %v3337_v24  ;;  %v3531_v24 = vld [vmem:[#allocation8 + $0xb0] sm:$0xff] }
 0x3c9   : > { %5315 = vmatprep.subr.mxu0 %v5712_v8 }
 0x3ca   : > { %5316 = vmatpush3.msra.mxu0 %v3336_v61  ;;  %v3530_v61 = vld [vmem:[#allocation8 + $0xa8] sm:$0xff] }
 0x3cb   : > { %5317 = vmatprep.subr.mxu0 %v5712_v8 }
 0x3cc   : > { %5318 = vmatpush3.msra.mxu0 %v3335_v33  ;;  %v3529_v33 = vld [vmem:[#allocation8 + $0xa0] sm:$0xff] }
 0x3cd   : > { %5319 = vmatprep.subr.mxu0 %v5712_v8 }
 0x3ce   : > { %5320 = vmatpush3.msra.mxu0 %v3334_v7  ;;  %v3528_v7 = vld [vmem:[#allocation8 + $0x98] sm:$0xff] }
 0x3cf   : > { %5321 = vmatprep.subr.mxu0 %v5712_v8 }
 0x3d0   : > { %5322 = vmatpush3.msra.mxu0 %v3333_v44  ;;  %v3527_v44 = vld [vmem:[#allocation8 + $0x90] sm:$0xff] }
 0x3d1   : > { %5323 = vmatprep.subr.mxu0 %v5712_v8 }
 0x3d2   : > { %5324 = vmatpush3.msra.mxu0 %v3332_v21  ;;  %v3621_v21 = vld [vmem:[#allocation8 + $0x10] sm:$0xff] }
 0x3d3   : > { %5325 = vmatprep.subr.mxu0 %v5712_v8 }
 0x3d4   : > { %5326 = vmatpush3.msra.mxu0 %v3331_v48  ;;  %v3620_v48 = vld [vmem:[#allocation8 + $0x8] sm:$0xff] }
 0x3d5   : > { %5327 = vmatprep.subr.mxu0 %v5712_v8 }
 0x3d6   : > { %5328 = vmatpush3.msra.mxu0 %v3330_v0 }
 0x3d7   : > { %5329 = vmatprep.subr.mxu0 %v5712_v8 }
 0x3d8   : > { %5330 = vmatpush3.msra.mxu0 %v3329_v58 }
 0x3d9   : > { %5331 = vmatprep.subr.mxu0 %v5712_v8 }
 0x3da   : > { %5332 = vmatpush3.msra.mxu0 %v3328_v20 }
 0x3db   : > { %5333 = vmatprep.subr.mxu0 %v5712_v8 }
 0x3dc   : > { %5334 = vmatpush3.msra.mxu0 %v3327_v51 }
 0x3dd   : > { %5373 = vmatprep.subr.mxu0 %v5712_v8 }
 0x45d   : > { %v5197_v1 = vpop.f32.mrf.mxu0 }
 0x45e   : > { %v3105_v43 = vadd.f32 %v5197_v1, %v4082_v2 }
 0x45f   : > { %v3099_v23 = vpop.f32.mrf.mxu0 }
 0x460   : > { %v3100_v29 = vadd.f32 %v4082_v2, %v3099_v23  ;;  %v4094_v23 = vld [vmem:[%s6921_s13 + $0x4] ss:$0 sm:$0xff] }
 0x461   : > { %v5232_v25 = vpop.f32.mrf.mxu1 }
 0x462   : > { %v3206_v13 = vadd.f32 %v5232_v25, %v3105_v43  ;;  %v4095_v43 = vld [vmem:[%s6922_s14 + $0x4] ss:$0 sm:$0xff] }
 0x463   : > { %v3196_v10 = vpop.f32.mrf.mxu1 }
 0x464   : > { %v3205_v9 = vadd.f32 %v3196_v10, %v3100_v29 }
 0x47d   : > { %v5267_v12 = vpop.f32.mrf.mxu0 }
 0x47e   : > { %v3306_v37 = vadd.f32 %v5267_v12, %v3206_v13  ;;  %v3724_v13 = vld [vmem:[#allocation8 + $0x178] sm:$0xff] }
 0x47f   : > { %v3296_v4 = vpop.f32.mrf.mxu0 }
 0x480   : > { %vm3308_vm7 = vcmp.ge.f32.partialorder %v3306_v37, 0.0  ;;  %v3310_v3 = vmul.f32 0.01, %v3306_v37  ;;  %v3305_v60 = vadd.f32 %v3296_v4, %v3205_v9  ;;  %v3723_v9 = vld [vmem:[#allocation8 + $0x170] sm:$0xff]  ;;  %v3721_v4 = vld [vmem:[#allocation8 + $0x160] sm:$0xff] }
 0x482   : > { %v3312_v5 = vsel %vm3308_vm7, %v3306_v37, %v3310_v3  ;;  %vm3307_vm9 = vcmp.ge.f32.partialorder %v3305_v60, 0.0  ;;  %v3309_v34 = vmul.f32 0.01, %v3305_v60  ;;  %v3722_v37 = vld [vmem:[#allocation8 + $0x168] sm:$0xff]  ;;  %v3720_v3 = vld [vmem:[#allocation8 + $0x158] sm:$0xff] }
 0x483   : > { %v3319_v54 = vmul.f32 %v4091_v15, %v3312_v5  ;;  %v3716_v5 = vld [vmem:[#allocation8 + $0x138] sm:$0xff] }
 0x484   : > { %v3311_v36 = vsel %vm3307_vm9, %v3305_v60, %v3309_v34  ;;  %v3718_v60 = vld [vmem:[#allocation8 + $0x148] sm:$0xff]  ;;  %v3715_v34 = vld [vmem:[#allocation8 + $0x130] sm:$0xff] }
 0x485   : > { %v3318_v18 = vmul.f32 %v4091_v15, %v3311_v36  ;;  %v3326_v56 = vadd.f32 %v4092_v16, %v3319_v54  ;;  %v3719_v15 = vld [vmem:[#allocation8 + $0x150] sm:$0xff]  ;;  %v3713_v54 = vld [vmem:[#allocation8 + $0x120] sm:$0xff]  ;;  %v3712_v36 = vld [vmem:[#allocation8 + $0x118] sm:$0xff] }
 0x487   : > { %5301 = vmatmul.mubr.f32.vlgmr.msra.gmra.mxu1 %v3326_v56  ;;  %v3325_v50 = vadd.f32 %v4092_v16, %v3318_v18  ;;  %v3714_v16 = vld [vmem:[#allocation8 + $0x128] sm:$0xff]  ;;  %v3711_v18 = vld [vmem:[#allocation8 + $0x110] sm:$0xff] }
 0x488   : > { %5339 = vmatpush3.msra.mxu1 %v3540_v31  ;;  %5370 = vmatprep.mubr.msk.f32.mxu1 %vm5713_vm6, %v5712_v8  ;;  %v3710_v56 = vld [vmem:[#allocation8 + $0x108] sm:$0xff]  ;;  %v3709_v31 = vld [vmem:[#allocation8 + $0x100] sm:$0xff] }
 0x489   : > { %5336 = vmatmul.mubr.f32.vlgmr.msra.gmra.mxu0 %v3325_v50  ;;  %5340 = vmatprep.subr.mxu1 %v5712_v8 }
 0x48a   : > { %5341 = vmatpush3.msra.mxu1 %v3539_v52  ;;  %5374 = vmatpush3.msra.mxu0 %v3634_v19 }
 0x48b   : > { %5342 = vmatprep.subr.mxu1 %v5712_v8  ;;  %5375 = vmatprep.subr.mxu0 %v5712_v8 }
 0x48c   : > { %5343 = vmatpush3.msra.mxu1 %v3538_v40  ;;  %5376 = vmatpush3.msra.mxu0 %v3633_v14 }
 0x48d   : > { %5344 = vmatprep.subr.mxu1 %v5712_v8  ;;  %5377 = vmatprep.subr.mxu0 %v5712_v8 }
 0x48e   : > { %5345 = vmatpush3.msra.mxu1 %v3537_v63  ;;  %5378 = vmatpush3.msra.mxu0 %v3632_v22  ;;  %v4096_v63 = vld [vmem:[%s6920_s12] ss:$0 sm:$0xff] }
 0x48f   : > { %5346 = vmatprep.subr.mxu1 %v5712_v8  ;;  %5379 = vmatprep.subr.mxu0 %v5712_v8 }
 0x490   : > { %5347 = vmatpush3.msra.mxu1 %v3536_v42  ;;  %5380 = vmatpush3.msra.mxu0 %v3631_v17 }
 0x491   : > { %5348 = vmatprep.subr.mxu1 %v5712_v8  ;;  %5381 = vmatprep.subr.mxu0 %v5712_v8 }
 0x492   : > { %5349 = vmatpush3.msra.mxu1 %v3535_v41  ;;  %5382 = vmatpush3.msra.mxu0 %v3630_v46  ;;  %v4101_v46 = vld [vmem:[%s6921_s13 + $0x5] ss:$0 sm:$0xff] }
 0x493   : > { %5350 = vmatprep.subr.mxu1 %v5712_v8  ;;  %5383 = vmatprep.subr.mxu0 %v5712_v8 }
 0x494   : > { %5351 = vmatpush3.msra.mxu1 %v3534_v6  ;;  %5384 = vmatpush3.msra.mxu0 %v3629_v49  ;;  %v4102_v49 = vld [vmem:[%s6922_s14 + $0x5] ss:$0 sm:$0xff] }
 0x495   : > { %5352 = vmatprep.subr.mxu1 %v5712_v8  ;;  %5385 = vmatprep.subr.mxu0 %v5712_v8 }
 0x496   : > { %5353 = vmatpush3.msra.mxu1 %v3533_v11  ;;  %5386 = vmatpush3.msra.mxu0 %v3628_v30 }
 0x497   : > { %5354 = vmatprep.subr.mxu1 %v5712_v8  ;;  %5387 = vmatprep.subr.mxu0 %v5712_v8 }
 0x498   : > { %5355 = vmatpush3.msra.mxu1 %v3532_v55  ;;  %5388 = vmatpush3.msra.mxu0 %v3627_v32 }
 0x499   : > { %5356 = vmatprep.subr.mxu1 %v5712_v8  ;;  %5389 = vmatprep.subr.mxu0 %v5712_v8 }
 0x49a   : > { %5405 = vmatprep.mubr.msk.f32.mxu0 %vm5713_vm6, %v5712_v8  ;;  %5357 = vmatpush3.msra.mxu1 %v3531_v24 }
 0x49b   : > { %5390 = vmatpush3.msra.mxu0 %v3626_v57  ;;  %5358 = vmatprep.subr.mxu1 %v5712_v8 }
 0x49c   : > { %5391 = vmatprep.subr.mxu0 %v5712_v8  ;;  %5359 = vmatpush3.msra.mxu1 %v3530_v61 }
 0x49d   : > { %5360 = vmatprep.subr.mxu1 %v5712_v8  ;;  %5392 = vmatpush3.msra.mxu0 %v3625_v38 }
 0x49e   : > { %5361 = vmatpush3.msra.mxu1 %v3529_v33  ;;  %5393 = vmatprep.subr.mxu0 %v5712_v8 }
 0x49f   : > { %5362 = vmatprep.subr.mxu1 %v5712_v8  ;;  %5394 = vmatpush3.msra.mxu0 %v3624_v39 }
 0x4a0   : > { %5363 = vmatpush3.msra.mxu1 %v3528_v7  ;;  %5395 = vmatprep.subr.mxu0 %v5712_v8 }
 0x4a1   : > { %5364 = vmatprep.subr.mxu1 %v5712_v8  ;;  %5396 = vmatpush3.msra.mxu0 %v3623_v59 }
 0x4a2   : > { %5365 = vmatpush3.msra.mxu1 %v3527_v44  ;;  %5397 = vmatprep.subr.mxu0 %v5712_v8 }
 0x4a3   : > { %5366 = vmatprep.subr.mxu1 %v5712_v8  ;;  %5398 = vmatpush3.msra.mxu0 %v3622_v45 }
 0x4a4   : > { %5367 = vmatpush3.msra.mxu1 %v3526_v62  ;;  %5399 = vmatprep.subr.mxu0 %v5712_v8 }
 0x4a5   : > { %5368 = vmatprep.subr.mxu1 %v5712_v8  ;;  %5400 = vmatpush3.msra.mxu0 %v3621_v21 }
 0x4a6   : > { %5369 = vmatpush3.msra.mxu1 %v3525_v47  ;;  %5401 = vmatprep.subr.mxu0 %v5712_v8 }
 0x4a7   : > { %5402 = vmatpush3.msra.mxu0 %v3620_v48  ;;  %5408 = vmatprep.subr.mxu1 %v5712_v8 }
 0x4a8   : > { %5403 = vmatprep.subr.mxu0 %v5712_v8 }
 0x4a9   : > { %5404 = vmatpush3.msra.mxu0 %v3619_v26 }
 0x547   : > { %v3426_v0 = vpop.f32.mrf.mxu1 }
 0x549   : > { %v5302_v53 = vpop.f32.mrf.mxu1  ;;  %v3496_v58 = vpop.f32.mrf.mxu0 }
 0x54a   : > { %v3497_v20 = vadd.f32 %v3496_v58, %v3426_v0 }
 0x54b   : > { %v5337_v51 = vpop.f32.mrf.mxu0 }
 0x54c   : > { %v3507_v1 = vadd.f32 %v4093_v27, %v3497_v20 }
 0x54e   : > { %vm3508_vm12 = vcmp.ge.f32.partialorder %v3507_v1, 0.0  ;;  %v3509_v2 = vmul.f32 0.01, %v3507_v1 }
 0x550   : > { %v3510_v25 = vsel %vm3508_vm12, %v3507_v1, %v3509_v2 }
 0x551   : > { %v3516_v29 = vmul.f32 %v4094_v23, %v3510_v25 }
 0x553   : > { %v3522_v10 = vadd.f32 %v4095_v43, %v3516_v29 }
 0x555   : > { %5371 = vmatmul.mubr.f32.vlgmr.msra.gmra.mxu1 %v3522_v10  ;;  %v3617_v12 = vrot.slane %v3522_v10, 7  ;;  %v3706_v50 = vrot.slane %v3522_v10, 1 }
 0x556   : > { %5409 = vmatpush3.msra.mxu1 %v3724_v13  ;;  %5440 = vmatprep.mubr.msk.f32.mxu1 %vm5713_vm6, %v5712_v8 }
 0x557   : > { %5410 = vmatprep.subr.mxu1 %v5712_v8  ;;  %5406 = vmatmul.mubr.msk.f32.vlgmr.msra.gmra.mxu0 %vm6254_vm8, %v3617_v12 }
 0x558   : > { %5411 = vmatpush3.msra.mxu1 %v3723_v9 }
 0x559   : > { %5412 = vmatprep.subr.mxu1 %v5712_v8 }
 0x55a   : > { %5413 = vmatpush3.msra.mxu1 %v3722_v37 }
 0x55b   : > { %5414 = vmatprep.subr.mxu1 %v5712_v8 }
 0x55c   : > { %5415 = vmatpush3.msra.mxu1 %v3721_v4 }
 0x55d   : > { %5416 = vmatprep.subr.mxu1 %v5712_v8 }
 0x55e   : > { %5417 = vmatpush3.msra.mxu1 %v3720_v3 }
 0x55f   : > { %5418 = vmatprep.subr.mxu1 %v5712_v8 }
 0x560   : > { %5419 = vmatpush3.msra.mxu1 %v3719_v15 }
 0x561   : > { %5420 = vmatprep.subr.mxu1 %v5712_v8 }
 0x562   : > { %5421 = vmatpush3.msra.mxu1 %v3718_v60 }
 0x563   : > { %5422 = vmatprep.subr.mxu1 %v5712_v8 }
 0x564   : > { %5423 = vmatpush3.msra.mxu1 %v3717_v28 }
 0x565   : > { %5424 = vmatprep.subr.mxu1 %v5712_v8 }
 0x566   : > { %5425 = vmatpush3.msra.mxu1 %v3716_v5 }
 0x567   : > { %5426 = vmatprep.subr.mxu1 %v5712_v8 }
 0x568   : > { %5427 = vmatpush3.msra.mxu1 %v3715_v34 }
 0x569   : > { %5428 = vmatprep.subr.mxu1 %v5712_v8 }
 0x56a   : > { %5429 = vmatpush3.msra.mxu1 %v3714_v16 }
 0x56b   : > { %5430 = vmatprep.subr.mxu1 %v5712_v8 }
 0x56c   : > { %5431 = vmatpush3.msra.mxu1 %v3713_v54 }
 0x56d   : > { %5432 = vmatprep.subr.mxu1 %v5712_v8 }
 0x56e   : > { %5433 = vmatpush3.msra.mxu1 %v3712_v36 }
 0x56f   : > { %5434 = vmatprep.subr.mxu1 %v5712_v8 }
 0x570   : > { %5435 = vmatpush3.msra.mxu1 %v3711_v18 }
 0x571   : > { %5436 = vmatprep.subr.mxu1 %v5712_v8 }
 0x572   : > { %5437 = vmatpush3.msra.mxu1 %v3710_v56 }
 0x573   : > { %5438 = vmatprep.subr.mxu1 %v5712_v8 }
 0x574   : > { %5439 = vmatpush3.msra.mxu1 %v3709_v31 }
 0x575   : > { %5441 = vmatmul.mubr.msk.f32.vlgmr.msra.gmra.mxu1 %vm6270_vm10, %v3706_v50 }
 0x615   : > { %v3613_v52 = vpop.f32.mrf.mxu1 }
 0x616   : > { %v3614_v22 = vadd.f32 %v4096_v63, %v3613_v52 }
 0x617   : > { %v5372_v19 = vpop.f32.mrf.mxu1  ;;  %v3701_v40 = vpop.f32.mrf.mxu0 }
 0x618   : > { %v3705_v42 = vadd.f32 %v3701_v40, %v3614_v22 }
 0x619   : > { %v5407_v14 = vpop.f32.mrf.mxu0 }
 0x635   : > { %v3791_v17 = vpop.f32.mrf.mxu1 }
 0x636   : > { %v3795_v8 = vadd.f32 %v3791_v17, %v3705_v42 }
 0x637   : > { %v5442_v41 = vpop.f32.mrf.mxu1 }
 0x638   : > { %vm3796_vm8 = vcmp.ge.f32.partialorder %v3795_v8, 0.0  ;;  %v3797_v35 = vmul.f32 0.01, %v3795_v8 }
 0x63a   : > { %v3798_v6 = vsel %vm3796_vm8, %v3795_v8, %v3797_v35 }
 0x63b   : > { %v3804_v11 = vmul.f32 %v4101_v46, %v3798_v6 }
 0x63d   : > { %v3810_v30 = vadd.f32 %v4102_v49, %v3804_v11 }
 0x63f   : > { %3811 = vst [vmem:[%s546_s24] sm:$0xff] %v3810_v30 }
 0x640   : > { %5645 = shalt.err (!%p5642_p11)
}
 0x641   : > { %s5646_s21 = scalar_lea.hbm %s3824_s25, 128  ;;  %s5650_s20 = scalar_lea.hbm %s6923_s15, 256 }
 0x642   : > { %p5647_p0 = scmp.ne.s32.totalorder %s3824_s25, %s5646_s21  ;;  %p5651_p3 = scmp.lt.s32.totalorder %s3824_s25, %s6923_s15 }
 0x643   : > { %p5652_p10 = scmp.lt.s32.totalorder %s5650_s20, %s5646_s21 }
 0x644   : > { %p5648_p2 = pnand %p5647_p0, %p5833_p5 }
 0x645   : > { %p5653_p9 = por %p5652_p10, %p5651_p3 }
 0x646   : > { %p5649_p1 = pneg %p5648_p2 }
 0x648   : > { %p5654_p12 = pnand %p5653_p9, %p5649_p1 }
 0x64a   : > { %5657 = shalt.err (!%p5654_p12)
}
 0x64b   : > { %5460 = dma.vmem_to_hbm [thread:$0]  (%p5833_p5), %s3827_s30, 128, %s3824_s25, %s3813_s0  }
 0x64c PF: > { %s6990_s1 = sld [smem:[#allocation17_spill]] }
 0x64d   : > { %s6991_s23 = sld [smem:[#allocation15_spill]] }
 0x652   : > { %p5487_p13 = scmp.ge.s32.totalorder %s6990_s1, 2 }
 0x653   : > { %s3838_s17 = sand.u32 1, %s6991_s23  }
 0x654   : > { %p5476_p4 = pnand %p5487_p13, %p5837_p6  ;;  %s3839_s26 = scalar_lea.sflag [#allocation4], %s3838_s17 }
 0x656   : > { %p5477_p7 = pneg %p5476_p4 }
 0x658   : > { %5687 = dma.done.wait (%p5477_p7), %s3839_s26, 128  }
 0x659   : > { %5689 = vsyncadd (%p5477_p7), %s3839_s26, 4294967168  ;;  %s6993_s21 = sld [smem:[#allocation18_spill]]  ;;  %s6996_s18 = smov %s5696_s19 }
 0x65a   : > { %s6994_s22 = sld [smem:[#allocation16_spill]] }
 0x65b   : > { %s6995_s20 = sld [smem:[#allocation19_spill]] }
 0x65f   : > { %p28_p8 = scmp.ge.s32.totalorder %s6993_s21, 4  }
 0x660   : > { %s6997_s19 = smov %s6994_s22 }
 0x661   :  { %30 = sbr.rel (!%p28_p8) target bundleno = 9 (0x9), region = 148 }
 0x666   :  { %3844 = vsyncpa [#allocation3], 1 }
 0x667   :  { %3846 = vsyncpa [#allocation3 + $0x1], 1 }
 0x668   :  { %3847 = vsyncpa [#allocation6], 1 }
 0x669   :  { %3848 = vsyncpa [#allocation9], 1 }
 0x66a   :  { %3849 = vsyncpa [#allocation4], 1 }
 0x66b   :  { %3851 = vsyncpa [#allocation4 + $0x1], 1 }

</bundles_post_ra>
